<compile_context>
chip_gen: v7x
topology: tpu7x:2x2x1
jax: 0.10.0
libtpu: 0.0.40
codegen_flags: <defaults>
</compile_context>

<pallas_src>
import math
import jax
import jax.numpy as jnp
from jax.experimental import pallas as pl
from jax.experimental.pallas import tpu as pltpu

B, T, F = 2, 8, 16      # batch, time steps, features per step
EMBED = 32              # embed_dim
PROJ = 64               # proj_dim (== d_model: feeds PositionalEncoding(64))
FINAL = 16              # final_dim (unused by the forward pass, kept for fidelity)
D = 64                  # transformer d_model
NHEAD = 4
DH = D // NHEAD
FFN = 128
NLAYERS = 2
NEG = -1e30             # numerically identical to float('-inf') mask after softmax

OUT_W = 128             # lane-dense packed-output width
OUT_COLS = 2            # real logits per (b,t)
ATTN_OFF = 16           # lane offset of the attention block in the packed output

# ---- row layout of the f32 "vecs" slab (rows on 8-sublane boundaries) --------
ROW_W1 = 0              # [wv1|wk1] lanes 0:64, [bv1|bk1] lanes 64:128
ROW_BKV2 = 1            # [bv2|bk2] lanes 0:128
ROW_BOUT = 2            # [bout|0 ] lanes 0:16
ROW_TEMB = 8            # 8 rows, lanes 64:128 = temb (K half alignment)
ROW_PE = 16             # 8 rows, lanes 0:64
ROW_MASK = 24           # 32 rows, lanes 0:64 = mask broadcast to (B*B*T, D)
VEC_ROWS = 56


# ---------------------------------------------------------------------------
# Single fused kernel: stage-1 attention-with-time-embedding + encoder + head.
# ---------------------------------------------------------------------------
def fused_kernel(src_ref, vecs_ref, wmisc_ref, wenc_ref, w2s_ref, benc_ref, out_ref):
    f32 = jnp.float32
    bf16 = jnp.bfloat16

    # ---- unpack slabs (static slices of whole-slab loads; offsets 8/64/128
    # aligned so the relayout cost is a few single-vreg selects) --------------
    vecs = vecs_ref[...]                                          # (56,128) f32
    wkv1 = vecs[ROW_W1:ROW_W1 + 1, 0:2 * EMBED]                   # (1,64)  [wv1|wk1]
    bkv1 = vecs[ROW_W1:ROW_W1 + 1, 2 * EMBED:4 * EMBED]           # (1,64)
    bkv2 = vecs[ROW_BKV2:ROW_BKV2 + 1, :]                         # (1,128) [bv2|bk2]
    boutp = vecs[ROW_BOUT:ROW_BOUT + 1, 0:ATTN_OFF]               # (1,16)
    temb_pad = vecs[ROW_TEMB:ROW_TEMB + T, :]                     # (T,128) [0|temb]
    pe = vecs[ROW_PE:ROW_PE + T, 0:D]                             # (T,64)
    mask_wide = vecs[ROW_MASK:ROW_MASK + B * B * T, 0:D]          # (32,64) additive

    wmisc = wmisc_ref[...]                                        # (64,208) bf16
    wkv2 = wmisc[:, 0:2 * PROJ]                                   # (64,128) block-diag [V|K]
    hproj = wmisc[:, 2 * PROJ:2 * PROJ + D]                       # (64,64) per-head block of ones
    woutp = wmisc[:, 2 * PROJ + D:2 * PROJ + D + ATTN_OFF]        # (64,16) out head, zero-padded

    # ---------------- Stage 1: SelfAttention with TimeEmbedding --------------
    # to_key/to_value first linears fused on the lane axis (per-scalar MLP).
    x = src_ref[...]                                              # [B,T,F]
    hkv = jnp.maximum(x[..., None] * wkv1 + bkv1, 0.0)            # [B,T,F,2E]
    hkv2 = hkv.reshape(B * T * F, 2 * EMBED)                      # (256,64)
    # second linears fused into one lane-dense block-diagonal matmul -> [V|K]
    kv = jnp.maximum(
        jnp.dot(hkv2.astype(bf16), wkv2, preferred_element_type=f32) + bkv2,
        0.0)                                                      # (256,128)
    kv4 = kv.reshape(B, T, F, 2 * PROJ)
    v4 = kv4[..., :PROJ]                                          # lane-offset-0 slice

    # A[b,t,f] = <K[b,t,f,:], temb[t,:]>/sqrt(P); temb is zero-padded onto the
    # K lanes so the K half never has to be sliced out of kv.
    A = jnp.sum(kv4 * temb_pad[None, :, None, :], axis=-1) * (1.0 / math.sqrt(PROJ))
    A = A - jnp.max(A, axis=-1, keepdims=True)
    eA = jnp.exp(A)
    attn = eA * pl.reciprocal(jnp.sum(eA, axis=-1, keepdims=True), approx=True)  # [B,T,F]
    h = jnp.sum(attn[..., None] * v4, axis=2)                     # [B,T,P]

    # ---------------- Encoder: pos-enc + 2 post-norm layers + out head -------
    # As in the PyTorch module, the encoder "sequence" axis is B (mask is BxB
    # causal) and its "batch" axis is T.
    x2 = (h + pe[None, :, :]).reshape(B * T, D)                   # (16,64), stays flat
    scale = 1.0 / math.sqrt(DH)

    def layer_norm(y2, g, b):                                     # y2: [B*T, D]
        mu = jnp.mean(y2, axis=-1, keepdims=True)
        var = jnp.mean((y2 - mu) ** 2, axis=-1, keepdims=True)
        return (y2 - mu) * jax.lax.rsqrt(var + 1e-5) * g + b

    for l in range(NLAYERS):
        wl = wenc_ref[l]                                          # (64,384) bf16
        wqkv = wl[:, 0:3 * D]
        wo = wl[:, 3 * D:4 * D]
        w1 = wl[:, 4 * D:4 * D + FFN]
        w2 = w2s_ref[l]                                           # (128,64) bf16
        bl = benc_ref[l]                                          # (8,128) f32
        bq, bk = bl[0:1, 0:D], bl[0:1, D:2 * D]
        bv, bo = bl[1:2, 0:D], bl[1:2, D:2 * D]
        b1 = bl[2:3, :]
        b2, g1 = bl[3:4, 0:D], bl[3:4, D:2 * D]
        be1, g2 = bl[4:5, 0:D], bl[4:5, D:2 * D]
        be2 = bl[5:6, 0:D]

        # fused Q|K|V projection: one lane-dense (64,192) MXU push
        qkv = jnp.dot(x2.astype(bf16), wqkv, preferred_element_type=f32)
        q3 = (qkv[:, 0 * D:1 * D] + bq).reshape(B, T, D)
        k3 = (qkv[:, 1 * D:2 * D] + bk).reshape(B, T, D)
        v3 = (qkv[:, 2 * D:3 * D] + bv).reshape(B, T, D)

        # head-replicated 64-lane-wide scores: one block-sum MXU matmul, no
        # 4-lane intermediates, no probability re-expansion matmul.
        prod = q3[:, None, :, :] * k3[None, :, :, :]              # [B,B,T,D]
        s = (jnp.dot(prod.reshape(B * B * T, D).astype(bf16), hproj,
                     preferred_element_type=f32) * scale + mask_wide)
        s = s.reshape(B, B, T, D)
        s = s - jnp.max(s, axis=1, keepdims=True)                 # softmax over keys
        e = jnp.exp(s)
        a = e * pl.reciprocal(jnp.sum(e, axis=1, keepdims=True), approx=True)
        ctx2 = jnp.sum(a * v3[None, :, :, :], axis=1).reshape(B * T, D)

        attn_out = jnp.dot(ctx2.astype(bf16), wo, preferred_element_type=f32) + bo
        y = layer_norm(x2 + attn_out, g1, be1)
        ff = jnp.maximum(
            jnp.dot(y.astype(bf16), w1, preferred_element_type=f32) + b1, 0.0)
        ff = jnp.dot(ff.astype(bf16), w2, preferred_element_type=f32) + b2
        x2 = layer_norm(y + ff, g2, be2)

    # output Linear(64,2), zero-padded to 16 lanes so the packed store is unmasked
    out16 = jnp.dot(x2.astype(bf16), woutp, preferred_element_type=f32) + boutp

    # pack [logits | attn | 0] into one lane-dense (16,128) slab: single vst
    attn2 = attn.reshape(B * T, F)                                # (16,16)
    pad = jnp.zeros((B * T, OUT_W - ATTN_OFF - F), f32)           # (16,96)
    out_ref[...] = jnp.concatenate([out16, attn2, pad], axis=-1)  # (16,128)


# ---------------------------------------------------------------------------
# Wrapper / parameters / reference
# ---------------------------------------------------------------------------
def _vmem():
    return pl.BlockSpec(memory_space=pltpu.MemorySpace.VMEM)


_COST = pl.CostEstimate(flops=7_000_000, transcendentals=4_500,
                        bytes_accessed=210_000)


@jax.jit
def forward(src, p):
    # Single call, no grid: entire working set (<1 MiB) lives in VMEM.
    # If B or T ever grows, add a parallel grid axis over T (v7x has 2 TCs).
    slab = pl.pallas_call(
        fused_kernel,
        out_shape=jax.ShapeDtypeStruct((B * T, OUT_W), jnp.float32),
        in_specs=[_vmem()] * 6,
        out_specs=_vmem(),
        cost_estimate=_COST,
    )(src, p['vecs'], p['w_misc'], p['w_enc'], p['w2s'], p['b_enc'])

    out = slab[:, :OUT_COLS].reshape(B, T, 2)
    attn_btf = slab[:, ATTN_OFF:ATTN_OFF + F].reshape(B, T, F)
    attention_weights = jnp.transpose(attn_btf, (2, 0, 1))            # [F,B,T]
    return out, attention_weights


def _linear(key, fan_in, fan_out):
    kw, kb = jax.random.split(key)
    bound = 1.0 / math.sqrt(fan_in)
    w = jax.random.uniform(kw, (fan_in, fan_out), jnp.float32, -bound, bound)
    b = jax.random.uniform(kb, (1, fan_out), jnp.float32, -bound, bound)
    return w, b


def init_params(key):
    ks = jax.random.split(key, 32)
    p = {}
    # SelfAttention / TimeEmbedding
    p['wk1'], p['bk1'] = _linear(ks[0], 1, EMBED)
    p['wk2'], p['bk2'] = _linear(ks[1], EMBED, PROJ)
    p['wv1'], p['bv1'] = _linear(ks[2], 1, EMBED)
    p['wv2'], p['bv2'] = _linear(ks[3], EMBED, PROJ)
    p['wlin'], p['blin'] = _linear(ks[4], 1, 1)
    p['wper'], p['bper'] = _linear(ks[5], 1, EMBED - 1)
    p['wtp'], p['btp'] = _linear(ks[6], EMBED, PROJ)

    def stack(pairs):
        ws, bs = zip(*pairs)
        return jnp.stack(ws), jnp.stack(bs)

    # 2 TransformerEncoderLayers (weights stored as (in, out) so x @ W works)
    p['wq'], p['bq'] = stack([_linear(ks[7 + l], D, D) for l in range(NLAYERS)])
    p['wk'], p['bk'] = stack([_linear(ks[9 + l], D, D) for l in range(NLAYERS)])
    p['wv'], p['bv'] = stack([_linear(ks[11 + l], D, D) for l in range(NLAYERS)])
    p['wo'], p['bo'] = stack([_linear(ks[13 + l], D, D) for l in range(NLAYERS)])
    p['w1'], p['b1'] = stack([_linear(ks[15 + l], D, FFN) for l in range(NLAYERS)])
    p['w2'], p['b2'] = stack([_linear(ks[17 + l], FFN, D) for l in range(NLAYERS)])
    p['g1'] = jnp.ones((NLAYERS, 1, D), jnp.float32)
    p['be1'] = jnp.zeros((NLAYERS, 1, D), jnp.float32)
    p['g2'] = jnp.ones((NLAYERS, 1, D), jnp.float32)
    p['be2'] = jnp.zeros((NLAYERS, 1, D), jnp.float32)
    p['wout'], p['bout'] = _linear(ks[19], D, 2)

    # PositionalEncoding(64), rows 0..T-1
    pos = jnp.arange(T, dtype=jnp.float32)[:, None]
    div = jnp.exp(jnp.arange(0, D, 2, dtype=jnp.float32) * (-math.log(10000.0) / D))
    pe = jnp.zeros((T, D), jnp.float32)
    pe = pe.at[:, 0::2].set(jnp.sin(pos * div)).at[:, 1::2].set(jnp.cos(pos * div))
    p['pe'] = pe

    # causal mask over the encoder "sequence" axis (= B, as in the torch code)
    i = jnp.arange(B)[:, None]
    j = jnp.arange(B)[None, :]
    p['mask'] = jnp.where(j <= i, 0.0, NEG).astype(jnp.float32)       # [B,B]

    # ---- derived, packed parameters consumed by the Pallas kernel ----------
    # TimeEmbedding hoisted out of the kernel: it only depends on t=1..T.
    tv = jnp.arange(1, T + 1, dtype=jnp.float32)[:, None]
    t1 = tv * p['wlin'][0, 0] + p['blin'][0, 0]
    t2 = jnp.sin(tv * p['wper'] + p['bper'])
    temb = jnp.maximum(jnp.concatenate([t1, t2], axis=1) @ p['wtp'] + p['btp'], 0.0)

    # f32 vector slab: first-layer per-scalar weights, small biases, temb
    # (padded onto the K lanes), positional encoding, 64-lane-wide mask.
    mask_wide = jnp.broadcast_to(
        p['mask'][:, :, None, None], (B, B, T, D)).reshape(B * B * T, D)
    vecs = jnp.zeros((VEC_ROWS, 128), jnp.float32)
    vecs = vecs.at[ROW_W1, 0:2 * EMBED].set(
        jnp.concatenate([p['wv1'], p['wk1']], axis=1)[0])
    vecs = vecs.at[ROW_W1, 2 * EMBED:4 * EMBED].set(
        jnp.concatenate([p['bv1'], p['bk1']], axis=1)[0])
    vecs = vecs.at[ROW_BKV2, :].set(
        jnp.concatenate([p['bv2'], p['bk2']], axis=1)[0])
    vecs = vecs.at[ROW_BOUT, 0:2].set(p['bout'][0])
    vecs = vecs.at[ROW_TEMB:ROW_TEMB + T, PROJ:2 * PROJ].set(temb)
    vecs = vecs.at[ROW_PE:ROW_PE + T, 0:D].set(pe)
    vecs = vecs.at[ROW_MASK:ROW_MASK + B * B * T, 0:D].set(mask_wide)
    p['vecs'] = vecs

    # bf16 misc weight slab: block-diagonal [V|K] second stage-1 linear, the
    # per-head block-of-ones score matrix, and the zero-padded output head.
    wkv2 = jnp.zeros((2 * EMBED, 2 * PROJ), jnp.float32)
    wkv2 = wkv2.at[:EMBED, :PROJ].set(p['wv2']).at[EMBED:, PROJ:].set(p['wk2'])
    head_of = jnp.arange(D, dtype=jnp.int32) // DH
    hproj = (head_of[:, None] == head_of[None, :]).astype(jnp.float32)   # (D,D)
    woutp = jnp.zeros((D, ATTN_OFF), jnp.float32).at[:, :2].set(p['wout'])
    p['w_misc'] = jnp.concatenate([wkv2, hproj, woutp], axis=1).astype(jnp.bfloat16)

    # bf16 per-layer encoder weight slab: [wq|wk|wv | wo | w1] on the lane axis.
    p['w_enc'] = jnp.concatenate(
        [p['wq'], p['wk'], p['wv'], p['wo'], p['w1']], axis=2).astype(jnp.bfloat16)
    p['w2s'] = p['w2'].astype(jnp.bfloat16)                           # (L,128,64)

    # f32 per-layer bias/gamma/beta slab, (L, 8, 128), 64-lane fields.
    b_enc = jnp.zeros((NLAYERS, 8, 128), jnp.float32)
    b_enc = b_enc.at[:, 0, 0:D].set(p['bq'][:, 0]).at[:, 0, D:2 * D].set(p['bk'][:, 0])
    b_enc = b_enc.at[:, 1, 0:D].set(p['bv'][:, 0]).at[:, 1, D:2 * D].set(p['bo'][:, 0])
    b_enc = b_enc.at[:, 2, :].set(p['b1'][:, 0])
    b_enc = b_enc.at[:, 3, 0:D].set(p['b2'][:, 0]).at[:, 3, D:2 * D].set(p['g1'][:, 0])
    b_enc = b_enc.at[:, 4, 0:D].set(p['be1'][:, 0]).at[:, 4, D:2 * D].set(p['g2'][:, 0])
    b_enc = b_enc.at[:, 5, 0:D].set(p['be2'][:, 0])
    p['b_enc'] = b_enc
    return p


def _ln(y, g, b):
    mu = y.mean(-1, keepdims=True)
    var = ((y - mu) ** 2).mean(-1, keepdims=True)
    return (y - mu) / jnp.sqrt(var + 1e-5) * g + b


def reference(src, p):
    # pure-JAX replica of the forward pass (eval mode)
    xs = src.reshape(-1, 1)
    K = jax.nn.relu(jax.nn.relu(xs * p['wk1'] + p['bk1']) @ p['wk2'] + p['bk2'])
    V = jax.nn.relu(jax.nn.relu(xs * p['wv1'] + p['bv1']) @ p['wv2'] + p['bv2'])
    K = K.reshape(B, T, F, PROJ)
    V = V.reshape(B, T, F, PROJ)
    tv = jnp.arange(1, T + 1, dtype=jnp.float32)[:, None]
    t1 = tv * p['wlin'][0, 0] + p['blin'][0, 0]
    t2 = jnp.sin(tv * p['wper'] + p['bper'])
    temb = jax.nn.relu(jnp.concatenate([t1, t2], axis=1) @ p['wtp'] + p['btp'])
    A = (K * temb[None, :, None, :]).sum(-1) / math.sqrt(PROJ)
    attn = jax.nn.softmax(A, axis=-1)
    emb = (attn[..., None] * V).sum(2)

    x = emb + p['pe'][None]
    for l in range(NLAYERS):
        x2 = x.reshape(B * T, D)
        q = (x2 @ p['wq'][l] + p['bq'][l]).reshape(B, T, NHEAD, DH)
        k = (x2 @ p['wk'][l] + p['bk'][l]).reshape(B, T, NHEAD, DH)
        v = (x2 @ p['wv'][l] + p['bv'][l]).reshape(B, T, NHEAD, DH)
        s = jnp.einsum('bthd,cthd->bcth', q, k) / math.sqrt(DH)
        s = s + p['mask'][:, :, None, None]
        a = jax.nn.softmax(s, axis=1)
        ctx = jnp.einsum('bcth,cthd->bthd', a, v).reshape(B * T, D)
        y = _ln(x2 + ctx @ p['wo'][l] + p['bo'][l], p['g1'][l], p['be1'][l])
        ff = jax.nn.relu(y @ p['w1'][l] + p['b1'][l]) @ p['w2'][l] + p['b2'][l]
        y = _ln(y + ff, p['g2'][l], p['be2'][l])
        x = y.reshape(B, T, D)
    out = (x.reshape(B * T, D) @ p['wout'] + p['bout']).reshape(B, T, 2)
    return out, jnp.transpose(attn, (2, 0, 1))


if __name__ == "__main__":
    key = jax.random.PRNGKey(0)
    kp, kx = jax.random.split(key)
    params = init_params(kp)
    src = jax.random.normal(kx, (B, T, F), jnp.float32)

    out, attn_w = forward(src, params)
    out, attn_w = jax.block_until_ready((out, attn_w))

    ref_out, ref_attn = reference(src, params)
    assert out.shape == (B, T, 2), out.shape
    assert attn_w.shape == (F, B, T), attn_w.shape
    assert jnp.allclose(out, ref_out, atol=2e-2, rtol=2e-2), \
        float(jnp.max(jnp.abs(out - ref_out)))
    assert jnp.allclose(attn_w, ref_attn, atol=2e-2, rtol=2e-2), \
        float(jnp.max(jnp.abs(attn_w - ref_attn)))
    print("KERNEL_OK")
</pallas_src>

<mosaic_0001>
module attributes {stable_mosaic.version = 11 : i64} {
  func.func @fused_kernel(%arg0: memref<2x8x16xf32, #tpu.memory_space<vmem>>, %arg1: memref<56x128xf32, #tpu.memory_space<vmem>>, %arg2: memref<64x208xbf16, #tpu.memory_space<vmem>>, %arg3: memref<2x64x384xbf16, #tpu.memory_space<vmem>>, %arg4: memref<2x128x64xbf16, #tpu.memory_space<vmem>>, %arg5: memref<2x8x128xf32, #tpu.memory_space<vmem>>, %arg6: memref<16x128xf32, #tpu.memory_space<vmem>>) attributes {dimension_semantics = [], scalar_prefetch = 0 : i64, scratch_operands = 0 : i64, tpu.core_type = #tpu.core_type<tc>} {
    %c0 = arith.constant 0 : index
    %c0_0 = arith.constant 0 : index
    %0 = vector.load %arg1[%c0, %c0_0] : memref<56x128xf32, #tpu.memory_space<vmem>>, vector<56x128xf32>
    %1 = vector.extract_strided_slice %0 {offsets = [0, 0], sizes = [1, 64], strides = [1, 1]} : vector<56x128xf32> to vector<1x64xf32>
    %2 = vector.extract_strided_slice %0 {offsets = [0, 64], sizes = [1, 64], strides = [1, 1]} : vector<56x128xf32> to vector<1x64xf32>
    %3 = vector.extract_strided_slice %0 {offsets = [1, 0], sizes = [1, 128], strides = [1, 1]} : vector<56x128xf32> to vector<1x128xf32>
    %4 = vector.extract_strided_slice %0 {offsets = [2, 0], sizes = [1, 16], strides = [1, 1]} : vector<56x128xf32> to vector<1x16xf32>
    %5 = vector.extract_strided_slice %0 {offsets = [8, 0], sizes = [8, 128], strides = [1, 1]} : vector<56x128xf32> to vector<8x128xf32>
    %6 = vector.extract_strided_slice %0 {offsets = [16, 0], sizes = [8, 64], strides = [1, 1]} : vector<56x128xf32> to vector<8x64xf32>
    %7 = vector.extract_strided_slice %0 {offsets = [24, 0], sizes = [32, 64], strides = [1, 1]} : vector<56x128xf32> to vector<32x64xf32>
    %c0_1 = arith.constant 0 : index
    %c0_2 = arith.constant 0 : index
    %8 = vector.load %arg2[%c0_1, %c0_2] : memref<64x208xbf16, #tpu.memory_space<vmem>>, vector<64x208xbf16>
    %9 = vector.extract_strided_slice %8 {offsets = [0, 0], sizes = [64, 128], strides = [1, 1]} : vector<64x208xbf16> to vector<64x128xbf16>
    %10 = vector.extract_strided_slice %8 {offsets = [0, 128], sizes = [64, 64], strides = [1, 1]} : vector<64x208xbf16> to vector<64x64xbf16>
    %11 = vector.extract_strided_slice %8 {offsets = [0, 192], sizes = [64, 16], strides = [1, 1]} : vector<64x208xbf16> to vector<64x16xbf16>
    %c0_3 = arith.constant 0 : index
    %c0_4 = arith.constant 0 : index
    %c0_5 = arith.constant 0 : index
    %12 = vector.load %arg0[%c0_3, %c0_4, %c0_5] : memref<2x8x16xf32, #tpu.memory_space<vmem>>, vector<2x8x16xf32>
    %13 = vector.shape_cast %12 : vector<2x8x16xf32> to vector<2x8x16x1xf32>
    %14 = vector.shape_cast %1 : vector<1x64xf32> to vector<1x1x1x64xf32>
    %15 = vector.broadcast %13 : vector<2x8x16x1xf32> to vector<2x8x16x64xf32>
    %16 = vector.broadcast %14 : vector<1x1x1x64xf32> to vector<2x8x16x64xf32>
    %17 = arith.mulf %15, %16 : vector<2x8x16x64xf32>
    %18 = vector.shape_cast %2 : vector<1x64xf32> to vector<1x1x1x64xf32>
    %19 = vector.broadcast %18 : vector<1x1x1x64xf32> to vector<2x8x16x64xf32>
    %20 = arith.addf %17, %19 : vector<2x8x16x64xf32>
    %cst = arith.constant 0.000000e+00 : f32
    %21 = vector.broadcast %cst : f32 to vector<2x8x16x64xf32>
    %22 = arith.maximumf %20, %21 : vector<2x8x16x64xf32>
    %23 = vector.shape_cast %22 : vector<2x8x16x64xf32> to vector<256x64xf32>
    %24 = arith.truncf %23 : vector<256x64xf32> to vector<256x64xbf16>
    %cst_6 = arith.constant dense<0.000000e+00> : vector<256x128xf32>
    %25 = tpu.matmul %24, %9, %cst_6 {dimension_numbers = #tpu.dot_dimension_numbers<[1], [0], [0], [1], [0, 0, 1, 1], [], []>} : vector<256x64xbf16>, vector<64x128xbf16>, vector<256x128xf32> -> vector<256x128xf32>
    %26 = vector.broadcast %3 : vector<1x128xf32> to vector<256x128xf32>
    %27 = arith.addf %25, %26 : vector<256x128xf32>
    %cst_7 = arith.constant 0.000000e+00 : f32
    %28 = vector.broadcast %cst_7 : f32 to vector<256x128xf32>
    %29 = arith.maximumf %27, %28 : vector<256x128xf32>
    %30 = vector.shape_cast %29 : vector<256x128xf32> to vector<2x8x16x128xf32>
    %31 = vector.extract_strided_slice %30 {offsets = [0, 0, 0, 0], sizes = [2, 8, 16, 64], strides = [1, 1, 1, 1]} : vector<2x8x16x128xf32> to vector<2x8x16x64xf32>
    %32 = vector.shape_cast %5 : vector<8x128xf32> to vector<1x8x1x128xf32>
    %33 = vector.broadcast %32 : vector<1x8x1x128xf32> to vector<2x8x16x128xf32>
    %34 = arith.mulf %30, %33 : vector<2x8x16x128xf32>
    %cst_8 = arith.constant dense<0.000000e+00> : vector<2x8x16xf32>
    %35 = vector.multi_reduction <add>, %34, %cst_8 [3] : vector<2x8x16x128xf32> to vector<2x8x16xf32>
    %cst_9 = arith.constant 1.250000e-01 : f32
    %36 = vector.broadcast %cst_9 : f32 to vector<2x8x16xf32>
    %37 = arith.mulf %35, %36 : vector<2x8x16xf32>
    %cst_10 = arith.constant dense<0xFF800000> : vector<2x8xf32>
    %38 = vector.multi_reduction <maximumf>, %37, %cst_10 [2] : vector<2x8x16xf32> to vector<2x8xf32>
    %39 = vector.shape_cast %38 : vector<2x8xf32> to vector<2x8x1xf32>
    %40 = vector.broadcast %39 : vector<2x8x1xf32> to vector<2x8x16xf32>
    %41 = arith.subf %37, %40 : vector<2x8x16xf32>
    %42 = math.exp %41 : vector<2x8x16xf32>
    %cst_11 = arith.constant dense<0.000000e+00> : vector<2x8xf32>
    %43 = vector.multi_reduction <add>, %42, %cst_11 [2] : vector<2x8x16xf32> to vector<2x8xf32>
    %44 = vector.shape_cast %43 : vector<2x8xf32> to vector<2x8x1xf32>
    %45 = tpu.reciprocal %44 {approx = true} : vector<2x8x1xf32> -> vector<2x8x1xf32>
    %46 = vector.broadcast %45 : vector<2x8x1xf32> to vector<2x8x16xf32>
    %47 = arith.mulf %42, %46 : vector<2x8x16xf32>
    %48 = vector.shape_cast %47 : vector<2x8x16xf32> to vector<2x8x16x1xf32>
    %49 = vector.broadcast %48 : vector<2x8x16x1xf32> to vector<2x8x16x64xf32>
    %50 = arith.mulf %49, %31 : vector<2x8x16x64xf32>
    %cst_12 = arith.constant dense<0.000000e+00> : vector<2x8x64xf32>
    %51 = vector.multi_reduction <add>, %50, %cst_12 [2] : vector<2x8x16x64xf32> to vector<2x8x64xf32>
    %52 = vector.shape_cast %6 : vector<8x64xf32> to vector<1x8x64xf32>
    %53 = vector.broadcast %52 : vector<1x8x64xf32> to vector<2x8x64xf32>
    %54 = arith.addf %51, %53 : vector<2x8x64xf32>
    %55 = vector.shape_cast %54 : vector<2x8x64xf32> to vector<16x64xf32>
    %c0_13 = arith.constant 0 : index
    %c0_14 = arith.constant 0 : index
    %c0_15 = arith.constant 0 : index
    %56 = vector.load %arg3[%c0_13, %c0_14, %c0_15] : memref<2x64x384xbf16, #tpu.memory_space<vmem>>, vector<1x64x384xbf16>
    %57 = vector.shape_cast %56 : vector<1x64x384xbf16> to vector<64x384xbf16>
    %58 = vector.extract_strided_slice %57 {offsets = [0, 0], sizes = [64, 192], strides = [1, 1]} : vector<64x384xbf16> to vector<64x192xbf16>
    %59 = vector.extract_strided_slice %57 {offsets = [0, 192], sizes = [64, 64], strides = [1, 1]} : vector<64x384xbf16> to vector<64x64xbf16>
    %60 = vector.extract_strided_slice %57 {offsets = [0, 256], sizes = [64, 128], strides = [1, 1]} : vector<64x384xbf16> to vector<64x128xbf16>
    %c0_16 = arith.constant 0 : index
    %c0_17 = arith.constant 0 : index
    %c0_18 = arith.constant 0 : index
    %61 = vector.load %arg4[%c0_16, %c0_17, %c0_18] : memref<2x128x64xbf16, #tpu.memory_space<vmem>>, vector<1x128x64xbf16>
    %62 = vector.shape_cast %61 : vector<1x128x64xbf16> to vector<128x64xbf16>
    %c0_19 = arith.constant 0 : index
    %c0_20 = arith.constant 0 : index
    %c0_21 = arith.constant 0 : index
    %63 = vector.load %arg5[%c0_19, %c0_20, %c0_21] : memref<2x8x128xf32, #tpu.memory_space<vmem>>, vector<1x8x128xf32>
    %64 = vector.shape_cast %63 : vector<1x8x128xf32> to vector<8x128xf32>
    %65 = vector.extract_strided_slice %64 {offsets = [0, 0], sizes = [1, 64], strides = [1, 1]} : vector<8x128xf32> to vector<1x64xf32>
    %66 = vector.extract_strided_slice %64 {offsets = [0, 64], sizes = [1, 64], strides = [1, 1]} : vector<8x128xf32> to vector<1x64xf32>
    %67 = vector.extract_strided_slice %64 {offsets = [1, 0], sizes = [1, 64], strides = [1, 1]} : vector<8x128xf32> to vector<1x64xf32>
    %68 = vector.extract_strided_slice %64 {offsets = [1, 64], sizes = [1, 64], strides = [1, 1]} : vector<8x128xf32> to vector<1x64xf32>
    %69 = vector.extract_strided_slice %64 {offsets = [2, 0], sizes = [1, 128], strides = [1, 1]} : vector<8x128xf32> to vector<1x128xf32>
    %70 = vector.extract_strided_slice %64 {offsets = [3, 0], sizes = [1, 64], strides = [1, 1]} : vector<8x128xf32> to vector<1x64xf32>
    %71 = vector.extract_strided_slice %64 {offsets = [3, 64], sizes = [1, 64], strides = [1, 1]} : vector<8x128xf32> to vector<1x64xf32>
    %72 = vector.extract_strided_slice %64 {offsets = [4, 0], sizes = [1, 64], strides = [1, 1]} : vector<8x128xf32> to vector<1x64xf32>
    %73 = vector.extract_strided_slice %64 {offsets = [4, 64], sizes = [1, 64], strides = [1, 1]} : vector<8x128xf32> to vector<1x64xf32>
    %74 = vector.extract_strided_slice %64 {offsets = [5, 0], sizes = [1, 64], strides = [1, 1]} : vector<8x128xf32> to vector<1x64xf32>
    %75 = arith.truncf %55 : vector<16x64xf32> to vector<16x64xbf16>
    %cst_22 = arith.constant dense<0.000000e+00> : vector<16x192xf32>
    %76 = tpu.matmul %75, %58, %cst_22 {dimension_numbers = #tpu.dot_dimension_numbers<[1], [0], [0], [1], [0, 0, 1, 1], [], []>} : vector<16x64xbf16>, vector<64x192xbf16>, vector<16x192xf32> -> vector<16x192xf32>
    %77 = vector.extract_strided_slice %76 {offsets = [0, 0], sizes = [16, 64], strides = [1, 1]} : vector<16x192xf32> to vector<16x64xf32>
    %78 = vector.broadcast %65 : vector<1x64xf32> to vector<16x64xf32>
    %79 = arith.addf %77, %78 : vector<16x64xf32>
    %80 = vector.shape_cast %79 : vector<16x64xf32> to vector<2x8x64xf32>
    %81 = vector.extract_strided_slice %76 {offsets = [0, 64], sizes = [16, 64], strides = [1, 1]} : vector<16x192xf32> to vector<16x64xf32>
    %82 = vector.broadcast %66 : vector<1x64xf32> to vector<16x64xf32>
    %83 = arith.addf %81, %82 : vector<16x64xf32>
    %84 = vector.shape_cast %83 : vector<16x64xf32> to vector<2x8x64xf32>
    %85 = vector.extract_strided_slice %76 {offsets = [0, 128], sizes = [16, 64], strides = [1, 1]} : vector<16x192xf32> to vector<16x64xf32>
    %86 = vector.broadcast %67 : vector<1x64xf32> to vector<16x64xf32>
    %87 = arith.addf %85, %86 : vector<16x64xf32>
    %88 = vector.shape_cast %87 : vector<16x64xf32> to vector<2x8x64xf32>
    %89 = vector.shape_cast %80 : vector<2x8x64xf32> to vector<2x1x8x64xf32>
    %90 = vector.shape_cast %84 : vector<2x8x64xf32> to vector<1x2x8x64xf32>
    %91 = vector.broadcast %89 : vector<2x1x8x64xf32> to vector<2x2x8x64xf32>
    %92 = vector.broadcast %90 : vector<1x2x8x64xf32> to vector<2x2x8x64xf32>
    %93 = arith.mulf %91, %92 : vector<2x2x8x64xf32>
    %94 = vector.shape_cast %93 : vector<2x2x8x64xf32> to vector<32x64xf32>
    %95 = arith.truncf %94 : vector<32x64xf32> to vector<32x64xbf16>
    %cst_23 = arith.constant dense<0.000000e+00> : vector<32x64xf32>
    %96 = tpu.matmul %95, %10, %cst_23 {dimension_numbers = #tpu.dot_dimension_numbers<[1], [0], [0], [1], [0, 0, 1, 1], [], []>} : vector<32x64xbf16>, vector<64x64xbf16>, vector<32x64xf32> -> vector<32x64xf32>
    %cst_24 = arith.constant 2.500000e-01 : f32
    %97 = vector.broadcast %cst_24 : f32 to vector<32x64xf32>
    %98 = arith.mulf %96, %97 : vector<32x64xf32>
    %99 = arith.addf %98, %7 : vector<32x64xf32>
    %100 = vector.shape_cast %99 : vector<32x64xf32> to vector<2x2x8x64xf32>
    %cst_25 = arith.constant dense<0xFF800000> : vector<2x8x64xf32>
    %101 = vector.multi_reduction <maximumf>, %100, %cst_25 [1] : vector<2x2x8x64xf32> to vector<2x8x64xf32>
    %102 = vector.shape_cast %101 : vector<2x8x64xf32> to vector<2x1x8x64xf32>
    %103 = vector.broadcast %102 : vector<2x1x8x64xf32> to vector<2x2x8x64xf32>
    %104 = arith.subf %100, %103 : vector<2x2x8x64xf32>
    %105 = math.exp %104 : vector<2x2x8x64xf32>
    %cst_26 = arith.constant dense<0.000000e+00> : vector<2x8x64xf32>
    %106 = vector.multi_reduction <add>, %105, %cst_26 [1] : vector<2x2x8x64xf32> to vector<2x8x64xf32>
    %107 = vector.shape_cast %106 : vector<2x8x64xf32> to vector<2x1x8x64xf32>
    %108 = tpu.reciprocal %107 {approx = true} : vector<2x1x8x64xf32> -> vector<2x1x8x64xf32>
    %109 = vector.broadcast %108 : vector<2x1x8x64xf32> to vector<2x2x8x64xf32>
    %110 = arith.mulf %105, %109 : vector<2x2x8x64xf32>
    %111 = vector.shape_cast %88 : vector<2x8x64xf32> to vector<1x2x8x64xf32>
    %112 = vector.broadcast %111 : vector<1x2x8x64xf32> to vector<2x2x8x64xf32>
    %113 = arith.mulf %110, %112 : vector<2x2x8x64xf32>
    %cst_27 = arith.constant dense<0.000000e+00> : vector<2x8x64xf32>
    %114 = vector.multi_reduction <add>, %113, %cst_27 [1] : vector<2x2x8x64xf32> to vector<2x8x64xf32>
    %115 = vector.shape_cast %114 : vector<2x8x64xf32> to vector<16x64xf32>
    %116 = arith.truncf %115 : vector<16x64xf32> to vector<16x64xbf16>
    %cst_28 = arith.constant dense<0.000000e+00> : vector<16x64xf32>
    %117 = tpu.matmul %116, %59, %cst_28 {dimension_numbers = #tpu.dot_dimension_numbers<[1], [0], [0], [1], [0, 0, 1, 1], [], []>} : vector<16x64xbf16>, vector<64x64xbf16>, vector<16x64xf32> -> vector<16x64xf32>
    %118 = vector.broadcast %68 : vector<1x64xf32> to vector<16x64xf32>
    %119 = arith.addf %117, %118 : vector<16x64xf32>
    %120 = arith.addf %55, %119 : vector<16x64xf32>
    %cst_29 = arith.constant dense<0.000000e+00> : vector<16xf32>
    %121 = vector.multi_reduction <add>, %120, %cst_29 [1] : vector<16x64xf32> to vector<16xf32>
    %122 = vector.shape_cast %121 : vector<16xf32> to vector<16x1xf32>
    %cst_30 = arith.constant 6.400000e+01 : f32
    %123 = vector.broadcast %cst_30 : f32 to vector<16x1xf32>
    %124 = arith.divf %122, %123 : vector<16x1xf32>
    %125 = vector.broadcast %124 : vector<16x1xf32> to vector<16x64xf32>
    %126 = arith.subf %120, %125 : vector<16x64xf32>
    %127 = arith.mulf %126, %126 : vector<16x64xf32>
    %cst_31 = arith.constant dense<0.000000e+00> : vector<16xf32>
    %128 = vector.multi_reduction <add>, %127, %cst_31 [1] : vector<16x64xf32> to vector<16xf32>
    %129 = vector.shape_cast %128 : vector<16xf32> to vector<16x1xf32>
    %cst_32 = arith.constant 6.400000e+01 : f32
    %130 = vector.broadcast %cst_32 : f32 to vector<16x1xf32>
    %131 = arith.divf %129, %130 : vector<16x1xf32>
    %132 = vector.broadcast %124 : vector<16x1xf32> to vector<16x64xf32>
    %133 = arith.subf %120, %132 : vector<16x64xf32>
    %cst_33 = arith.constant 9.99999974E-6 : f32
    %134 = vector.broadcast %cst_33 : f32 to vector<16x1xf32>
    %135 = arith.addf %131, %134 : vector<16x1xf32>
    %136 = math.rsqrt %135 : vector<16x1xf32>
    %137 = vector.broadcast %136 : vector<16x1xf32> to vector<16x64xf32>
    %138 = arith.mulf %133, %137 : vector<16x64xf32>
    %139 = vector.broadcast %71 : vector<1x64xf32> to vector<16x64xf32>
    %140 = arith.mulf %138, %139 : vector<16x64xf32>
    %141 = vector.broadcast %72 : vector<1x64xf32> to vector<16x64xf32>
    %142 = arith.addf %140, %141 : vector<16x64xf32>
    %143 = arith.truncf %142 : vector<16x64xf32> to vector<16x64xbf16>
    %cst_34 = arith.constant dense<0.000000e+00> : vector<16x128xf32>
    %144 = tpu.matmul %143, %60, %cst_34 {dimension_numbers = #tpu.dot_dimension_numbers<[1], [0], [0], [1], [0, 0, 1, 1], [], []>} : vector<16x64xbf16>, vector<64x128xbf16>, vector<16x128xf32> -> vector<16x128xf32>
    %145 = vector.broadcast %69 : vector<1x128xf32> to vector<16x128xf32>
    %146 = arith.addf %144, %145 : vector<16x128xf32>
    %cst_35 = arith.constant 0.000000e+00 : f32
    %147 = vector.broadcast %cst_35 : f32 to vector<16x128xf32>
    %148 = arith.maximumf %146, %147 : vector<16x128xf32>
    %149 = arith.truncf %148 : vector<16x128xf32> to vector<16x128xbf16>
    %cst_36 = arith.constant dense<0.000000e+00> : vector<16x64xf32>
    %150 = tpu.matmul %149, %62, %cst_36 {dimension_numbers = #tpu.dot_dimension_numbers<[1], [0], [0], [1], [0, 0, 1, 1], [], []>} : vector<16x128xbf16>, vector<128x64xbf16>, vector<16x64xf32> -> vector<16x64xf32>
    %151 = vector.broadcast %70 : vector<1x64xf32> to vector<16x64xf32>
    %152 = arith.addf %150, %151 : vector<16x64xf32>
    %153 = arith.addf %142, %152 : vector<16x64xf32>
    %cst_37 = arith.constant dense<0.000000e+00> : vector<16xf32>
    %154 = vector.multi_reduction <add>, %153, %cst_37 [1] : vector<16x64xf32> to vector<16xf32>
    %155 = vector.shape_cast %154 : vector<16xf32> to vector<16x1xf32>
    %cst_38 = arith.constant 6.400000e+01 : f32
    %156 = vector.broadcast %cst_38 : f32 to vector<16x1xf32>
    %157 = arith.divf %155, %156 : vector<16x1xf32>
    %158 = vector.broadcast %157 : vector<16x1xf32> to vector<16x64xf32>
    %159 = arith.subf %153, %158 : vector<16x64xf32>
    %160 = arith.mulf %159, %159 : vector<16x64xf32>
    %cst_39 = arith.constant dense<0.000000e+00> : vector<16xf32>
    %161 = vector.multi_reduction <add>, %160, %cst_39 [1] : vector<16x64xf32> to vector<16xf32>
    %162 = vector.shape_cast %161 : vector<16xf32> to vector<16x1xf32>
    %cst_40 = arith.constant 6.400000e+01 : f32
    %163 = vector.broadcast %cst_40 : f32 to vector<16x1xf32>
    %164 = arith.divf %162, %163 : vector<16x1xf32>
    %165 = vector.broadcast %157 : vector<16x1xf32> to vector<16x64xf32>
    %166 = arith.subf %153, %165 : vector<16x64xf32>
    %cst_41 = arith.constant 9.99999974E-6 : f32
    %167 = vector.broadcast %cst_41 : f32 to vector<16x1xf32>
    %168 = arith.addf %164, %167 : vector<16x1xf32>
    %169 = math.rsqrt %168 : vector<16x1xf32>
    %170 = vector.broadcast %169 : vector<16x1xf32> to vector<16x64xf32>
    %171 = arith.mulf %166, %170 : vector<16x64xf32>
    %172 = vector.broadcast %73 : vector<1x64xf32> to vector<16x64xf32>
    %173 = arith.mulf %171, %172 : vector<16x64xf32>
    %174 = vector.broadcast %74 : vector<1x64xf32> to vector<16x64xf32>
    %175 = arith.addf %173, %174 : vector<16x64xf32>
    %c1 = arith.constant 1 : index
    %c0_42 = arith.constant 0 : index
    %c0_43 = arith.constant 0 : index
    %176 = vector.load %arg3[%c1, %c0_42, %c0_43] : memref<2x64x384xbf16, #tpu.memory_space<vmem>>, vector<1x64x384xbf16>
    %177 = vector.shape_cast %176 : vector<1x64x384xbf16> to vector<64x384xbf16>
    %178 = vector.extract_strided_slice %177 {offsets = [0, 0], sizes = [64, 192], strides = [1, 1]} : vector<64x384xbf16> to vector<64x192xbf16>
    %179 = vector.extract_strided_slice %177 {offsets = [0, 192], sizes = [64, 64], strides = [1, 1]} : vector<64x384xbf16> to vector<64x64xbf16>
    %180 = vector.extract_strided_slice %177 {offsets = [0, 256], sizes = [64, 128], strides = [1, 1]} : vector<64x384xbf16> to vector<64x128xbf16>
    %c1_44 = arith.constant 1 : index
    %c0_45 = arith.constant 0 : index
    %c0_46 = arith.constant 0 : index
    %181 = vector.load %arg4[%c1_44, %c0_45, %c0_46] : memref<2x128x64xbf16, #tpu.memory_space<vmem>>, vector<1x128x64xbf16>
    %182 = vector.shape_cast %181 : vector<1x128x64xbf16> to vector<128x64xbf16>
    %c1_47 = arith.constant 1 : index
    %c0_48 = arith.constant 0 : index
    %c0_49 = arith.constant 0 : index
    %183 = vector.load %arg5[%c1_47, %c0_48, %c0_49] : memref<2x8x128xf32, #tpu.memory_space<vmem>>, vector<1x8x128xf32>
    %184 = vector.shape_cast %183 : vector<1x8x128xf32> to vector<8x128xf32>
    %185 = vector.extract_strided_slice %184 {offsets = [0, 0], sizes = [1, 64], strides = [1, 1]} : vector<8x128xf32> to vector<1x64xf32>
    %186 = vector.extract_strided_slice %184 {offsets = [0, 64], sizes = [1, 64], strides = [1, 1]} : vector<8x128xf32> to vector<1x64xf32>
    %187 = vector.extract_strided_slice %184 {offsets = [1, 0], sizes = [1, 64], strides = [1, 1]} : vector<8x128xf32> to vector<1x64xf32>
    %188 = vector.extract_strided_slice %184 {offsets = [1, 64], sizes = [1, 64], strides = [1, 1]} : vector<8x128xf32> to vector<1x64xf32>
    %189 = vector.extract_strided_slice %184 {offsets = [2, 0], sizes = [1, 128], strides = [1, 1]} : vector<8x128xf32> to vector<1x128xf32>
    %190 = vector.extract_strided_slice %184 {offsets = [3, 0], sizes = [1, 64], strides = [1, 1]} : vector<8x128xf32> to vector<1x64xf32>
    %191 = vector.extract_strided_slice %184 {offsets = [3, 64], sizes = [1, 64], strides = [1, 1]} : vector<8x128xf32> to vector<1x64xf32>
    %192 = vector.extract_strided_slice %184 {offsets = [4, 0], sizes = [1, 64], strides = [1, 1]} : vector<8x128xf32> to vector<1x64xf32>
    %193 = vector.extract_strided_slice %184 {offsets = [4, 64], sizes = [1, 64], strides = [1, 1]} : vector<8x128xf32> to vector<1x64xf32>
    %194 = vector.extract_strided_slice %184 {offsets = [5, 0], sizes = [1, 64], strides = [1, 1]} : vector<8x128xf32> to vector<1x64xf32>
    %195 = arith.truncf %175 : vector<16x64xf32> to vector<16x64xbf16>
    %cst_50 = arith.constant dense<0.000000e+00> : vector<16x192xf32>
    %196 = tpu.matmul %195, %178, %cst_50 {dimension_numbers = #tpu.dot_dimension_numbers<[1], [0], [0], [1], [0, 0, 1, 1], [], []>} : vector<16x64xbf16>, vector<64x192xbf16>, vector<16x192xf32> -> vector<16x192xf32>
    %197 = vector.extract_strided_slice %196 {offsets = [0, 0], sizes = [16, 64], strides = [1, 1]} : vector<16x192xf32> to vector<16x64xf32>
    %198 = vector.broadcast %185 : vector<1x64xf32> to vector<16x64xf32>
    %199 = arith.addf %197, %198 : vector<16x64xf32>
    %200 = vector.shape_cast %199 : vector<16x64xf32> to vector<2x8x64xf32>
    %201 = vector.extract_strided_slice %196 {offsets = [0, 64], sizes = [16, 64], strides = [1, 1]} : vector<16x192xf32> to vector<16x64xf32>
    %202 = vector.broadcast %186 : vector<1x64xf32> to vector<16x64xf32>
    %203 = arith.addf %201, %202 : vector<16x64xf32>
    %204 = vector.shape_cast %203 : vector<16x64xf32> to vector<2x8x64xf32>
    %205 = vector.extract_strided_slice %196 {offsets = [0, 128], sizes = [16, 64], strides = [1, 1]} : vector<16x192xf32> to vector<16x64xf32>
    %206 = vector.broadcast %187 : vector<1x64xf32> to vector<16x64xf32>
    %207 = arith.addf %205, %206 : vector<16x64xf32>
    %208 = vector.shape_cast %207 : vector<16x64xf32> to vector<2x8x64xf32>
    %209 = vector.shape_cast %200 : vector<2x8x64xf32> to vector<2x1x8x64xf32>
    %210 = vector.shape_cast %204 : vector<2x8x64xf32> to vector<1x2x8x64xf32>
    %211 = vector.broadcast %209 : vector<2x1x8x64xf32> to vector<2x2x8x64xf32>
    %212 = vector.broadcast %210 : vector<1x2x8x64xf32> to vector<2x2x8x64xf32>
    %213 = arith.mulf %211, %212 : vector<2x2x8x64xf32>
    %214 = vector.shape_cast %213 : vector<2x2x8x64xf32> to vector<32x64xf32>
    %215 = arith.truncf %214 : vector<32x64xf32> to vector<32x64xbf16>
    %cst_51 = arith.constant dense<0.000000e+00> : vector<32x64xf32>
    %216 = tpu.matmul %215, %10, %cst_51 {dimension_numbers = #tpu.dot_dimension_numbers<[1], [0], [0], [1], [0, 0, 1, 1], [], []>} : vector<32x64xbf16>, vector<64x64xbf16>, vector<32x64xf32> -> vector<32x64xf32>
    %cst_52 = arith.constant 2.500000e-01 : f32
    %217 = vector.broadcast %cst_52 : f32 to vector<32x64xf32>
    %218 = arith.mulf %216, %217 : vector<32x64xf32>
    %219 = arith.addf %218, %7 : vector<32x64xf32>
    %220 = vector.shape_cast %219 : vector<32x64xf32> to vector<2x2x8x64xf32>
    %cst_53 = arith.constant dense<0xFF800000> : vector<2x8x64xf32>
    %221 = vector.multi_reduction <maximumf>, %220, %cst_53 [1] : vector<2x2x8x64xf32> to vector<2x8x64xf32>
    %222 = vector.shape_cast %221 : vector<2x8x64xf32> to vector<2x1x8x64xf32>
    %223 = vector.broadcast %222 : vector<2x1x8x64xf32> to vector<2x2x8x64xf32>
    %224 = arith.subf %220, %223 : vector<2x2x8x64xf32>
    %225 = math.exp %224 : vector<2x2x8x64xf32>
    %cst_54 = arith.constant dense<0.000000e+00> : vector<2x8x64xf32>
    %226 = vector.multi_reduction <add>, %225, %cst_54 [1] : vector<2x2x8x64xf32> to vector<2x8x64xf32>
    %227 = vector.shape_cast %226 : vector<2x8x64xf32> to vector<2x1x8x64xf32>
    %228 = tpu.reciprocal %227 {approx = true} : vector<2x1x8x64xf32> -> vector<2x1x8x64xf32>
    %229 = vector.broadcast %228 : vector<2x1x8x64xf32> to vector<2x2x8x64xf32>
    %230 = arith.mulf %225, %229 : vector<2x2x8x64xf32>
    %231 = vector.shape_cast %208 : vector<2x8x64xf32> to vector<1x2x8x64xf32>
    %232 = vector.broadcast %231 : vector<1x2x8x64xf32> to vector<2x2x8x64xf32>
    %233 = arith.mulf %230, %232 : vector<2x2x8x64xf32>
    %cst_55 = arith.constant dense<0.000000e+00> : vector<2x8x64xf32>
    %234 = vector.multi_reduction <add>, %233, %cst_55 [1] : vector<2x2x8x64xf32> to vector<2x8x64xf32>
    %235 = vector.shape_cast %234 : vector<2x8x64xf32> to vector<16x64xf32>
    %236 = arith.truncf %235 : vector<16x64xf32> to vector<16x64xbf16>
    %cst_56 = arith.constant dense<0.000000e+00> : vector<16x64xf32>
    %237 = tpu.matmul %236, %179, %cst_56 {dimension_numbers = #tpu.dot_dimension_numbers<[1], [0], [0], [1], [0, 0, 1, 1], [], []>} : vector<16x64xbf16>, vector<64x64xbf16>, vector<16x64xf32> -> vector<16x64xf32>
    %238 = vector.broadcast %188 : vector<1x64xf32> to vector<16x64xf32>
    %239 = arith.addf %237, %238 : vector<16x64xf32>
    %240 = arith.addf %175, %239 : vector<16x64xf32>
    %cst_57 = arith.constant dense<0.000000e+00> : vector<16xf32>
    %241 = vector.multi_reduction <add>, %240, %cst_57 [1] : vector<16x64xf32> to vector<16xf32>
    %242 = vector.shape_cast %241 : vector<16xf32> to vector<16x1xf32>
    %cst_58 = arith.constant 6.400000e+01 : f32
    %243 = vector.broadcast %cst_58 : f32 to vector<16x1xf32>
    %244 = arith.divf %242, %243 : vector<16x1xf32>
    %245 = vector.broadcast %244 : vector<16x1xf32> to vector<16x64xf32>
    %246 = arith.subf %240, %245 : vector<16x64xf32>
    %247 = arith.mulf %246, %246 : vector<16x64xf32>
    %cst_59 = arith.constant dense<0.000000e+00> : vector<16xf32>
    %248 = vector.multi_reduction <add>, %247, %cst_59 [1] : vector<16x64xf32> to vector<16xf32>
    %249 = vector.shape_cast %248 : vector<16xf32> to vector<16x1xf32>
    %cst_60 = arith.constant 6.400000e+01 : f32
    %250 = vector.broadcast %cst_60 : f32 to vector<16x1xf32>
    %251 = arith.divf %249, %250 : vector<16x1xf32>
    %252 = vector.broadcast %244 : vector<16x1xf32> to vector<16x64xf32>
    %253 = arith.subf %240, %252 : vector<16x64xf32>
    %cst_61 = arith.constant 9.99999974E-6 : f32
    %254 = vector.broadcast %cst_61 : f32 to vector<16x1xf32>
    %255 = arith.addf %251, %254 : vector<16x1xf32>
    %256 = math.rsqrt %255 : vector<16x1xf32>
    %257 = vector.broadcast %256 : vector<16x1xf32> to vector<16x64xf32>
    %258 = arith.mulf %253, %257 : vector<16x64xf32>
    %259 = vector.broadcast %191 : vector<1x64xf32> to vector<16x64xf32>
    %260 = arith.mulf %258, %259 : vector<16x64xf32>
    %261 = vector.broadcast %192 : vector<1x64xf32> to vector<16x64xf32>
    %262 = arith.addf %260, %261 : vector<16x64xf32>
    %263 = arith.truncf %262 : vector<16x64xf32> to vector<16x64xbf16>
    %cst_62 = arith.constant dense<0.000000e+00> : vector<16x128xf32>
    %264 = tpu.matmul %263, %180, %cst_62 {dimension_numbers = #tpu.dot_dimension_numbers<[1], [0], [0], [1], [0, 0, 1, 1], [], []>} : vector<16x64xbf16>, vector<64x128xbf16>, vector<16x128xf32> -> vector<16x128xf32>
    %265 = vector.broadcast %189 : vector<1x128xf32> to vector<16x128xf32>
    %266 = arith.addf %264, %265 : vector<16x128xf32>
    %cst_63 = arith.constant 0.000000e+00 : f32
    %267 = vector.broadcast %cst_63 : f32 to vector<16x128xf32>
    %268 = arith.maximumf %266, %267 : vector<16x128xf32>
    %269 = arith.truncf %268 : vector<16x128xf32> to vector<16x128xbf16>
    %cst_64 = arith.constant dense<0.000000e+00> : vector<16x64xf32>
    %270 = tpu.matmul %269, %182, %cst_64 {dimension_numbers = #tpu.dot_dimension_numbers<[1], [0], [0], [1], [0, 0, 1, 1], [], []>} : vector<16x128xbf16>, vector<128x64xbf16>, vector<16x64xf32> -> vector<16x64xf32>
    %271 = vector.broadcast %190 : vector<1x64xf32> to vector<16x64xf32>
    %272 = arith.addf %270, %271 : vector<16x64xf32>
    %273 = arith.addf %262, %272 : vector<16x64xf32>
    %cst_65 = arith.constant dense<0.000000e+00> : vector<16xf32>
    %274 = vector.multi_reduction <add>, %273, %cst_65 [1] : vector<16x64xf32> to vector<16xf32>
    %275 = vector.shape_cast %274 : vector<16xf32> to vector<16x1xf32>
    %cst_66 = arith.constant 6.400000e+01 : f32
    %276 = vector.broadcast %cst_66 : f32 to vector<16x1xf32>
    %277 = arith.divf %275, %276 : vector<16x1xf32>
    %278 = vector.broadcast %277 : vector<16x1xf32> to vector<16x64xf32>
    %279 = arith.subf %273, %278 : vector<16x64xf32>
    %280 = arith.mulf %279, %279 : vector<16x64xf32>
    %cst_67 = arith.constant dense<0.000000e+00> : vector<16xf32>
    %281 = vector.multi_reduction <add>, %280, %cst_67 [1] : vector<16x64xf32> to vector<16xf32>
    %282 = vector.shape_cast %281 : vector<16xf32> to vector<16x1xf32>
    %cst_68 = arith.constant 6.400000e+01 : f32
    %283 = vector.broadcast %cst_68 : f32 to vector<16x1xf32>
    %284 = arith.divf %282, %283 : vector<16x1xf32>
    %285 = vector.broadcast %277 : vector<16x1xf32> to vector<16x64xf32>
    %286 = arith.subf %273, %285 : vector<16x64xf32>
    %cst_69 = arith.constant 9.99999974E-6 : f32
    %287 = vector.broadcast %cst_69 : f32 to vector<16x1xf32>
    %288 = arith.addf %284, %287 : vector<16x1xf32>
    %289 = math.rsqrt %288 : vector<16x1xf32>
    %290 = vector.broadcast %289 : vector<16x1xf32> to vector<16x64xf32>
    %291 = arith.mulf %286, %290 : vector<16x64xf32>
    %292 = vector.broadcast %193 : vector<1x64xf32> to vector<16x64xf32>
    %293 = arith.mulf %291, %292 : vector<16x64xf32>
    %294 = vector.broadcast %194 : vector<1x64xf32> to vector<16x64xf32>
    %295 = arith.addf %293, %294 : vector<16x64xf32>
    %296 = arith.truncf %295 : vector<16x64xf32> to vector<16x64xbf16>
    %cst_70 = arith.constant dense<0.000000e+00> : vector<16x16xf32>
    %297 = tpu.matmul %296, %11, %cst_70 {dimension_numbers = #tpu.dot_dimension_numbers<[1], [0], [0], [1], [0, 0, 1, 1], [], []>} : vector<16x64xbf16>, vector<64x16xbf16>, vector<16x16xf32> -> vector<16x16xf32>
    %298 = vector.broadcast %4 : vector<1x16xf32> to vector<16x16xf32>
    %299 = arith.addf %297, %298 : vector<16x16xf32>
    %300 = vector.shape_cast %47 : vector<2x8x16xf32> to vector<16x16xf32>
    %cst_71 = arith.constant 0.000000e+00 : f32
    %301 = vector.broadcast %cst_71 : f32 to vector<16x96xf32>
    %302 = tpu.concatenate %299, %300, %301 in 1 : vector<16x16xf32>, vector<16x16xf32>, vector<16x96xf32> -> vector<16x128xf32>
    %c0_72 = arith.constant 0 : index
    %c0_73 = arith.constant 0 : index
    %303 = vector.load %arg6[%c0_72, %c0_73] : memref<16x128xf32, #tpu.memory_space<vmem>>, vector<16x128xf32>
    tpu.vector_store %arg6[%c0_72, %c0_73], %302 {strides = array<i32>} : memref<16x128xf32, #tpu.memory_space<vmem>>, vector<16x128xf32>,
    return
  }
}

</mosaic_0001>

<bundles_post_ra>
// kernel: forward.1
= control target key start
LH: loop header
LB: loop body
LE: loop exit
PB: predicated region body
PF: predicated region fallthrough
CT: control target
= control target key end

     0   :  { %11 = vsyncpa [#allocation3], 0  ;;  %s8200_s0 = inlined_call_operand.hbm [shape: f32[2,8,16], index: 0, kind: input, shape index: {}]   ;;  %s8201_s1 = inlined_call_operand.hbm [shape: f32[56,128], index: 1, kind: input, shape index: {}]   ;;  %s8202_s2 = inlined_call_operand.hbm [shape: bf16[64,208], index: 2, kind: input, shape index: {}]   ;;  %s8203_s3 = inlined_call_operand.vmem [shape: bf16[2,64,384], index: 3, kind: input, shape index: {}]   ;;  %s8204_s4 = inlined_call_operand.vmem [shape: bf16[2,128,64], index: 4, kind: input, shape index: {}]   ;;  %s8205_s5 = inlined_call_operand.hbm [shape: f32[2,8,128], index: 5, kind: input, shape index: {}]   ;;  %s8206_s6 = inlined_call_operand.vmem [shape: f32[16,128], index: 6, kind: output, shape index: {}]  }
   0x1   :  { %12 = vsyncpa [#allocation5], 0 }
   0x2   :  { %13 = vsyncpa [#allocation8], 0  ;;  %s5524_s21 = smov [#allocation4]   ;;  %s5525_s23 = smov [#allocation2]  }
   0x3   :  { %s31_s22 = sshll.u32 %s5524_s21, 4  ;;  %s19_s24 = sshll.u32 %s5525_s23, 4  ;;  %s32_s22 = int_to_ptr.vmem [resolvable:$true] %s31_s22  ;;  %s5570_s24 = int_to_ptr.vmem [resolvable:$true] %s19_s24 }
   0x4   :  { %s5430_s27 = scalar_lea.hbm %s8201_s1, 896 }
   0x5   :  { %p5431_p0 = scmp.ne.s32.totalorder %s8201_s1, %s5430_s27  ;;  %p5434_p1 = scmp.lt.u32.totalorder %s5430_s27, %s8201_s1 }
   0x7   :  { %p5436_p2 = pnand %p5434_p1, %p5431_p0 }
   0x9   :  { %5439 = shalt.err (!%p5436_p2)
}
   0xa   :  { %s5440_s8 = scalar_lea.vmem %s32_s22, 896  ;;  %p5445_p4 = scmp.lt.s32.totalorder %s32_s22, %s32_s22 }
   0xb   :  { %p5441_p3 = scmp.ne.s32.totalorder %s32_s22, %s5440_s8  ;;  %p5446_p5 = scmp.lt.s32.totalorder %s5440_s8, %s5440_s8 }
   0xd   :  { %p5447_p6 = por %p5446_p5, %p5445_p4 }
   0xf   :  { %p5448_p7 = pnand %p5447_p6, %p5441_p3 }
  0x11   :  { %5451 = shalt.err (!%p5448_p7)
}
  0x12   :  { %s5526_s9 = smov 128   ;;  %s5527_s10 = smov 8  }
  0x13   :  { %37 = dma.hbm_to_vmem [thread:$0]  %s8201_s1, 896, %s32_s22, [#allocation5], %s5526_s9, %s5526_s9, %s5527_s10  }
  0x14   :  { %s5452_s15 = scalar_lea.hbm %s8200_s0, 256 }
  0x15   :  { %p5453_p8 = scmp.ne.s32.totalorder %s8200_s0, %s5452_s15  ;;  %p5456_p9 = scmp.lt.u32.totalorder %s5452_s15, %s8200_s0 }
  0x17   :  { %p5458_p10 = pnand %p5456_p9, %p5453_p8 }
  0x19   :  { %5461 = shalt.err (!%p5458_p10)
}
  0x1a   :  { %s5462_s20 = scalar_lea.vmem %s5570_s24, 256  ;;  %p5467_p12 = scmp.lt.s32.totalorder %s5570_s24, %s5570_s24 }
  0x1b   :  { %p5463_p11 = scmp.ne.s32.totalorder %s5570_s24, %s5462_s20  ;;  %p5468_p13 = scmp.lt.s32.totalorder %s5462_s20, %s5462_s20 }
  0x1d   :  { %p5469_p0 = por %p5468_p13, %p5467_p12 }
  0x1f   :  { %p5470_p1 = pnand %p5469_p0, %p5463_p11 }
  0x21   :  { %5473 = shalt.err (!%p5470_p1)
}
  0x22   :  { %25 = dma.hbm_to_vmem [thread:$0]  %s8200_s0, 256, %s5570_s24, [#allocation3], %s5526_s9, %s5526_s9, %s5527_s10  }
  0x23   :  { %s5528_s22 = smov [#allocation6]   ;;  %s5529_s25 = smov [#allocation7]  }
  0x24   :  { %s43_s23 = sshll.u32 %s5528_s22, 4  ;;  %s59_s26 = sshll.u32 %s5529_s25, 4  ;;  %s44_s23 = int_to_ptr.vmem [resolvable:$true] %s43_s23  ;;  %s5607_s26 = int_to_ptr.vmem [resolvable:$true] %s59_s26 }
  0x25   :  { %s5474_s29 = scalar_lea.hbm %s8202_s2, 1024 }
  0x26   :  { %p5475_p2 = scmp.ne.s32.totalorder %s8202_s2, %s5474_s29  ;;  %p5478_p3 = scmp.lt.u32.totalorder %s5474_s29, %s8202_s2 }
  0x28   :  { %p5480_p4 = pnand %p5478_p3, %p5475_p2 }
  0x2a   :  { %5483 = shalt.err (!%p5480_p4)
}
  0x2b   :  { %s5484_s0 = scalar_lea.vmem %s44_s23, 1024  ;;  %p5489_p6 = scmp.lt.s32.totalorder %s44_s23, %s44_s23 }
  0x2c   :  { %p5485_p5 = scmp.ne.s32.totalorder %s44_s23, %s5484_s0  ;;  %p5490_p7 = scmp.lt.s32.totalorder %s5484_s0, %s5484_s0 }
  0x2e   :  { %p5491_p8 = por %p5490_p7, %p5489_p6 }
  0x30   :  { %p5492_p9 = pnand %p5491_p8, %p5485_p5 }
  0x32   :  { %5495 = shalt.err (!%p5492_p9)
}
  0x33   :  { %49 = dma.hbm_to_vmem [thread:$0]  %s8202_s2, 1024, %s44_s23, [#allocation5], %s5526_s9, %s5526_s9, %s5527_s10  }
  0x34   :  { %s5496_s15 = scalar_lea.hbm %s8205_s5, 256 }
  0x35   :  { %p5497_p10 = scmp.ne.s32.totalorder %s8205_s5, %s5496_s15  ;;  %p5500_p11 = scmp.lt.u32.totalorder %s5496_s15, %s8205_s5 }
  0x37   :  { %p5502_p12 = pnand %p5500_p11, %p5497_p10 }
  0x39   :  { %5505 = shalt.err (!%p5502_p12)
}
  0x3a   :  { %s5506_s20 = scalar_lea.vmem %s5607_s26, 256  ;;  %p5511_p0 = scmp.lt.s32.totalorder %s5607_s26, %s5607_s26 }
  0x3b   :  { %p5507_p13 = scmp.ne.s32.totalorder %s5607_s26, %s5506_s20  ;;  %p5512_p1 = scmp.lt.s32.totalorder %s5506_s20, %s5506_s20 }
  0x3d   :  { %p5513_p2 = por %p5512_p1, %p5511_p0 }
  0x3f   :  { %p5514_p3 = pnand %p5513_p2, %p5507_p13 }
  0x41   :  { %5517 = shalt.err (!%p5514_p3)
}
  0x42   :  { %65 = dma.hbm_to_vmem [thread:$0]  %s8205_s5, 256, %s5607_s26, [#allocation8], %s5526_s9, %s5526_s9, %s5527_s10  }
  0x43   :  { %5518 = dma.done.wait [#allocation3], 256  }
  0x44   :  { %5519 = vsyncadd [#allocation3], 4294967040 }
  0x45   :  { %5520 = dma.done.wait [#allocation5], 1920  }
  0x46   :  { %5521 = vsyncadd [#allocation5], 4294965376 }
  0x47   :  { %5522 = dma.done.wait [#allocation8], 256  }
  0x48   :  { %5523 = vsyncadd [#allocation8], 4294967040  ;;  %v96_v0 = vlaneseq  ;;  %v94_v4 = vld [vmem:[#allocation2] sm:$0xff]  ;;  %v5249_v7 = vld [vmem:[#allocation6] ss:$8 sps:$4 sm:$0xff]   ;;  %s5530_s5 = smov 64  }
  0x49   :  { %v5252_v9 = vld [vmem:[#allocation6 + $0x10] ss:$8 sps:$4 sm:$0xff]   ;;  %v5658_v10 = vld [vmem:[#allocation4] sm:$0xff]  ;;  %5072 = vmatprep.subr.bf16.mxu0 %v5249_v7  ;;  %v95_v24 = vld [vmem:[#allocation2 + $0x8] sm:$0xff]  ;;  %vm420_vm0 = vcmask 523264   ;;  %vm923_vm1 = vcmask 130112  }
  0x4a   :  { %v5645_v1 = vshrl.u32 %v96_v0, 7  ;;  %5073 = vmatpush3.bf16.msra.mxu0 %v5249_v7  ;;  %v5255_v11 = vld [vmem:[#allocation6 + $0x20] ss:$8 sps:$4 sm:$0xff]   ;;  %v5258_v16 = vld [vmem:[#allocation6 + $0x30] ss:$8 sps:$4 sm:$0xff]   ;;  %vm1060_vm2 = vcmask 1041409  }
  0x4b   :  { %5074 = vmatprep.subr.bf16.mxu0 %v5252_v9  ;;  %vm1062_vm3 = vcmask 1042434   ;;  %vm1064_vm4 = vcmask 1043459   ;;  %vm1066_vm5 = vcmask 1044484   ;;  %vm1068_vm6 = vcmask 1045509  }
  0x4c   :  { %8283 = vst [vmem:[#allocation12_spill] sm:$0xff] %v5645_v1  ;;  %v5648_v2 = vsub.s32 1, %v5645_v1  ;;  %v5651_v3 = vsub.s32 0, %v5645_v1  ;;  %v5656_v8 = vsub.s32 2, %v5645_v1  ;;  %v5666_v14 = vsub.s32 3, %v5645_v1 }
  0x4d   :  { %v5669_v15 = vsub.s32 4, %v5645_v1  ;;  %v5672_v17 = vsub.s32 5, %v5645_v1  ;;  %v5680_v21 = vsub.s32 6, %v5645_v1  ;;  %v5683_v22 = vsub.s32 7, %v5645_v1 }
  0x4e   :  { %v110_v5 = vrot.slane %v94_v4, %v5648_v2  ;;  %v99_v6 = vrot.slane %v94_v4, %v5651_v3  ;;  %v5662_v12 = vrot.slane %v5658_v10, %v5651_v3  ;;  %v121_v13 = vrot.slane %v94_v4, %v5656_v8  ;;  %5075 = vmatpush3.bf16.msra.mxu0 %v5252_v9 }
  0x4f   :  { %5076 = vmatprep.subr.bf16.mxu0 %v5255_v11  ;;  %v132_v18 = vrot.slane %v94_v4, %v5666_v14  ;;  %v143_v19 = vrot.slane %v94_v4, %v5669_v15  ;;  %v154_v20 = vrot.slane %v94_v4, %v5672_v17  ;;  %v165_v23 = vrot.slane %v94_v4, %v5680_v21 }
  0x50   :  { %112 = vbcast.lane.b32.xlu1 %v110_v5, 256  ;;  %101 = vbcast.lane.b32.xlu0 %v99_v6, 256  ;;  %v176_v25 = vrot.slane %v94_v4, %v5683_v22  ;;  %v187_v26 = vrot.slane %v95_v24, %v5651_v3  ;;  %v198_v27 = vrot.slane %v95_v24, %v5648_v2  ;;  %vm1070_vm7 = vcmask 1046534  }
  0x51   :  { %v209_v28 = vrot.slane %v95_v24, %v5656_v8  ;;  %v220_v29 = vrot.slane %v95_v24, %v5666_v14  ;;  %v231_v30 = vrot.slane %v95_v24, %v5669_v15  ;;  %v242_v31 = vrot.slane %v95_v24, %v5672_v17 }
  0x52   :  { %5077 = vmatpush3.bf16.msra.mxu0 %v5255_v11  ;;  %v253_v32 = vrot.slane %v95_v24, %v5680_v21  ;;  %v264_v33 = vrot.slane %v95_v24, %v5683_v22  ;;  %vm1072_vm8 = vcmask 1047559   ;;  %vm1083_vm9 = vcmask 130048  }
  0x53   :  { %5078 = vmatprep.subr.bf16.mxu0 %v5258_v16  ;;  %vm4723_vm10 = vcmask 261312   ;;  %vm5534_vm11 = vmmov 0   ;;  %vm4878_vm12 = vcmask 261120  }
  0x54   :  { %116 = vbcast.lane.b32.xlu1 %v110_v5, 264  ;;  %105 = vbcast.lane.b32.xlu0 %v99_v6, 264 }
  0x56   :  { %5079 = vmatpush3.bf16.msra.mxu0 %v5258_v16 }
  0x58   :  { %123 = vbcast.lane.b32.xlu1 %v121_v13, 256  ;;  %309 = vrot.lane.b32.xlu0 %v5662_v12, %s5530_s5 }
  0x5c   :  { %134 = vbcast.lane.b32.xlu1 %v132_v18, 256  ;;  %127 = vbcast.lane.b32.xlu0 %v121_v13, 264 }
  0x60   :  { %145 = vbcast.lane.b32.xlu1 %v143_v19, 256  ;;  %138 = vbcast.lane.b32.xlu0 %v132_v18, 264 }
  0x64   :  { %156 = vbcast.lane.b32.xlu1 %v154_v20, 256  ;;  %149 = vbcast.lane.b32.xlu0 %v143_v19, 264 }
  0x68   :  { %167 = vbcast.lane.b32.xlu1 %v165_v23, 256  ;;  %160 = vbcast.lane.b32.xlu0 %v154_v20, 264 }
  0x6c   :  { %178 = vbcast.lane.b32.xlu1 %v176_v25, 256  ;;  %171 = vbcast.lane.b32.xlu0 %v165_v23, 264 }
  0x70   :  { %189 = vbcast.lane.b32.xlu1 %v187_v26, 256  ;;  %182 = vbcast.lane.b32.xlu0 %v176_v25, 264 }
  0x74   :  { %200 = vbcast.lane.b32.xlu1 %v198_v27, 256  ;;  %193 = vbcast.lane.b32.xlu0 %v187_v26, 264 }
  0x78   :  { %211 = vbcast.lane.b32.xlu1 %v209_v28, 256  ;;  %204 = vbcast.lane.b32.xlu0 %v198_v27, 264 }
  0x7c   :  { %222 = vbcast.lane.b32.xlu1 %v220_v29, 256  ;;  %215 = vbcast.lane.b32.xlu0 %v209_v28, 264 }
  0x80   :  { %233 = vbcast.lane.b32.xlu1 %v231_v30, 256  ;;  %226 = vbcast.lane.b32.xlu0 %v220_v29, 264 }
  0x84   :  { %244 = vbcast.lane.b32.xlu1 %v242_v31, 256  ;;  %237 = vbcast.lane.b32.xlu0 %v231_v30, 264 }
  0x88   :  { %255 = vbcast.lane.b32.xlu1 %v253_v32, 256  ;;  %248 = vbcast.lane.b32.xlu0 %v242_v31, 264 }
  0x8c   :  { %266 = vbcast.lane.b32.xlu1 %v264_v33, 256  ;;  %259 = vbcast.lane.b32.xlu0 %v253_v32, 264 }
  0x90   :  { %270 = vbcast.lane.b32.xlu0 %v264_v33, 264 }
  0xc2   :  { %v113_v34 = vpop.permute.xlu1 %112  ;;  %v102_v35 = vpop.permute.xlu0 %101 }
  0xc3   :  { %v278_v39 = vmul.f32 %v5662_v12, %v113_v34  ;;  %v276_v40 = vmul.f32 %v5662_v12, %v102_v35 }
  0xc6   :  { %v117_v36 = vpop.permute.xlu1 %116  ;;  %v106_v37 = vpop.permute.xlu0 %105 }
  0xc7   :  { %v279_v38 = vmul.f32 %v5662_v12, %v117_v36  ;;  %v277_v41 = vmul.f32 %v5662_v12, %v106_v37 }
  0xca   :  { %v124_v42 = vpop.permute.xlu1 %123  ;;  %v5699_v43 = vpop.permute.xlu0 %309 }
  0xcb   :  { %v280_v44 = vmul.f32 %v5662_v12, %v124_v42  ;;  %v312_v45 = vadd.f32 %v5699_v43, %v276_v40  ;;  %v313_v46 = vadd.f32 %v5699_v43, %v277_v41  ;;  %v314_v47 = vadd.f32 %v5699_v43, %v278_v39 }
  0xcc   :  { %v315_v48 = vadd.f32 %v5699_v43, %v279_v38 }
  0xcd   :  { %v344_v49 = vmax.f32 %v312_v45, 0.0  ;;  %v345_v50 = vmax.f32 %v313_v46, 0.0  ;;  %v346_v51 = vmax.f32 %v314_v47, 0.0  ;;  %v316_v57 = vadd.f32 %v5699_v43, %v280_v44 }
  0xce   :  { %v135_v52 = vpop.permute.xlu1 %134  ;;  %v128_v53 = vpop.permute.xlu0 %127  ;;  %v347_v54 = vmax.f32 %v315_v48, 0.0 }
  0xcf   :  { %v282_v55 = vmul.f32 %v5662_v12, %v135_v52  ;;  %v281_v56 = vmul.f32 %v5662_v12, %v128_v53  ;;  %v376_v58 = vpack.c.bf16 %v345_v50, %v344_v49  ;;  %v348_v4 = vmax.f32 %v316_v57, 0.0 }
  0xd0   :  { %v377_v59 = vpack.c.bf16 %v347_v54, %v346_v51 }
  0xd1   :  { %v317_v60 = vadd.f32 %v5699_v43, %v281_v56  ;;  %5080 = vmatprep.mubr.msk.bf16.mxu0 %vm420_vm0, %v376_v58  ;;  %v318_v61 = vadd.f32 %v5699_v43, %v282_v55 }
  0xd2   :  { %v146_v62 = vpop.permute.xlu1 %145  ;;  %v139_v63 = vpop.permute.xlu0 %138  ;;  %5081 = vmatmul.mubr.msk.bf16.vlgmr.msra.gmra.mrb[0].mxu0 %vm420_vm0, %v377_v59 }
  0xd3   :  { %v349_v5 = vmax.f32 %v317_v60, 0.0  ;;  %v284_v6 = vmul.f32 %v5662_v12, %v146_v62  ;;  %v283_v7 = vmul.f32 %v5662_v12, %v139_v63  ;;  %v350_v13 = vmax.f32 %v318_v61, 0.0 }
  0xd5   :  { %v378_v9 = vpack.c.bf16 %v349_v5, %v348_v4  ;;  %v319_v11 = vadd.f32 %v5699_v43, %v283_v7  ;;  %v320_v19 = vadd.f32 %v5699_v43, %v284_v6 }
  0xd6   :  { %v157_v16 = vpop.permute.xlu1 %156  ;;  %v150_v18 = vpop.permute.xlu0 %149 }
  0xd7   :  { %v351_v20 = vmax.f32 %v319_v11, 0.0  ;;  %v286_v23 = vmul.f32 %v5662_v12, %v157_v16  ;;  %v285_v24 = vmul.f32 %v5662_v12, %v150_v18  ;;  %5084 = vmatprep.mubr.msk.bf16.mxu0 %vm420_vm0, %v378_v9  ;;  %v352_v30 = vmax.f32 %v320_v19, 0.0 }
  0xd9   :  { %v379_v25 = vpack.c.bf16 %v351_v20, %v350_v13  ;;  %v321_v26 = vadd.f32 %v5699_v43, %v285_v24  ;;  %v322_v27 = vadd.f32 %v5699_v43, %v286_v23 }
  0xda   :  { %v168_v28 = vpop.permute.xlu1 %167  ;;  %v161_v29 = vpop.permute.xlu0 %160 }
  0xdb   :  { %v353_v31 = vmax.f32 %v321_v26, 0.0  ;;  %v288_v32 = vmul.f32 %v5662_v12, %v168_v28  ;;  %v287_v33 = vmul.f32 %v5662_v12, %v161_v29  ;;  %5085 = vmatmul.mubr.msk.bf16.gmra.mrb[4].mxu0 %vm420_vm0, %v379_v25  ;;  %v354_v36 = vmax.f32 %v322_v27, 0.0 }
  0xdd   :  { %v380_v34 = vpack.c.bf16 %v353_v31, %v352_v30  ;;  %v323_v35 = vadd.f32 %v5699_v43, %v287_v33  ;;  %v324_v39 = vadd.f32 %v5699_v43, %v288_v32 }
  0xde   :  { %v179_v37 = vpop.permute.xlu1 %178  ;;  %v172_v38 = vpop.permute.xlu0 %171 }
  0xdf   :  { %v355_v40 = vmax.f32 %v323_v35, 0.0  ;;  %v290_v41 = vmul.f32 %v5662_v12, %v179_v37  ;;  %v289_v42 = vmul.f32 %v5662_v12, %v172_v38  ;;  %5088 = vmatprep.mubr.msk.bf16.mxu0 %vm420_vm0, %v380_v34  ;;  %v356_v49 = vmax.f32 %v324_v39, 0.0 }
  0xe1   :  { %v381_v44 = vpack.c.bf16 %v355_v40, %v354_v36  ;;  %v325_v45 = vadd.f32 %v5699_v43, %v289_v42  ;;  %v326_v46 = vadd.f32 %v5699_v43, %v290_v41 }
  0xe2   :  { %v190_v47 = vpop.permute.xlu1 %189  ;;  %v183_v48 = vpop.permute.xlu0 %182 }
  0xe3   :  { %v357_v50 = vmax.f32 %v325_v45, 0.0  ;;  %v292_v51 = vmul.f32 %v5662_v12, %v190_v47  ;;  %v291_v52 = vmul.f32 %v5662_v12, %v183_v48  ;;  %5089 = vmatmul.mubr.msk.bf16.gmra.mrb[8].mxu0 %vm420_vm0, %v381_v44  ;;  %v358_v55 = vmax.f32 %v326_v46, 0.0 }
  0xe5   :  { %v382_v53 = vpack.c.bf16 %v357_v50, %v356_v49  ;;  %v327_v54 = vadd.f32 %v5699_v43, %v291_v52  ;;  %v328_v58 = vadd.f32 %v5699_v43, %v292_v51 }
  0xe6   :  { %v201_v56 = vpop.permute.xlu1 %200  ;;  %v194_v57 = vpop.permute.xlu0 %193 }
  0xe7   :  { %v359_v59 = vmax.f32 %v327_v54, 0.0  ;;  %v294_v60 = vmul.f32 %v5662_v12, %v201_v56  ;;  %v293_v61 = vmul.f32 %v5662_v12, %v194_v57  ;;  %5092 = vmatprep.mubr.msk.bf16.mxu0 %vm420_vm0, %v382_v53  ;;  %v360_v7 = vmax.f32 %v328_v58, 0.0 }
  0xe9   :  { %v383_v62 = vpack.c.bf16 %v359_v59, %v358_v55  ;;  %v329_v63 = vadd.f32 %v5699_v43, %v293_v61  ;;  %v330_v4 = vadd.f32 %v5699_v43, %v294_v60 }
  0xea   :  { %v212_v5 = vpop.permute.xlu1 %211  ;;  %v205_v6 = vpop.permute.xlu0 %204 }
  0xeb   :  { %v361_v9 = vmax.f32 %v329_v63, 0.0  ;;  %v296_v11 = vmul.f32 %v5662_v12, %v212_v5  ;;  %v295_v13 = vmul.f32 %v5662_v12, %v205_v6  ;;  %5093 = vmatmul.mubr.msk.bf16.gmra.mrb[12].mxu0 %vm420_vm0, %v383_v62  ;;  %v362_v19 = vmax.f32 %v330_v4, 0.0 }
  0xed   :  { %v384_v16 = vpack.c.bf16 %v361_v9, %v360_v7  ;;  %v331_v18 = vadd.f32 %v5699_v43, %v295_v13  ;;  %v332_v24 = vadd.f32 %v5699_v43, %v296_v11 }
  0xee   :  { %v223_v20 = vpop.permute.xlu1 %222  ;;  %v216_v23 = vpop.permute.xlu0 %215 }
  0xef   :  { %v363_v25 = vmax.f32 %v331_v18, 0.0  ;;  %v298_v26 = vmul.f32 %v5662_v12, %v223_v20  ;;  %v297_v27 = vmul.f32 %v5662_v12, %v216_v23  ;;  %5096 = vmatprep.mubr.msk.bf16.mxu0 %vm420_vm0, %v384_v16  ;;  %v364_v33 = vmax.f32 %v332_v24, 0.0 }
  0xf1   :  { %v385_v28 = vpack.c.bf16 %v363_v25, %v362_v19  ;;  %v333_v29 = vadd.f32 %v5699_v43, %v297_v27  ;;  %v334_v30 = vadd.f32 %v5699_v43, %v298_v26  ;;  %v5531_v25 = vmov 1966171168  }
  0xf2   :  { %v234_v31 = vpop.permute.xlu1 %233  ;;  %v227_v32 = vpop.permute.xlu0 %226  ;;  %v665_v26 = vunpack.c.l.s4 %v5531_v25 }
  0xf3   :  { %v365_v34 = vmax.f32 %v333_v29, 0.0  ;;  %v300_v35 = vmul.f32 %v5662_v12, %v234_v31  ;;  %v299_v36 = vmul.f32 %v5662_v12, %v227_v32  ;;  %5097 = vmatmul.mubr.msk.bf16.gmra.mrb[16].mxu0 %vm420_vm0, %v385_v28  ;;  %v366_v39 = vmax.f32 %v334_v30, 0.0  ;;  %v80_v29 = vld [vmem:[#allocation4 + $0x8] sm:$0xff] }
  0xf4   :  { %v666_v27 = vunpack.c.0.s8 %v665_v26  ;;  %v5780_v31 = vrot.slane %v5658_v10, %v5648_v2 }
  0xf5   :  { %v386_v37 = vpack.c.bf16 %v365_v34, %v364_v33  ;;  %v335_v38 = vadd.f32 %v5699_v43, %v299_v36  ;;  %v336_v42 = vadd.f32 %v5699_v43, %v300_v35 }
  0xf6   :  { %v245_v40 = vpop.permute.xlu1 %244  ;;  %v238_v41 = vpop.permute.xlu0 %237  ;;  %v669_v28 = vsub.s32 %v666_v27, %v5645_v1 }
  0xf7   :  { %v367_v44 = vmax.f32 %v335_v38, 0.0  ;;  %v302_v45 = vmul.f32 %v5662_v12, %v245_v40  ;;  %v301_v46 = vmul.f32 %v5662_v12, %v238_v41  ;;  %5100 = vmatprep.mubr.msk.bf16.mxu0 %vm420_vm0, %v386_v37  ;;  %v368_v52 = vmax.f32 %v336_v42, 0.0 }
  0xf8   :  { %v670_v30 = vrot.slane %v80_v29, %v669_v28  ;;  %v663_v40 = vcombine.high %v80_v29, %v80_v29 }
  0xf9   :  { %v387_v47 = vpack.c.bf16 %v367_v44, %v366_v39  ;;  %v337_v48 = vadd.f32 %v5699_v43, %v301_v46  ;;  %v338_v49 = vadd.f32 %v5699_v43, %v302_v45 }
  0xfa   :  { %v256_v50 = vpop.permute.xlu1 %255  ;;  %v249_v51 = vpop.permute.xlu0 %248  ;;  %v686_v32 = vrot.slane %v670_v30, %v669_v28 }
  0xfb   :  { %v369_v53 = vmax.f32 %v337_v48, 0.0  ;;  %v304_v54 = vmul.f32 %v5662_v12, %v256_v50  ;;  %v303_v55 = vmul.f32 %v5662_v12, %v249_v51  ;;  %5101 = vmatmul.mubr.msk.bf16.gmra.mrb[20].mxu0 %vm420_vm0, %v387_v47  ;;  %v370_v58 = vmax.f32 %v338_v49, 0.0 }
  0xfc   :  { %v5792_v39 = vrot.slane %v686_v32, %v5651_v3  ;;  %v677_v51 = vrot.slane %v663_v40, %v669_v28 }
  0xfd   :  { %v388_v56 = vpack.c.bf16 %v369_v53, %v368_v52  ;;  %v339_v57 = vadd.f32 %v5699_v43, %v303_v55  ;;  %v340_v61 = vadd.f32 %v5699_v43, %v304_v54  ;;  %v708_v54 = vcombine.high %v686_v32, %v686_v32 }
  0xfe   :  { %v267_v59 = vpop.permute.xlu1 %266  ;;  %v260_v60 = vpop.permute.xlu0 %259 }
  0xff   :  { %v371_v62 = vmax.f32 %v339_v57, 0.0  ;;  %v306_v63 = vmul.f32 %v5662_v12, %v267_v59  ;;  %v305_v4 = vmul.f32 %v5662_v12, %v260_v60  ;;  %5104 = vmatprep.mubr.msk.bf16.mxu0 %vm420_vm0, %v388_v56  ;;  %v372_v9 = vmax.f32 %v340_v61, 0.0 }
 0x100   :  { %v679_v59 = vcombine.high %v677_v51, %v677_v51 }
 0x101   :  { %v389_v5 = vpack.c.bf16 %v371_v62, %v370_v58  ;;  %v341_v6 = vadd.f32 %v5699_v43, %v305_v4  ;;  %v342_v11 = vadd.f32 %v5699_v43, %v306_v63 }
 0x102   :  { %v271_v7 = vpop.permute.xlu0 %270 }
 0x103   :  { %v373_v13 = vmax.f32 %v341_v6, 0.0  ;;  %v307_v16 = vmul.f32 %v5662_v12, %v271_v7  ;;  %5105 = vmatmul.mubr.msk.bf16.gmra.mrb[24].mxu0 %vm420_vm0, %v389_v5  ;;  %v374_v20 = vmax.f32 %v342_v11, 0.0  ;;  %v678_v12 = vcombine.high %v670_v30, %v670_v30 }
 0x104   :  { %v5833_v6 = vrot.slane %v708_v54, %v5651_v3 }
 0x105   :  { %v390_v18 = vpack.c.bf16 %v373_v13, %v372_v9  ;;  %v343_v19 = vadd.f32 %v5699_v43, %v307_v16  ;;  %v700_v43 = vrot.slane %v678_v12, %v669_v28  ;;  %v707_v13 = vrot.slane %v679_v59, %v669_v28 }
 0x107   :  { %v375_v23 = vmax.f32 %v343_v19, 0.0  ;;  %5108 = vmatprep.mubr.msk.bf16.mxu0 %vm420_vm0, %v390_v18  ;;  %v5786_v36 = vrot.slane %v700_v43, %v5651_v3  ;;  %v710_v47 = vcombine.high %v700_v43, %v700_v43  ;;  %v5851_v26 = vrot.slane %v707_v13, %v5651_v3 }
 0x109   :  { %v391_v24 = vpack.c.bf16 %v375_v23, %v374_v20  ;;  %v5820_v58 = vrot.slane %v710_v47, %v5651_v3  ;;  %v693_v20 = vrot.slane %v677_v51, %v669_v28 }
 0x10b   :  { %5109 = vmatmul.mubr.msk.bf16.gmra.mrb[28].mxu0 %vm420_vm0, %v391_v24 }
 0x1a5   :  { %v5082_v33 = vpop.f32.mrb[0].mxu0 }
 0x1a6   :  { %v5783_v34 = vadd.f32 %v5082_v33, %v5780_v31  ;;  %v503_v35 = vpop.f32.mrb[1].mxu0  ;;  %v5867_v33 = vrot.slane %v693_v20, %v5651_v3 }
 0x1a7   :  { %v5789_v37 = vadd.f32 %v503_v35, %v5780_v31  ;;  %v5083_v38 = vpop.f32.mrb[2].mxu0 }
 0x1a8   :  { %8284 = vst [vmem:[#allocation13_spill] sm:$0xff] %v5783_v34  ;;  %v8237_v10 = vmax.f32 %v5783_v34, 0.0  ;;  %v5796_v41 = vadd.f32 %v5083_v38, %v5780_v31  ;;  %v506_v42 = vpop.f32.mrb[3].mxu0 }
 0x1a9   :  { %8285 = vst [vmem:[#allocation14_spill] sm:$0xff] %v5789_v37  ;;  %v8233_v44 = vmax.f32 %v5789_v37, 0.0  ;;  %v5800_v45 = vadd.f32 %v506_v42, %v5780_v31  ;;  %v711_v42 = vcombine.high %v707_v13, %v707_v13 }
 0x1aa   :  { %8286 = vst [vmem:[#allocation15_spill] sm:$0xff] %v5796_v41  ;;  %v754_v46 = vmul.f32 %v5786_v36, %v8237_v10  ;;  %v8238_v48 = vmax.f32 %v5796_v41, 0.0 }
 0x1ab   :  { %8287 = vst [vmem:[#allocation16_spill] sm:$0xff] %v5800_v45  ;;  %v8234_v49 = vmax.f32 %v5800_v45, 0.0  ;;  %v752_v50 = vmul.f32 %v5792_v39, %v8233_v44  ;;  %v5885_v54 = vrot.slane %v711_v42, %v5651_v3 }
 0x1ac   :  { %788 = vadd.xlane.f32.xlu0 %v754_v46  ;;  %v755_v57 = vmul.f32 %v5786_v36, %v8238_v48 }
 0x1ad   :  { %784 = vadd.xlane.f32.xlu1 %v752_v50  ;;  %v753_v52 = vmul.f32 %v5792_v39, %v8234_v49 }
 0x1ae   :  { %v5086_v53 = vpop.f32.mrb[4].mxu0 }
 0x1af   :  { %v5814_v55 = vadd.f32 %v5086_v53, %v5780_v31  ;;  %v519_v56 = vpop.f32.mrb[5].mxu0 }
 0x1b0   :  { %v5823_v60 = vadd.f32 %v519_v56, %v5780_v31  ;;  %v5087_v61 = vpop.f32.mrb[6].mxu0  ;;  %786 = vadd.xlane.f32.xlu0 %v753_v52  ;;  %v709_v56 = vcombine.high %v693_v20, %v693_v20 }
 0x1b1   :  { %8288 = vst [vmem:[#allocation17_spill] sm:$0xff] %v5814_v55  ;;  %v8229_v62 = vmax.f32 %v5814_v55, 0.0  ;;  %v5827_v63 = vadd.f32 %v5087_v61, %v5780_v31  ;;  %v522_v4 = vpop.f32.mrb[7].mxu0  ;;  %790 = vadd.xlane.f32.xlu1 %v755_v57 }
 0x1b2   :  { %8289 = vst [vmem:[#allocation18_spill] sm:$0xff] %v5823_v60  ;;  %v5830_v5 = vadd.f32 %v522_v4, %v5780_v31  ;;  %v8236_v7 = vmax.f32 %v5823_v60, 0.0 }
 0x1b3   :  { %8290 = vst [vmem:[#allocation19_spill] sm:$0xff] %v5827_v63  ;;  %v8232_v9 = vmax.f32 %v5827_v63, 0.0  ;;  %v758_v11 = vmul.f32 %v5820_v58, %v8229_v62 }
 0x1b4   :  { %8291 = vst [vmem:[#allocation20_spill] sm:$0xff] %v5830_v5  ;;  %v8235_v16 = vmax.f32 %v5830_v5, 0.0  ;;  %v756_v25 = vmul.f32 %v5833_v6, %v8236_v7 }
 0x1b5   :  { %796 = vadd.xlane.f32.xlu0 %v758_v11  ;;  %v759_v18 = vmul.f32 %v5820_v58, %v8232_v9 }
 0x1b6   :  { %v5090_v19 = vpop.f32.mrb[8].mxu0  ;;  %v757_v43 = vmul.f32 %v5833_v6, %v8235_v16 }
 0x1b7   :  { %v5845_v23 = vadd.f32 %v5090_v19, %v5780_v31  ;;  %v535_v24 = vpop.f32.mrb[9].mxu0  ;;  %798 = vadd.xlane.f32.xlu1 %v759_v18 }
 0x1b8   :  { %v5854_v27 = vadd.f32 %v535_v24, %v5780_v31  ;;  %v5091_v29 = vpop.f32.mrb[10].mxu0 }
 0x1b9   :  { %8292 = vst [vmem:[#allocation21_spill] sm:$0xff] %v5845_v23  ;;  %v8216_v30 = vmax.f32 %v5845_v23, 0.0  ;;  %v5858_v28 = vadd.f32 %v5091_v29, %v5780_v31  ;;  %v538_v12 = vpop.f32.mrb[11].mxu0  ;;  %792 = vadd.xlane.f32.xlu0 %v756_v25  ;;  %v5906_v25 = vrot.slane %v709_v56, %v5651_v3 }
 0x1ba   :  { %8293 = vst [vmem:[#allocation22_spill] sm:$0xff] %v5854_v27  ;;  %v5864_v32 = vadd.f32 %v538_v12, %v5780_v31  ;;  %v8222_v35 = vmax.f32 %v5854_v27, 0.0 }
 0x1bb   :  { %8294 = vst [vmem:[#allocation23_spill] sm:$0xff] %v5858_v28  ;;  %v8220_v38 = vmax.f32 %v5858_v28, 0.0  ;;  %794 = vadd.xlane.f32.xlu1 %v757_v43  ;;  %v762_v40 = vmul.f32 %v5851_v26, %v8216_v30 }
 0x1bc   :  { %8295 = vst [vmem:[#allocation24_spill] sm:$0xff] %v5864_v32  ;;  %v8227_v46 = vmax.f32 %v5864_v32, 0.0  ;;  %v760_v53 = vmul.f32 %v5867_v33, %v8222_v35 }
 0x1bd   :  { %804 = vadd.xlane.f32.xlu0 %v762_v40  ;;  %v763_v47 = vmul.f32 %v5851_v26, %v8220_v38 }
 0x1be   :  { %v5094_v50 = vpop.f32.mrb[12].mxu0  ;;  %v761_v13 = vmul.f32 %v5867_v33, %v8227_v46  ;;  %v6031_v46 = vand.u32 127, %v96_v0 }
 0x1bf   :  { %v5879_v51 = vadd.f32 %v5094_v50, %v5780_v31  ;;  %v551_v52 = vpop.f32.mrb[13].mxu0  ;;  %806 = vadd.xlane.f32.xlu1 %v763_v47 }
 0x1c0   :  { %v5888_v57 = vadd.f32 %v551_v52, %v5780_v31  ;;  %v5095_v59 = vpop.f32.mrb[14].mxu0  ;;  %8316 = vst [vmem:[#allocation45_spill] sm:$0xff] %v6031_v46  ;;  %v6045_v9 = vsub.s32 %v6031_v46, %v5645_v1 }
 0x1c1   :  { %8296 = vst [vmem:[#allocation25_spill] sm:$0xff] %v5879_v51  ;;  %v8207_v61 = vmax.f32 %v5879_v51, 0.0  ;;  %v5892_v4 = vadd.f32 %v5095_v59, %v5780_v31  ;;  %v554_v11 = vpop.f32.mrb[15].mxu0  ;;  %800 = vadd.xlane.f32.xlu0 %v760_v53 }
 0x1c2   :  { %8297 = vst [vmem:[#allocation26_spill] sm:$0xff] %v5888_v57  ;;  %v5898_v18 = vadd.f32 %v554_v11, %v5780_v31  ;;  %v8210_v19 = vmax.f32 %v5888_v57, 0.0 }
 0x1c3   :  { %8298 = vst [vmem:[#allocation27_spill] sm:$0xff] %v5892_v4  ;;  %v8208_v20 = vmax.f32 %v5892_v4, 0.0  ;;  %802 = vadd.xlane.f32.xlu1 %v761_v13  ;;  %v766_v24 = vmul.f32 %v5885_v54, %v8207_v61 }
 0x1c4   :  { %8299 = vst [vmem:[#allocation28_spill] sm:$0xff] %v5898_v18  ;;  %v8214_v29 = vmax.f32 %v5898_v18, 0.0  ;;  %v764_v47 = vmul.f32 %v5906_v25, %v8210_v19 }
 0x1c5   :  { %812 = vadd.xlane.f32.xlu0 %v766_v24  ;;  %v767_v12 = vmul.f32 %v5885_v54, %v8208_v20 }
 0x1c6   :  { %v5098_v43 = vpop.f32.mrb[16].mxu0  ;;  %v765_v11 = vmul.f32 %v5906_v25, %v8214_v29 }
 0x1c7   :  { %v5913_v40 = vadd.f32 %v5098_v43, %v5780_v31  ;;  %v567_v42 = vpop.f32.mrb[17].mxu0  ;;  %814 = vadd.xlane.f32.xlu1 %v767_v12 }
 0x1c8   :  { %v5919_v50 = vadd.f32 %v567_v42, %v5780_v31  ;;  %v5099_v52 = vpop.f32.mrb[18].mxu0 }
 0x1c9   :  { %8300 = vst [vmem:[#allocation29_spill] sm:$0xff] %v5913_v40  ;;  %v8209_v53 = vmax.f32 %v5913_v40, 0.0  ;;  %v5923_v56 = vadd.f32 %v5099_v52, %v5780_v31  ;;  %v570_v59 = vpop.f32.mrb[19].mxu0  ;;  %808 = vadd.xlane.f32.xlu0 %v764_v47 }
 0x1ca   :  { %8301 = vst [vmem:[#allocation30_spill] sm:$0xff] %v5919_v50  ;;  %v5929_v13 = vadd.f32 %v570_v59, %v5780_v31  ;;  %v8211_v24 = vmax.f32 %v5919_v50, 0.0 }
 0x1cb   :  { %8302 = vst [vmem:[#allocation31_spill] sm:$0xff] %v5923_v56  ;;  %v8212_v12 = vmax.f32 %v5923_v56, 0.0  ;;  %810 = vadd.xlane.f32.xlu1 %v765_v11  ;;  %v770_v43 = vmul.f32 %v5786_v36, %v8209_v53 }
 0x1cc   :  { %8303 = vst [vmem:[#allocation32_spill] sm:$0xff] %v5929_v13  ;;  %v8213_v42 = vmax.f32 %v5929_v13, 0.0  ;;  %v768_v11 = vmul.f32 %v5792_v39, %v8211_v24 }
 0x1cd   :  { %820 = vadd.xlane.f32.xlu0 %v770_v43  ;;  %v771_v47 = vmul.f32 %v5786_v36, %v8212_v12 }
 0x1ce   :  { %v5102_v52 = vpop.f32.mrb[20].mxu0 }
 0x1cf   :  { %v5941_v59 = vadd.f32 %v5102_v52, %v5780_v31  ;;  %v583_v61 = vpop.f32.mrb[21].mxu0  ;;  %822 = vadd.xlane.f32.xlu1 %v771_v47  ;;  %v769_v52 = vmul.f32 %v5792_v39, %v8213_v42 }
 0x1d0   :  { %v5947_v20 = vadd.f32 %v583_v61, %v5780_v31  ;;  %v5103_v53 = vpop.f32.mrb[22].mxu0 }
 0x1d1   :  { %8304 = vst [vmem:[#allocation33_spill] sm:$0xff] %v5941_v59  ;;  %v8215_v43 = vmax.f32 %v5941_v59, 0.0  ;;  %v5951_v19 = vadd.f32 %v5103_v53, %v5780_v31  ;;  %v586_v36 = vpop.f32.mrb[23].mxu0  ;;  %816 = vadd.xlane.f32.xlu0 %v768_v11 }
 0x1d2   :  { %8305 = vst [vmem:[#allocation34_spill] sm:$0xff] %v5947_v20  ;;  %v5957_v47 = vadd.f32 %v586_v36, %v5780_v31  ;;  %v8218_v24 = vmax.f32 %v5947_v20, 0.0 }
 0x1d3   :  { %8306 = vst [vmem:[#allocation35_spill] sm:$0xff] %v5951_v19  ;;  %v8217_v61 = vmax.f32 %v5951_v19, 0.0  ;;  %818 = vadd.xlane.f32.xlu1 %v769_v52  ;;  %v774_v12 = vmul.f32 %v5820_v58, %v8215_v43 }
 0x1d4   :  { %8307 = vst [vmem:[#allocation36_spill] sm:$0xff] %v5957_v47  ;;  %v8219_v53 = vmax.f32 %v5957_v47, 0.0  ;;  %v772_v52 = vmul.f32 %v5833_v6, %v8218_v24 }
 0x1d5   :  { %828 = vadd.xlane.f32.xlu0 %v774_v12  ;;  %v775_v11 = vmul.f32 %v5820_v58, %v8217_v61 }
 0x1d6   :  { %v5106_v39 = vpop.f32.mrb[24].mxu0 }
 0x1d7   :  { %v5969_v36 = vadd.f32 %v5106_v39, %v5780_v31  ;;  %v599_v42 = vpop.f32.mrb[25].mxu0  ;;  %830 = vadd.xlane.f32.xlu1 %v775_v11  ;;  %v773_v39 = vmul.f32 %v5833_v6, %v8219_v53 }
 0x1d8   :  { %v5975_v29 = vadd.f32 %v599_v42, %v5780_v31  ;;  %v5107_v43 = vpop.f32.mrb[26].mxu0 }
 0x1d9   :  { %8308 = vst [vmem:[#allocation37_spill] sm:$0xff] %v5969_v36  ;;  %v8221_v12 = vmax.f32 %v5969_v36, 0.0  ;;  %v5979_v30 = vadd.f32 %v5107_v43, %v5780_v31  ;;  %v602_v58 = vpop.f32.mrb[27].mxu0  ;;  %824 = vadd.xlane.f32.xlu0 %v772_v52 }
 0x1da   :  { %8309 = vst [vmem:[#allocation38_spill] sm:$0xff] %v5975_v29  ;;  %v5985_v11 = vadd.f32 %v602_v58, %v5780_v31  ;;  %v8225_v61 = vmax.f32 %v5975_v29, 0.0 }
 0x1db   :  { %8310 = vst [vmem:[#allocation39_spill] sm:$0xff] %v5979_v30  ;;  %v8223_v42 = vmax.f32 %v5979_v30, 0.0  ;;  %826 = vadd.xlane.f32.xlu1 %v773_v39  ;;  %v778_v24 = vmul.f32 %v5851_v26, %v8221_v12 }
 0x1dc   :  { %8311 = vst [vmem:[#allocation40_spill] sm:$0xff] %v5985_v11  ;;  %v8226_v43 = vmax.f32 %v5985_v11, 0.0  ;;  %v776_v58 = vmul.f32 %v5867_v33, %v8225_v61 }
 0x1dd   :  { %836 = vadd.xlane.f32.xlu0 %v778_v24  ;;  %v779_v52 = vmul.f32 %v5851_v26, %v8223_v42 }
 0x1de   :  { %v5110_v6 = vpop.f32.mrb[28].mxu0  ;;  %v777_v26 = vmul.f32 %v5867_v33, %v8226_v43 }
 0x1df   :  { %v615_v53 = vpop.f32.mrb[29].mxu0  ;;  %838 = vadd.xlane.f32.xlu1 %v779_v52  ;;  %v6000_v39 = vadd.f32 %v5110_v6, %v5780_v31 }
 0x1e0   :  { %v6003_v38 = vadd.f32 %v615_v53, %v5780_v31  ;;  %v5111_v12 = vpop.f32.mrb[30].mxu0 }
 0x1e1   :  { %8312 = vst [vmem:[#allocation41_spill] sm:$0xff] %v6000_v39  ;;  %v6006_v24 = vadd.f32 %v5111_v12, %v5780_v31  ;;  %v618_v35 = vpop.f32.mrb[31].mxu0  ;;  %832 = vadd.xlane.f32.xlu0 %v776_v58  ;;  %v8230_v6 = vmax.f32 %v6000_v39, 0.0 }
 0x1e2   :  { %8313 = vst [vmem:[#allocation42_spill] sm:$0xff] %v6003_v38  ;;  %v8224_v52 = vmax.f32 %v6003_v38, 0.0  ;;  %v6013_v42 = vadd.f32 %v618_v35, %v5780_v31 }
 0x1e3   :  { %8314 = vst [vmem:[#allocation43_spill] sm:$0xff] %v6006_v24  ;;  %834 = vadd.xlane.f32.xlu1 %v777_v26  ;;  %v8231_v58 = vmax.f32 %v6006_v24, 0.0  ;;  %v782_v31 = vmul.f32 %v5885_v54, %v8230_v6 }
 0x1e4   :  { %8315 = vst [vmem:[#allocation44_spill] sm:$0xff] %v6013_v42  ;;  %v8228_v53 = vmax.f32 %v6013_v42, 0.0  ;;  %v780_v12 = vmul.f32 %v5906_v25, %v8224_v52 }
 0x1e5   :  { %v783_v35 = vmul.f32 %v5885_v54, %v8231_v58 }
 0x1e6   :  { %840 = vadd.xlane.f32.xlu0 %v780_v12  ;;  %v781_v33 = vmul.f32 %v5906_v25, %v8228_v53 }
 0x1e8   :  { %842 = vadd.xlane.f32.xlu1 %v781_v33  ;;  %v918_v33 = vadd.s32 4294967288, %v6031_v46 }
 0x1ea   :  { %844 = vadd.xlane.f32.xlu0 %v782_v31  ;;  %v6035_v31 = vsub.s32 %v918_v33, %v5645_v1 }
 0x1ec   :  { %846 = vadd.xlane.f32.xlu1 %v783_v35 }
 0x239   :  { %v789_v26 = vpop.xlane.xlu0 %788 }
 0x23a   :  { %v785_v52 = vpop.xlane.xlu1 %784  ;;  %v6047_v0 = vmul.f32 0.125, %v789_v26 }
 0x23b   :  { %v6049_v44 = vmul.f32 0.125, %v785_v52 }
 0x23c   :  { %v928_v26 = vrot.slane %v6047_v0, %v6045_v9 }
 0x23d   :  { %v787_v61 = vpop.xlane.xlu0 %786  ;;  %v917_v52 = vrot.slane %v6049_v44, %v6045_v9 }
 0x23e   :  { %v791_v43 = vpop.xlane.xlu1 %790  ;;  %v6037_v6 = vmul.f32 0.125, %v787_v61 }
 0x23f   :  { %v6039_v54 = vmul.f32 0.125, %v791_v43 }
 0x240   :  { %v922_v61 = vrot.slane %v6037_v6, %v6035_v31 }
 0x241   :  { %v932_v43 = vrot.slane %v6039_v54, %v6035_v31 }
 0x242   :  { %v797_v12 = vpop.xlane.xlu0 %796  ;;  %v924_v24 = vsel %vm923_vm1, %v922_v61, %v917_v52 }
 0x243   :  { %v933_v38 = vsel %vm923_vm1, %v932_v43, %v928_v26  ;;  %v6073_v42 = vmul.f32 0.125, %v797_v12 }
 0x244   :  { %v799_v25 = vpop.xlane.xlu1 %798  ;;  %v1061_v61 = vsel %vm1060_vm2, %v933_v38, %v924_v24 }
 0x245   :  { %v6063_v7 = vmul.f32 0.125, %v799_v25  ;;  %v946_v12 = vrot.slane %v6073_v42, %v6045_v9 }
 0x246   :  { %v793_v53 = vpop.xlane.xlu0 %792 }
 0x247   :  { %v6051_v16 = vmul.f32 0.125, %v793_v53 }
 0x248   :  { %v795_v62 = vpop.xlane.xlu1 %794 }
 0x249   :  { %v6041_v58 = vmul.f32 0.125, %v795_v62  ;;  %v937_v10 = vrot.slane %v6051_v16, %v6045_v9 }
 0x24a   :  { %v805_v35 = vpop.xlane.xlu0 %804 }
 0x24b   :  { %v941_v62 = vrot.slane %v6041_v58, %v6035_v31 }
 0x24c   :  { %v807_v49 = vpop.xlane.xlu1 %806 }
 0x24d   :  { %v942_v25 = vsel %vm923_vm1, %v941_v62, %v937_v10  ;;  %v6080_v29 = vmul.f32 0.125, %v807_v49  ;;  %v6088_v62 = vmul.f32 0.125, %v805_v35 }
 0x24e   :  { %v801_v33 = vpop.xlane.xlu0 %800  ;;  %v1063_v10 = vsel %vm1062_vm3, %v942_v25, %v1061_v61 }
 0x24f   :  { %v6067_v48 = vmul.f32 0.125, %v801_v33  ;;  %v950_v33 = vrot.slane %v6063_v7, %v6035_v31  ;;  %v968_v24 = vrot.slane %v6080_v29, %v6035_v31  ;;  %v964_v25 = vrot.slane %v6088_v62, %v6045_v9 }
 0x250   :  { %v803_v53 = vpop.xlane.xlu1 %802 }
 0x251   :  { %v6069_v39 = vmul.f32 0.125, %v803_v53  ;;  %v955_v43 = vrot.slane %v6067_v48, %v6045_v9  ;;  %v951_v38 = vsel %vm923_vm1, %v950_v33, %v946_v12  ;;  %v969_v12 = vsel %vm923_vm1, %v968_v24, %v964_v25 }
 0x252   :  { %v813_v36 = vpop.xlane.xlu0 %812  ;;  %v1065_v35 = vsel %vm1064_vm4, %v951_v38, %v1063_v10 }
 0x253   :  { %v959_v30 = vrot.slane %v6069_v39, %v6035_v31  ;;  %v6098_v59 = vmul.f32 0.125, %v813_v36 }
 0x254   :  { %v815_v53 = vpop.xlane.xlu1 %814 }
 0x255   :  { %v6090_v26 = vmul.f32 0.125, %v815_v53  ;;  %v960_v49 = vsel %vm923_vm1, %v959_v30, %v955_v43 }
 0x256   :  { %v809_v52 = vpop.xlane.xlu0 %808  ;;  %v1067_v61 = vsel %vm1066_vm5, %v960_v49, %v1065_v35 }
 0x257   :  { %v6093_v11 = vmul.f32 0.125, %v809_v52  ;;  %v986_v30 = vrot.slane %v6090_v26, %v6035_v31  ;;  %v1069_v52 = vsel %vm1068_vm6, %v969_v12, %v1067_v61 }
 0x258   :  { %v811_v19 = vpop.xlane.xlu1 %810 }
 0x259   :  { %v6100_v50 = vmul.f32 0.125, %v811_v19  ;;  %v973_v33 = vrot.slane %v6093_v11, %v6045_v9  ;;  %v982_v19 = vrot.slane %v6098_v59, %v6045_v9 }
 0x25a   :  { %v821_v53 = vpop.xlane.xlu0 %820 }
 0x25b   :  { %v977_v36 = vrot.slane %v6100_v50, %v6035_v31  ;;  %v987_v38 = vsel %vm923_vm1, %v986_v30, %v982_v19 }
 0x25c   :  { %v823_v43 = vpop.xlane.xlu1 %822 }
 0x25d   :  { %v978_v10 = vsel %vm923_vm1, %v977_v36, %v973_v33  ;;  %v6125_v36 = vmul.f32 0.125, %v823_v43 }
 0x25e   :  { %v817_v49 = vpop.xlane.xlu0 %816  ;;  %v1071_v35 = vsel %vm1070_vm7, %v978_v10, %v1069_v52  ;;  %v6131_v10 = vmul.f32 0.125, %v821_v53 }
 0x25f   :  { %v1073_v13 = vsel %vm1072_vm8, %v987_v38, %v1071_v35  ;;  %v6127_v30 = vmul.f32 0.125, %v817_v49  ;;  %v1004_v52 = vrot.slane %v6125_v36, %v6035_v31 }
 0x260   :  { %v819_v20 = vpop.xlane.xlu1 %818  ;;  %v1084_v47 = vsel %vm1083_vm9, %v1073_v13, -inf  ;;  %v1000_v56 = vrot.slane %v6131_v10, %v6045_v9 }
 0x261   :  { %1085 = vmax.xlane.f32.xlu0 %v1084_v47  ;;  %v6121_v40 = vmul.f32 0.125, %v819_v20  ;;  %v991_v43 = vrot.slane %v6127_v30, %v6045_v9 }
 0x262   :  { %v829_v51 = vpop.xlane.xlu0 %828  ;;  %v1005_v23 = vsel %vm923_vm1, %v1004_v52, %v1000_v56 }
 0x263   :  { %v995_v13 = vrot.slane %v6121_v40, %v6035_v31 }
 0x264   :  { %v831_v4 = vpop.xlane.xlu1 %830 }
 0x265   :  { %v6141_v49 = vmul.f32 0.125, %v831_v4  ;;  %v996_v57 = vsel %vm923_vm1, %v995_v13, %v991_v43  ;;  %v6154_v4 = vmul.f32 0.125, %v829_v51 }
 0x266   :  { %v825_v24 = vpop.xlane.xlu0 %824  ;;  %v1074_v32 = vsel %vm1060_vm2, %v1005_v23, %v996_v57 }
 0x267   :  { %v6129_v12 = vmul.f32 0.125, %v825_v24  ;;  %v1022_v28 = vrot.slane %v6141_v49, %v6035_v31 }
 0x268   :  { %v827_v25 = vpop.xlane.xlu1 %826 }
 0x269   :  { %v6123_v61 = vmul.f32 0.125, %v827_v25  ;;  %v1009_v53 = vrot.slane %v6129_v12, %v6045_v9  ;;  %v8263_v25 = vmov 0  }
 0x26a   :  { %v837_v33 = vpop.xlane.xlu0 %836  ;;  %5248 = vset.pattern.permute.xlu1 %v8263_v25  ;;  %5247 = vset.pattern.permute.xlu0 %v8263_v25 }
 0x26b   :  { %v1013_v20 = vrot.slane %v6123_v61, %v6035_v31  ;;  %2231 = vmatprep.mubr.bf16.mxu1 %v8263_v25  ;;  %v6173_v25 = vmul.f32 0.125, %v837_v33 }
 0x26c   :  { %v839_v19 = vpop.xlane.xlu1 %838 }
 0x26d   :  { %v1014_v18 = vsel %vm923_vm1, %v1013_v20, %v1009_v53  ;;  %v6163_v27 = vmul.f32 0.125, %v839_v19  ;;  %v1018_v20 = vrot.slane %v6154_v4, %v6045_v9 }
 0x26e   :  { %v833_v47 = vpop.xlane.xlu0 %832  ;;  %v1075_v53 = vsel %vm1062_vm3, %v1014_v18, %v1074_v32 }
 0x26f   :  { %v6145_v35 = vmul.f32 0.125, %v833_v47  ;;  %v1023_v23 = vsel %vm923_vm1, %v1022_v28, %v1018_v20  ;;  %v1040_v57 = vrot.slane %v6163_v27, %v6035_v31 }
 0x270   :  { %v835_v38 = vpop.xlane.xlu1 %834  ;;  %v1076_v33 = vsel %vm1064_vm4, %v1023_v23, %v1075_v53 }
 0x271   :  { %v6147_v24 = vmul.f32 0.125, %v835_v38  ;;  %v1027_v51 = vrot.slane %v6145_v35, %v6045_v9 }
 0x273   :  { %v1031_v47 = vrot.slane %v6147_v24, %v6035_v31  ;;  %v841_v38 = vpop.xlane.xlu0 %840 }
 0x274   :  { %v6168_v13 = vmul.f32 0.125, %v841_v38 }
 0x275   :  { %v843_v43 = vpop.xlane.xlu1 %842  ;;  %v1032_v19 = vsel %vm923_vm1, %v1031_v47, %v1027_v51  ;;  %v1036_v47 = vrot.slane %v6173_v25, %v6045_v9 }
 0x276   :  { %v6175_v56 = vmul.f32 0.125, %v843_v43  ;;  %v1045_v32 = vrot.slane %v6168_v13, %v6045_v9  ;;  %v1077_v28 = vsel %vm1066_vm5, %v1032_v19, %v1076_v33 }
 0x277   :  { %v845_v52 = vpop.xlane.xlu0 %844  ;;  %v1041_v63 = vsel %vm923_vm1, %v1040_v57, %v1036_v47 }
 0x278   :  { %v1049_v38 = vrot.slane %v6175_v56, %v6035_v31  ;;  %v6183_v55 = vmul.f32 0.125, %v845_v52  ;;  %v1078_v37 = vsel %vm1068_vm6, %v1041_v63, %v1077_v28 }
 0x279   :  { %v847_v18 = vpop.xlane.xlu1 %846 }
 0x27a   :  { %v6190_v51 = vmul.f32 0.125, %v847_v18  ;;  %v1050_v43 = vsel %vm923_vm1, %v1049_v38, %v1045_v32  ;;  %v1054_v20 = vrot.slane %v6183_v55, %v6045_v9 }
 0x27b   :  { %v1079_v23 = vsel %vm1070_vm7, %v1050_v43, %v1078_v37 }
 0x27c   :  { %v1058_v52 = vrot.slane %v6190_v51, %v6035_v31 }
 0x27e   :  { %v1059_v53 = vsel %vm923_vm1, %v1058_v52, %v1054_v20 }
 0x27f   :  { %v1080_v18 = vsel %vm1072_vm8, %v1059_v53, %v1079_v23 }
 0x280   :  { %v1087_v19 = vsel %vm1083_vm9, %v1080_v18, -inf }
 0x281   :  { %1088 = vmax.xlane.f32.xlu1 %v1087_v19 }
 0x2ee   :  { %v1086_v38 = vpop.xlane.xlu0 %1085 }
 0x2ef   :  { %v1095_v32 = vrot.slane %v1086_v38, %v5651_v3  ;;  %v1099_v33 = vrot.slane %v1086_v38, %v5648_v2  ;;  %v1103_v45 = vrot.slane %v1086_v38, %v5656_v8  ;;  %v1107_v57 = vrot.slane %v1086_v38, %v5666_v14 }
 0x2f0   :  { %v1111_v52 = vrot.slane %v1086_v38, %v5669_v15 }
 0x2f1   :  { %v1172_v63 = vsub.f32 %v6049_v44, %v1095_v32  ;;  %v1173_v47 = vsub.f32 %v6037_v6, %v1095_v32  ;;  %v1177_v37 = vsub.f32 %v6041_v58, %v1103_v45  ;;  %v1174_v28 = vsub.f32 %v6047_v0, %v1099_v33 }
 0x2f2   :  { %v1179_v23 = vsub.f32 %v6063_v7, %v1107_v57  ;;  %v1175_v19 = vsub.f32 %v6039_v54, %v1099_v33  ;;  %v1115_v44 = vrot.slane %v1086_v38, %v5672_v17  ;;  %v1181_v58 = vsub.f32 %v6069_v39, %v1111_v52 }
 0x2f3   :  { %v1204_v43 = vmul.f32 1.442695, %v1172_v63  ;;  %v1206_v20 = vmul.f32 1.442695, %v1173_v47  ;;  %v1214_v53 = vmul.f32 1.442695, %v1177_v37  ;;  %v1176_v32 = vsub.f32 %v6051_v16, %v1103_v45 }
 0x2f4   :  { %v1208_v18 = vmul.f32 1.442695, %v1174_v28  ;;  %v1218_v6 = vmul.f32 1.442695, %v1179_v23  ;;  %v1210_v0 = vmul.f32 1.442695, %v1175_v19  ;;  %v1119_v63 = vrot.slane %v1086_v38, %v5680_v21 }
 0x2f5   :  { %5310 = vpow2.f32 %v1204_v43  ;;  %v1222_v47 = vmul.f32 1.442695, %v1181_v58  ;;  %v1183_v7 = vsub.f32 %v6080_v29, %v1115_v44  ;;  %v1212_v37 = vmul.f32 1.442695, %v1176_v32 }
 0x2f6   :  { %5312 = vpow2.f32 %v1206_v20  ;;  %v1178_v54 = vsub.f32 %v6073_v42, %v1107_v57  ;;  %v1123_v39 = vrot.slane %v1086_v38, %v5683_v22  ;;  %v1185_v16 = vsub.f32 %v6100_v50, %v1119_v63 }
 0x2f7   :  { %5314 = vpow2.f32 %v1214_v53  ;;  %v1226_v45 = vmul.f32 1.442695, %v1183_v7  ;;  %v1180_v43 = vsub.f32 %v6067_v48, %v1111_v52  ;;  %v1182_v50 = vsub.f32 %v6088_v62, %v1115_v44 }
 0x2f8   :  { %5316 = vpow2.f32 %v1208_v18  ;;  %v1216_v29 = vmul.f32 1.442695, %v1178_v54  ;;  %v1230_v38 = vmul.f32 1.442695, %v1185_v16  ;;  %v1187_v57 = vsub.f32 %v6090_v26, %v1123_v39 }
 0x2f9   :  { %5318 = vpow2.f32 %v1218_v6  ;;  %v1220_v53 = vmul.f32 1.442695, %v1180_v43  ;;  %v1224_v52 = vmul.f32 1.442695, %v1182_v50  ;;  %v1184_v19 = vsub.f32 %v6093_v11, %v1119_v63 }
 0x2fa   :  { %5320 = vpow2.f32 %v1210_v0  ;;  %v1234_v48 = vmul.f32 1.442695, %v1187_v57  ;;  %v1186_v58 = vsub.f32 %v6098_v59, %v1123_v39 }
 0x2fb   :  { %5322 = vpow2.f32 %v1222_v47  ;;  %v1228_v44 = vmul.f32 1.442695, %v1184_v19 }
 0x2fc   :  { %5324 = vpow2.f32 %v1212_v37  ;;  %v1232_v54 = vmul.f32 1.442695, %v1186_v58 }
 0x2fd   :  { %5326 = vpow2.f32 %v1226_v45 }
 0x2fe   :  { %5328 = vpow2.f32 %v1216_v29 }
 0x2ff   :  { %v6221_v33 = vpop.eup %5310  ;;  %5330 = vpow2.f32 %v1230_v38 }
 0x300   :  { %v6223_v28 = vpop.eup %5312  ;;  %1301 = vperm.xlu0 %5247, %v6221_v33   ;;  %5332 = vpow2.f32 %v1220_v53 }
 0x301   :  { %1304 = vperm.xlu1 %5248, %v6223_v28   ;;  %v6230_v20 = vpop.eup %5314  ;;  %5334 = vpow2.f32 %v1234_v48 }
 0x302   :  { %v6232_v42 = vpop.eup %5316  ;;  %5336 = vpow2.f32 %v1224_v52 }
 0x303   :  { %v6238_v23 = vpop.eup %5318  ;;  %5338 = vpow2.f32 %v1228_v44 }
 0x304   :  { %1316 = vperm.xlu0 %5247, %v6230_v20   ;;  %v6240_v18 = vpop.eup %5320 }
 0x305   :  { %1307 = vperm.xlu1 %5248, %v6232_v42   ;;  %v6245_v6 = vpop.eup %5322 }
 0x306   :  { %v6247_v26 = vpop.eup %5324 }
 0x307   :  { %v6252_v0 = vpop.eup %5326 }
 0x308   :  { %1322 = vperm.xlu0 %5247, %v6238_v23   ;;  %v6259_v47 = vpop.eup %5328 }
 0x309   :  { %1310 = vperm.xlu1 %5248, %v6240_v18   ;;  %v6270_v45 = vpop.eup %5330 }
 0x30a   :  { %v6272_v29 = vpop.eup %5332 }
 0x30b   :  { %v6283_v53 = vpop.eup %5334 }
 0x30c   :  { %1328 = vperm.xlu0 %5247, %v6245_v6   ;;  %v6285_v50 = vpop.eup %5336 }
 0x30d   :  { %1313 = vperm.xlu1 %5248, %v6247_v26   ;;  %v6295_v44 = vpop.eup %5338 }
 0x30e   :  { %v1089_v62 = vpop.xlane.xlu1 %1088 }
 0x30f   :  { %v1127_v32 = vrot.slane %v1089_v62, %v5651_v3  ;;  %v1135_v11 = vrot.slane %v1089_v62, %v5656_v8  ;;  %v6257_v63 = vrot.slane %v1089_v62, %v5666_v14  ;;  %v6263_v7 = vrot.slane %v1089_v62, %v5669_v15 }
 0x310   :  { %1334 = vperm.xlu0 %5247, %v6252_v0   ;;  %v6276_v43 = vrot.slane %v1089_v62, %v5672_v17  ;;  %v1131_v38 = vrot.slane %v1089_v62, %v5648_v2  ;;  %v6289_v48 = vrot.slane %v1089_v62, %v5680_v21  ;;  %v1155_v58 = vrot.slane %v1089_v62, %v5683_v22 }
 0x311   :  { %1319 = vperm.xlu1 %5248, %v6259_v47   ;;  %v1193_v59 = vsub.f32 %v6123_v61, %v1135_v11  ;;  %v1195_v37 = vsub.f32 %v6141_v49, %v6257_v63  ;;  %v1188_v39 = vsub.f32 %v6127_v30, %v1127_v32  ;;  %v1197_v49 = vsub.f32 %v6147_v24, %v6263_v7 }
 0x312   :  { %v1189_v57 = vsub.f32 %v6121_v40, %v1127_v32  ;;  %v1199_v24 = vsub.f32 %v6163_v27, %v6276_v43  ;;  %v1190_v40 = vsub.f32 %v6131_v10, %v1131_v38  ;;  %v1203_v62 = vsub.f32 %v6190_v51, %v1155_v58 }
 0x313   :  { %v1246_v16 = vmul.f32 1.442695, %v1193_v59  ;;  %v1250_v61 = vmul.f32 1.442695, %v1195_v37  ;;  %v1236_v30 = vmul.f32 1.442695, %v1188_v39  ;;  %v1201_v59 = vsub.f32 %v6175_v56, %v6289_v48 }
 0x314   :  { %1340 = vperm.xlu0 %5247, %v6270_v45   ;;  %v1254_v52 = vmul.f32 1.442695, %v1197_v49  ;;  %v1238_v19 = vmul.f32 1.442695, %v1189_v57  ;;  %v1258_v32 = vmul.f32 1.442695, %v1199_v24  ;;  %v1192_v56 = vsub.f32 %v6129_v12, %v1135_v11 }
 0x315   :  { %1325 = vperm.xlu1 %5248, %v6272_v29   ;;  %5340 = vpow2.f32 %v1246_v16  ;;  %v1240_v37 = vmul.f32 1.442695, %v1190_v40  ;;  %v1262_v10 = vmul.f32 1.442695, %v1201_v59  ;;  %v1196_v11 = vsub.f32 %v6145_v35, %v6263_v7 }
 0x316   :  { %5342 = vpow2.f32 %v1232_v54  ;;  %v1191_v54 = vsub.f32 %v6125_v36, %v1131_v38  ;;  %v1266_v36 = vmul.f32 1.442695, %v1203_v62  ;;  %v1244_v38 = vmul.f32 1.442695, %v1192_v56 }
 0x317   :  { %5344 = vpow2.f32 %v1250_v61  ;;  %v1200_v35 = vsub.f32 %v6168_v13, %v6289_v48 }
 0x318   :  { %1346 = vperm.xlu0 %5247, %v6283_v53   ;;  %5346 = vpow2.f32 %v1236_v30  ;;  %v1242_v16 = vmul.f32 1.442695, %v1191_v54  ;;  %v1194_v30 = vsub.f32 %v6154_v4, %v6257_v63  ;;  %v1198_v4 = vsub.f32 %v6173_v25, %v6276_v43 }
 0x319   :  { %1331 = vperm.xlu1 %5248, %v6285_v50   ;;  %5348 = vpow2.f32 %v1254_v52  ;;  %v1252_v63 = vmul.f32 1.442695, %v1196_v11  ;;  %v1202_v25 = vsub.f32 %v6183_v55, %v1155_v58  ;;  %v1260_v43 = vmul.f32 1.442695, %v1200_v35 }
 0x31a   :  { %5350 = vpow2.f32 %v1238_v19  ;;  %v1248_v12 = vmul.f32 1.442695, %v1194_v30  ;;  %v1256_v7 = vmul.f32 1.442695, %v1198_v4 }
 0x31b   :  { %5352 = vpow2.f32 %v1258_v32  ;;  %v1264_v13 = vmul.f32 1.442695, %v1202_v25 }
 0x31c   :  { %5354 = vpow2.f32 %v1240_v37 }
 0x31d   :  { %1337 = vperm.xlu1 %5248, %v6295_v44   ;;  %5356 = vpow2.f32 %v1262_v10 }
 0x31e   :  { %5358 = vpow2.f32 %v1242_v16 }
 0x31f   :  { %v6302_v27 = vpop.eup %5340  ;;  %5360 = vpow2.f32 %v1266_v36 }
 0x320   :  { %v6304_v39 = vpop.eup %5342  ;;  %1364 = vperm.xlu0 %5247, %v6302_v27   ;;  %5362 = vpow2.f32 %v1244_v38 }
 0x321   :  { %1343 = vperm.xlu1 %5248, %v6304_v39   ;;  %v6310_v61 = vpop.eup %5344  ;;  %5364 = vpow2.f32 %v1248_v12 }
 0x322   :  { %v6312_v49 = vpop.eup %5346  ;;  %5366 = vpow2.f32 %v1252_v63 }
 0x323   :  { %v6318_v51 = vpop.eup %5348  ;;  %5368 = vpow2.f32 %v1256_v7 }
 0x324   :  { %1370 = vperm.xlu0 %5247, %v6310_v61   ;;  %v6320_v57 = vpop.eup %5350  ;;  %5370 = vpow2.f32 %v1260_v43 }
 0x325   :  { %1349 = vperm.xlu1 %5248, %v6312_v49   ;;  %v6326_v52 = vpop.eup %5352  ;;  %5372 = vpow2.f32 %v1264_v13 }
 0x326   :  { %v6328_v24 = vpop.eup %5354 }
 0x327   :  { %v6334_v19 = vpop.eup %5356 }
 0x328   :  { %1376 = vperm.xlu0 %5247, %v6318_v51   ;;  %v6336_v40 = vpop.eup %5358 }
 0x329   :  { %1352 = vperm.xlu1 %5248, %v6320_v57   ;;  %v6342_v32 = vpop.eup %5360 }
 0x32a   :  { %8317 = vst [vmem:[#allocation46_spill] sm:$0xff] %v6342_v32  ;;  %v6344_v59 = vpop.eup %5362 }
 0x32b   :  { %v6349_v37 = vpop.eup %5364 }
 0x32c   :  { %1382 = vperm.xlu0 %5247, %v6326_v52   ;;  %v6352_v48 = vpop.eup %5366 }
 0x32d   :  { %1355 = vperm.xlu1 %5248, %v6328_v24   ;;  %v6355_v54 = vpop.eup %5368 }
 0x32e   :  { %v6358_v10 = vpop.eup %5370 }
 0x32f   :  { %v6361_v55 = vpop.eup %5372 }
 0x330   :  { %1388 = vperm.xlu0 %5247, %v6334_v19   ;;  %8318 = vst [vmem:[#allocation47_spill] sm:$0xff] %v6361_v55 }
 0x331   :  { %1358 = vperm.xlu1 %5248, %v6336_v40  }
 0x334   :  { %1394 = vperm.xlu0 %5247, %v6342_v32  }
 0x335   :  { %1361 = vperm.xlu1 %5248, %v6344_v59  }
 0x339   :  { %1367 = vperm.xlu1 %5248, %v6349_v37  }
 0x33d   :  { %1373 = vperm.xlu1 %5248, %v6352_v48  }
 0x341   :  { %1379 = vperm.xlu1 %5248, %v6355_v54  }
 0x345   :  { %1385 = vperm.xlu1 %5248, %v6358_v10  }
 0x349   :  { %1391 = vperm.xlu1 %5248, %v6361_v55  }
 0x37f   :  { %v1302_v58 = vpop.permute.xlu0 %1301 }
 0x380   :  { %v1305_v62 = vpop.permute.xlu1 %1304  ;;  %v1399_v13 = vrot.slane %v1302_v58, %v6045_v9 }
 0x381   :  { %v1403_v5 = vrot.slane %v1305_v62, %v6035_v31 }
 0x383   :  { %v1317_v16 = vpop.permute.xlu0 %1316  ;;  %v1404_v62 = vsel %vm923_vm1, %v1403_v5, %v1399_v13 }
 0x384   :  { %v1308_v56 = vpop.permute.xlu1 %1307  ;;  %v1421_v41 = vrot.slane %v1317_v16, %v6035_v31 }
 0x385   :  { %v1408_v60 = vrot.slane %v1308_v56, %v6045_v9 }
 0x387   :  { %v1323_v36 = vpop.permute.xlu0 %1322 }
 0x388   :  { %v1311_v38 = vpop.permute.xlu1 %1310  ;;  %v1430_v46 = vrot.slane %v1323_v36, %v6035_v31 }
 0x389   :  { %v1412_v35 = vrot.slane %v1311_v38, %v6035_v31 }
 0x38b   :  { %v1329_v30 = vpop.permute.xlu0 %1328  ;;  %v1413_v38 = vsel %vm923_vm1, %v1412_v35, %v1408_v60 }
 0x38c   :  { %v1314_v12 = vpop.permute.xlu1 %1313  ;;  %v1439_v55 = vrot.slane %v1329_v30, %v6035_v31 }
 0x38d   :  { %v1417_v7 = vrot.slane %v1314_v12, %v6045_v9 }
 0x38f   :  { %v1335_v4 = vpop.permute.xlu0 %1334  ;;  %v1422_v58 = vsel %vm923_vm1, %v1421_v41, %v1417_v7 }
 0x390   :  { %v1320_v11 = vpop.permute.xlu1 %1319  ;;  %v1448_v56 = vrot.slane %v1335_v4, %v6035_v31 }
 0x391   :  { %v1426_v34 = vrot.slane %v1320_v11, %v6045_v9 }
 0x393   :  { %v1341_v25 = vpop.permute.xlu0 %1340  ;;  %v1431_v11 = vsel %vm923_vm1, %v1430_v46, %v1426_v34 }
 0x394   :  { %v1326_v63 = vpop.permute.xlu1 %1325  ;;  %v1457_v36 = vrot.slane %v1341_v25, %v6035_v31 }
 0x395   :  { %v1435_v1 = vrot.slane %v1326_v63, %v6045_v9  ;;  %v1540_v63 = vsel %vm1060_vm2, %v1413_v38, %v1404_v62 }
 0x396   :  { %v1541_v30 = vsel %vm1062_vm3, %v1422_v58, %v1540_v63 }
 0x397   :  { %v1440_v60 = vsel %vm923_vm1, %v1439_v55, %v1435_v1  ;;  %v1347_v35 = vpop.permute.xlu0 %1346  ;;  %v1542_v7 = vsel %vm1064_vm4, %v1431_v11, %v1541_v30 }
 0x398   :  { %v1332_v43 = vpop.permute.xlu1 %1331  ;;  %v1543_v34 = vsel %vm1066_vm5, %v1440_v60, %v1542_v7  ;;  %v1466_v46 = vrot.slane %v1347_v35, %v6035_v31 }
 0x399   :  { %v1444_v12 = vrot.slane %v1332_v43, %v6045_v9 }
 0x39b   :  { %v1449_v41 = vsel %vm923_vm1, %v1448_v56, %v1444_v12 }
 0x39c   :  { %v1338_v32 = vpop.permute.xlu1 %1337  ;;  %v1544_v25 = vsel %vm1068_vm6, %v1449_v41, %v1543_v34 }
 0x39d   :  { %v1453_v16 = vrot.slane %v1338_v32, %v6045_v9 }
 0x39f   :  { %v1458_v5 = vsel %vm923_vm1, %v1457_v36, %v1453_v16  ;;  %v1365_v12 = vpop.permute.xlu0 %1364 }
 0x3a0   :  { %v1344_v4 = vpop.permute.xlu1 %1343  ;;  %v1545_v55 = vsel %vm1070_vm7, %v1458_v5, %v1544_v25 }
 0x3a1   :  { %v1462_v32 = vrot.slane %v1344_v4, %v6045_v9 }
 0x3a3   :  { %v1467_v1 = vsel %vm923_vm1, %v1466_v46, %v1462_v32  ;;  %v1371_v56 = vpop.permute.xlu0 %1370  ;;  %v1493_v32 = vrot.slane %v1365_v12, %v6035_v31 }
 0x3a4   :  { %v1350_v43 = vpop.permute.xlu1 %1349  ;;  %v1546_v13 = vsel %vm1072_vm8, %v1467_v1, %v1545_v55  ;;  %v1502_v1 = vrot.slane %v1371_v56, %v6035_v31 }
 0x3a5   :  { %v1556_v38 = vsel %vm1083_vm9, %v1546_v13, 0.0  ;;  %v1471_v55 = vrot.slane %v1350_v43, %v6045_v9 }
 0x3a6   :  { %1557 = vadd.xlane.f32.xlu1 %v1556_v38 }
 0x3a7   :  { %v1377_v16 = vpop.permute.xlu0 %1376 }
 0x3a8   :  { %v1353_v58 = vpop.permute.xlu1 %1352 }
 0x3a9   :  { %v1475_v4 = vrot.slane %v1353_v58, %v6035_v31 }
 0x3ab   :  { %v1383_v60 = vpop.permute.xlu0 %1382 }
 0x3ac   :  { %v1356_v62 = vpop.permute.xlu1 %1355 }
 0x3ad   :  { %v1480_v34 = vrot.slane %v1356_v62, %v6045_v9  ;;  %v1476_v62 = vsel %vm923_vm1, %v1475_v4, %v1471_v55 }
 0x3af   :  { %v1389_v41 = vpop.permute.xlu0 %1388 }
 0x3b0   :  { %v1359_v11 = vpop.permute.xlu1 %1358  ;;  %v1529_v56 = vrot.slane %v1389_v41, %v6035_v31 }
 0x3b1   :  { %v1484_v30 = vrot.slane %v1359_v11, %v6035_v31  ;;  %v1511_v11 = vrot.slane %v1377_v16, %v6035_v31 }
 0x3b3   :  { %v1485_v13 = vsel %vm923_vm1, %v1484_v30, %v1480_v34  ;;  %v1395_v30 = vpop.permute.xlu0 %1394 }
 0x3b4   :  { %v1362_v63 = vpop.permute.xlu1 %1361  ;;  %v1547_v43 = vsel %vm1060_vm2, %v1485_v13, %v1476_v62 }
 0x3b5   :  { %v1489_v7 = vrot.slane %v1362_v63, %v6045_v9 }
 0x3b7   :  { %v1494_v58 = vsel %vm923_vm1, %v1493_v32, %v1489_v7 }
 0x3b8   :  { %v1368_v36 = vpop.permute.xlu1 %1367  ;;  %v1548_v16 = vsel %vm1062_vm3, %v1494_v58, %v1547_v43 }
 0x3b9   :  { %v1498_v46 = vrot.slane %v1368_v36, %v6045_v9  ;;  %v1520_v36 = vrot.slane %v1383_v60, %v6035_v31 }
 0x3bb   :  { %v1503_v12 = vsel %vm923_vm1, %v1502_v1, %v1498_v46  ;;  %v1538_v46 = vrot.slane %v1395_v30, %v6035_v31 }
 0x3bc   :  { %v1374_v35 = vpop.permute.xlu1 %1373  ;;  %v1549_v34 = vsel %vm1064_vm4, %v1503_v12, %v1548_v16 }
 0x3bd   :  { %v1507_v25 = vrot.slane %v1374_v35, %v6045_v9 }
 0x3c0   :  { %v1380_v5 = vpop.permute.xlu1 %1379 }
 0x3c1   :  { %v1516_v38 = vrot.slane %v1380_v5, %v6045_v9  ;;  %v1512_v5 = vsel %vm923_vm1, %v1511_v11, %v1507_v25 }
 0x3c2   :  { %v1550_v32 = vsel %vm1066_vm5, %v1512_v5, %v1549_v34 }
 0x3c3   :  { %v1521_v7 = vsel %vm923_vm1, %v1520_v36, %v1516_v38 }
 0x3c4   :  { %v1386_v63 = vpop.permute.xlu1 %1385  ;;  %v1551_v1 = vsel %vm1068_vm6, %v1521_v7, %v1550_v32 }
 0x3c5   :  { %v1525_v35 = vrot.slane %v1386_v63, %v6045_v9 }
 0x3c7   :  { %v1530_v4 = vsel %vm923_vm1, %v1529_v56, %v1525_v35 }
 0x3c8   :  { %v1392_v60 = vpop.permute.xlu1 %1391  ;;  %v1552_v25 = vsel %vm1070_vm7, %v1530_v4, %v1551_v1 }
 0x3c9   :  { %v1534_v41 = vrot.slane %v1392_v60, %v6045_v9 }
 0x3cb   :  { %v1539_v55 = vsel %vm923_vm1, %v1538_v46, %v1534_v41 }
 0x3cc   :  { %v1553_v13 = vsel %vm1072_vm8, %v1539_v55, %v1552_v25 }
 0x3cd   :  { %v1559_v38 = vsel %vm1083_vm9, %v1553_v13, 0.0 }
 0x3ce   :  { %1560 = vadd.xlane.f32.xlu0 %v1559_v38 }
 0x433   :  { %v1558_v11 = vpop.xlane.xlu1 %1557 }
 0x434   :  { %5374 = vrcp.f32 %v1558_v11  ;;  %v8320_v11 = vld [vmem:[#allocation47_spill] sm:$0xff] }
 0x43e   :  { %v5375_v58 = vpop.eup %5374 }
 0x43f   :  { %v1573_v31 = vrot.slane %v5375_v58, %v5648_v2  ;;  %v1577_v62 = vrot.slane %v5375_v58, %v5656_v8  ;;  %v1569_v35 = vrot.slane %v5375_v58, %v5651_v3 }
 0x441   :  { %v1649_v63 = vmul.f32 %v6240_v18, %v1573_v31  ;;  %v1648_v9 = vmul.f32 %v6232_v42, %v1573_v31  ;;  %v1650_v36 = vmul.f32 %v6247_v26, %v1577_v62  ;;  %v1651_v12 = vmul.f32 %v6230_v20, %v1577_v62  ;;  %v6506_v31 = vld [vmem:[%s8203_s3 + $0x4c] ss:$12 sps:$4 sm:$0xff]   ;;  %v8321_v62 = vld [vmem:[#allocation45_spill] sm:$0xff] }
 0x442   :  { %v1647_v56 = vmul.f32 %v6223_v28, %v1569_v35  ;;  %v1646_v43 = vmul.f32 %v6221_v33, %v1569_v35  ;;  %v1581_v18 = vrot.slane %v5375_v58, %v5666_v14  ;;  %v1585_v26 = vrot.slane %v5375_v58, %v5669_v15  ;;  %v8322_v35 = vld [vmem:[#allocation12_spill] sm:$0xff] }
 0x443   :  { %1695 = vperm.xlu1 %5248, %v1649_v63   ;;  %1690 = vperm.xlu0 %5247, %v1648_v9   ;;  %v1589_v28 = vrot.slane %v5375_v58, %v5672_v17  ;;  %v5273_v63 = vld [vmem:[%s8203_s3 + $0x48] ss:$12 sps:$4 sm:$0xff]  }
 0x444   :  { %v1653_v42 = vmul.f32 %v6238_v23, %v1581_v18  ;;  %v1652_v30 = vmul.f32 %v6259_v47, %v1581_v18  ;;  %v1655_v20 = vmul.f32 %v6245_v6, %v1585_v26  ;;  %v1654_v5 = vmul.f32 %v6272_v29, %v1585_v26  ;;  %v6511_v9 = vld [vmem:[#allocation6 + $0x4] ss:$8 sps:$4 sm:$0xff]  }
 0x445   :  { %v1657_v33 = vmul.f32 %v6252_v0, %v1589_v28  ;;  %v1656_v16 = vmul.f32 %v6285_v50, %v1589_v28  ;;  %v1593_v23 = vrot.slane %v5375_v58, %v5680_v21  ;;  %v1597_v6 = vrot.slane %v5375_v58, %v5683_v22  ;;  %v8326_v28 = vld [vmem:[#allocation13_spill] sm:$0xff] }
 0x447   :  { %1700 = vperm.xlu1 %5248, %v1650_v36   ;;  %1705 = vperm.xlu0 %5247, %v1651_v12   ;;  %v1659_v47 = vmul.f32 %v6270_v45, %v1593_v23  ;;  %v1658_v7 = vmul.f32 %v6295_v44, %v1593_v23  ;;  %v1661_v29 = vmul.f32 %v6283_v53, %v1597_v6  ;;  %v4718_v36 = vadd.s32 4294967272, %v8321_v62 }
 0x448   :  { %v1660_v0 = vmul.f32 %v6304_v39, %v1597_v6  ;;  %v4713_v12 = vadd.s32 4294967280, %v8321_v62 }
 0x44b   :  { %1685 = vperm.xlu0 %5247, %v1647_v56   ;;  %1680 = vperm.xlu1 %5248, %v1646_v43   ;;  %v6518_v56 = vsub.s32 %v4718_v36, %v8322_v35  ;;  %v6521_v43 = vsub.s32 %v4713_v12, %v8322_v35 }
 0x44f   :  { %1715 = vperm.xlu0 %5247, %v1653_v42   ;;  %1710 = vperm.xlu1 %5248, %v1652_v30   ;;  %v8324_v30 = vld [vmem:[#allocation15_spill] sm:$0xff] }
 0x450   :  { %v8325_v26 = vmax.f32 %v8324_v30, 0.0 }
 0x453   :  { %1725 = vperm.xlu0 %5247, %v1655_v20   ;;  %1720 = vperm.xlu1 %5248, %v1654_v5  }
 0x457   :  { %1735 = vperm.xlu0 %5247, %v1657_v33   ;;  %1730 = vperm.xlu1 %5248, %v1656_v16   ;;  %v8327_v33 = vmax.f32 %v8326_v28, 0.0 }
 0x45b   :  { %v1561_v34 = vpop.xlane.xlu0 %1560  ;;  %1745 = vperm.xlu0 %5247, %v1659_v47   ;;  %1740 = vperm.xlu1 %5248, %v1658_v7  }
 0x45c   :  { %5376 = vrcp.f32 %v1561_v34 }
 0x45f   :  { %1755 = vperm.xlu0 %5247, %v1661_v29   ;;  %1750 = vperm.xlu1 %5248, %v1660_v0  }
 0x466   :  { %v5377_v50 = vpop.eup %5376 }
 0x467   :  { %v1605_v4 = vrot.slane %v5377_v50, %v5648_v2  ;;  %v1609_v44 = vrot.slane %v5377_v50, %v5656_v8  ;;  %v1601_v53 = vrot.slane %v5377_v50, %v5651_v3 }
 0x469   :  { %v1665_v60 = vmul.f32 %v6336_v40, %v1605_v4  ;;  %v1664_v45 = vmul.f32 %v6328_v24, %v1605_v4  ;;  %v1667_v46 = vmul.f32 %v6302_v27, %v1609_v44  ;;  %v1666_v32 = vmul.f32 %v6344_v59, %v1609_v44  ;;  %v8330_v44 = vld [vmem:[#allocation20_spill] sm:$0xff] }
 0x46a   :  { %v1663_v39 = vmul.f32 %v6320_v57, %v1601_v53  ;;  %v1662_v41 = vmul.f32 %v6312_v49, %v1601_v53  ;;  %v1613_v40 = vrot.slane %v5377_v50, %v5666_v14  ;;  %v1617_v27 = vrot.slane %v5377_v50, %v5669_v15 }
 0x46b   :  { %1775 = vperm.xlu0 %5247, %v1665_v60   ;;  %1770 = vperm.xlu1 %5248, %v1664_v45   ;;  %v1621_v57 = vrot.slane %v5377_v50, %v5672_v17 }
 0x46c   :  { %v1669_v24 = vmul.f32 %v6310_v61, %v1613_v40  ;;  %v1668_v1 = vmul.f32 %v6349_v37, %v1613_v40  ;;  %v1671_v59 = vmul.f32 %v6318_v51, %v1617_v27  ;;  %v1670_v55 = vmul.f32 %v6352_v48, %v1617_v27  ;;  %v8319_v48 = vld [vmem:[#allocation46_spill] sm:$0xff] }
 0x46d   :  { %v1673_v49 = vmul.f32 %v6326_v52, %v1621_v57  ;;  %v1672_v25 = vmul.f32 %v6355_v54, %v1621_v57  ;;  %v1625_v61 = vrot.slane %v5377_v50, %v5680_v21  ;;  %v1629_v51 = vrot.slane %v5377_v50, %v5683_v22  ;;  %v6479_v21 = vld [vmem:[%s8203_s3 + $0x4] ss:$12 sps:$4 sm:$0xff]   ;;  %v5264_v52 = vld [vmem:[%s8203_s3] ss:$12 sps:$4 sm:$0xff]   ;;  %v6487_v22 = vld [vmem:[%s8203_s3 + $0x1c] ss:$12 sps:$4 sm:$0xff]  }
 0x46e   :  { %2199 = vmatprep.subr.bf16.mxu1 %v6479_v21  ;;  %v6497_v54 = vld [vmem:[%s8203_s3 + $0x34] ss:$12 sps:$4 sm:$0xff]   ;;  %8323 = vst [vmem:[#allocation46_spill] sm:$0xff] %v6521_v43  ;;  %v8328_v50 = vld [vmem:[#allocation18_spill] sm:$0xff] }
 0x46f   :  { %1785 = vperm.xlu0 %5247, %v1667_v46   ;;  %1780 = vperm.xlu1 %5248, %v1666_v32   ;;  %v1675_v37 = vmul.f32 %v6334_v19, %v1625_v61  ;;  %v1674_v13 = vmul.f32 %v6358_v10, %v1625_v61  ;;  %v1677_v38 = vmul.f32 %v8319_v48, %v1629_v51  ;;  %v5267_v19 = vld [vmem:[%s8203_s3 + $0x18] ss:$12 sps:$4 sm:$0xff]   ;;  %v5270_v10 = vld [vmem:[%s8203_s3 + $0x30] ss:$12 sps:$4 sm:$0xff]   ;;  %v8329_v4 = vmax.f32 %v8328_v50, 0.0 }
 0x470   :  { %v1676_v58 = vmul.f32 %v8320_v11, %v1629_v51  ;;  %2200 = vmatpush1.bf16.msra.mxu1 %v5264_v52  ;;  %v8331_v46 = vmax.f32 %v8330_v44, 0.0  ;;  %v8332_v51 = vld [vmem:[#allocation16_spill] sm:$0xff]  ;;  %v8334_v11 = vld [vmem:[#allocation14_spill] sm:$0xff]  ;;  %v6563_v44 = vld [vmem:[#allocation4 + $0x10] sm:$0xff] }
 0x471   :  { %2201 = vmatprep.subr.bf16.mxu1 %v6487_v22  ;;  %v8333_v48 = vmax.f32 %v8332_v51, 0.0 }
 0x473   :  { %1765 = vperm.xlu0 %5247, %v1663_v39   ;;  %1760 = vperm.xlu1 %5248, %v1662_v41  }
 0x474   :  { %2202 = vmatpush1.bf16.msra.mxu1 %v5267_v19 }
 0x475   :  { %2203 = vmatprep.subr.bf16.mxu1 %v6497_v54 }
 0x477   :  { %1795 = vperm.xlu0 %5247, %v1669_v24   ;;  %1790 = vperm.xlu1 %5248, %v1668_v1  }
 0x478   :  { %2204 = vmatpush1.bf16.msra.mxu1 %v5270_v10 }
 0x479   :  { %2205 = vmatprep.subr.bf16.mxu1 %v6506_v31 }
 0x47b   :  { %1805 = vperm.xlu0 %5247, %v1671_v59   ;;  %1800 = vperm.xlu1 %5248, %v1670_v55  }
 0x47c   :  { %2206 = vmatpush1.bf16.msra.mxu1 %v5273_v63 }
 0x47d   :  { %5112 = vmatprep.subr.bf16.mxu1 %v6511_v9 }
 0x47f   :  { %1815 = vperm.xlu0 %5247, %v1673_v49   ;;  %1810 = vperm.xlu1 %5248, %v1672_v25  }
 0x483   :  { %1825 = vperm.xlu0 %5247, %v1675_v37   ;;  %1820 = vperm.xlu1 %5248, %v1674_v13  }
 0x487   :  { %1835 = vperm.xlu0 %5247, %v1677_v38   ;;  %1830 = vperm.xlu1 %5248, %v1676_v58   ;;  %v8335_v58 = vmax.f32 %v8334_v11, 0.0 }
 0x4c2   :  { %v1696_v18 = vpop.permute.xlu1 %1695  ;;  %v1691_v42 = vpop.permute.xlu0 %1690 }
 0x4c3   :  { %v1841_v20 = vmul.f32 %v1696_v18, %v8325_v26  ;;  %v4732_v5 = vrot.slane %v1696_v18, %v6518_v56  ;;  %v1840_v16 = vmul.f32 %v1691_v42, %v8327_v33  ;;  %v4728_v23 = vrot.slane %v1691_v42, %v6521_v43 }
 0x4c5   :  { %v1880_v47 = vsel %vm420_vm0, %v1841_v20, 0.0  ;;  %v1879_v7 = vsel %vm420_vm0, %v1840_v16, 0.0  ;;  %v4733_v6 = vsel %vm4723_vm10, %v4732_v5, %v4728_v23  ;;  %v8336_v23 = vld [vmem:[#allocation19_spill] sm:$0xff] }
 0x4c6   :  { %v1881_v34 = vadd.f32 %v1880_v47, %v1879_v7  ;;  %v1701_v29 = vpop.permute.xlu1 %1700  ;;  %v1706_v0 = vpop.permute.xlu0 %1705  ;;  %v8337_v47 = vmax.f32 %v8336_v23, 0.0 }
 0x4c7   :  { %v1842_v60 = vmul.f32 %v1701_v29, %v8329_v4  ;;  %v4737_v45 = vrot.slane %v1701_v29, %v6521_v43  ;;  %v1843_v32 = vmul.f32 %v1706_v0, %v8331_v46  ;;  %v4741_v53 = vrot.slane %v1706_v0, %v6518_v56 }
 0x4c8   :  { %v1882_v39 = vrot.slane %v1881_v34, 4 }
 0x4c9   :  { %v1888_v41 = vsel %vm420_vm0, %v1842_v60, 0.0  ;;  %v1889_v40 = vsel %vm420_vm0, %v1843_v32, 0.0  ;;  %v4742_v24 = vsel %vm4723_vm10, %v4741_v53, %v4737_v45 }
 0x4ca   :  { %v1686_v1 = vpop.permute.xlu0 %1685  ;;  %v1681_v27 = vpop.permute.xlu1 %1680  ;;  %v1883_v57 = vadd.f32 %v1882_v39, %v1881_v34  ;;  %v1890_v49 = vadd.f32 %v1889_v40, %v1888_v41 }
 0x4cb   :  { %v4722_v59 = vrot.slane %v1686_v1, %v6518_v56  ;;  %v4717_v55 = vrot.slane %v1681_v27, %v6521_v43  ;;  %v1839_v38 = vmul.f32 %v1686_v1, %v8333_v48  ;;  %v1838_v52 = vmul.f32 %v1681_v27, %v8335_v58  ;;  %v8340_v58 = vld [vmem:[#allocation24_spill] sm:$0xff] }
 0x4cc   :  { %v1884_v63 = vrot.slane %v1883_v57, 2  ;;  %v1891_v62 = vrot.slane %v1890_v49, 4  ;;  %v2015_v27 = vrot.slane %v6563_v44, 1 }
 0x4cd   :  { %v4724_v25 = vsel %vm4723_vm10, %v4722_v59, %v4717_v55  ;;  %v1871_v18 = vsel %vm420_vm0, %v1839_v38, 0.0  ;;  %v1870_v42 = vsel %vm420_vm0, %v1838_v52, 0.0  ;;  %v8341_v52 = vmax.f32 %v8340_v58, 0.0 }
 0x4ce   :  { %v4860_v61 = vsel %vm1060_vm2, %v4733_v6, %v4724_v25  ;;  %v1716_v37 = vpop.permute.xlu0 %1715  ;;  %v1711_v13 = vpop.permute.xlu1 %1710  ;;  %v1885_v20 = vadd.f32 %v1884_v63, %v1883_v57  ;;  %v1892_v5 = vadd.f32 %v1891_v62, %v1890_v49  ;;  %v1872_v16 = vadd.f32 %v1871_v18, %v1870_v42  ;;  %v8338_v6 = vld [vmem:[#allocation17_spill] sm:$0xff] }
 0x4cf   :  { %v4750_v19 = vrot.slane %v1716_v37, %v6518_v56  ;;  %v4861_v10 = vsel %vm1062_vm3, %v4742_v24, %v4860_v61  ;;  %v4746_v36 = vrot.slane %v1711_v13, %v6521_v43  ;;  %v1845_v7 = vmul.f32 %v1716_v37, %v8337_v47 }
 0x4d0   :  { %v8339_v34 = vmax.f32 %v8338_v6, 0.0  ;;  %v1886_v60 = vrot.slane %v1885_v20, 1  ;;  %v1893_v45 = vrot.slane %v1892_v5, 2  ;;  %v1873_v53 = vrot.slane %v1872_v16, 4 }
 0x4d1   :  { %v4751_v30 = vsel %vm4723_vm10, %v4750_v19, %v4746_v36  ;;  %v1898_v39 = vsel %vm420_vm0, %v1845_v7, 0.0  ;;  %v2016_v47 = vrot.slane %v6563_v44, 2 }
 0x4d2   :  { %v1726_v12 = vpop.permute.xlu0 %1725  ;;  %v1721_v35 = vpop.permute.xlu1 %1720  ;;  %v4862_v28 = vsel %vm1064_vm4, %v4751_v30, %v4861_v10  ;;  %v1844_v29 = vmul.f32 %v1711_v13, %v8339_v34  ;;  %v1887_v59 = vadd.f32 %v1886_v60, %v1885_v20  ;;  %v1894_v55 = vadd.f32 %v1893_v45, %v1892_v5  ;;  %v8342_v10 = vld [vmem:[#allocation22_spill] sm:$0xff]  ;;  %v8344_v30 = vld [vmem:[#allocation23_spill] sm:$0xff]  ;;  %v8346_v5 = vld [vmem:[#allocation21_spill] sm:$0xff] }
 0x4d3   :  { %v4759_v26 = vrot.slane %v1726_v12, %v6518_v56  ;;  %v4755_v33 = vrot.slane %v1721_v35, %v6521_v43  ;;  %v1874_v61 = vadd.f32 %v1873_v53, %v1872_v16  ;;  %v1847_v19 = vmul.f32 %v1726_v12, %v8341_v52 }
 0x4d4   :  { %v1897_v41 = vsel %vm420_vm0, %v1844_v29, 0.0  ;;  %v6577_v51 = vadd.f32 %v2015_v27, %v1887_v59  ;;  %v1895_v48 = vrot.slane %v1894_v55, 1  ;;  %v8343_v63 = vmax.f32 %v8342_v10, 0.0  ;;  %v8348_v59 = vld [vmem:[#allocation28_spill] sm:$0xff]  ;;  %v8353_v10 = vld [vmem:[#allocation31_spill] sm:$0xff] }
 0x4d5   :  { %v4760_v4 = vsel %vm4723_vm10, %v4759_v26, %v4755_v33  ;;  %v1899_v57 = vadd.f32 %v1898_v39, %v1897_v41  ;;  %v1875_v42 = vrot.slane %v1874_v61, 2  ;;  %v8345_v26 = vmax.f32 %v8344_v30, 0.0 }
 0x4d6   :  { %v1736_v0 = vpop.permute.xlu0 %1735  ;;  %v1731_v50 = vpop.permute.xlu1 %1730  ;;  %v4863_v46 = vsel %vm1066_vm5, %v4760_v4, %v4862_v28  ;;  %v1846_v62 = vmul.f32 %v1721_v35, %v8343_v63  ;;  %v8347_v28 = vmax.f32 %v8346_v5, 0.0  ;;  %v2080_v12 = vpack.c.bf16 %v6577_v51, %v6577_v51 }
 0x4d7   :  { %v4768_v32 = vrot.slane %v1736_v0, %v6518_v56  ;;  %v4764_v24 = vrot.slane %v1731_v50, %v6521_v43  ;;  %v1900_v11 = vrot.slane %v1899_v57, 4  ;;  %v1849_v20 = vmul.f32 %v1736_v0, %v8345_v26 }
 0x4d8   :  { %v1848_v33 = vmul.f32 %v1731_v50, %v8347_v28  ;;  %v1896_v35 = vadd.f32 %v1895_v48, %v1894_v55  ;;  %v1907_v34 = vsel %vm420_vm0, %v1847_v19, 0.0  ;;  %v1906_v29 = vsel %vm420_vm0, %v1846_v62, 0.0 }
 0x4d9   :  { %v4769_v49 = vsel %vm4723_vm10, %v4768_v32, %v4764_v24  ;;  %v1901_v6 = vadd.f32 %v1900_v11, %v1899_v57  ;;  %v2017_v0 = vrot.slane %v6563_v44, 3  ;;  %v1876_v50 = vadd.f32 %v1875_v42, %v1874_v61 }
 0x4da   :  { %v1746_v40 = vpop.permute.xlu0 %1745  ;;  %v1741_v1 = vpop.permute.xlu1 %1740  ;;  %v4864_v37 = vsel %vm1068_vm6, %v4769_v49, %v4863_v46  ;;  %v1916_v4 = vsel %vm420_vm0, %v1849_v20, 0.0  ;;  %v1915_v60 = vsel %vm420_vm0, %v1848_v33, 0.0  ;;  %v6600_v46 = vunpack.c.l.b16 %v2080_v12 }
 0x4db   :  { %v4777_v25 = vrot.slane %v1746_v40, %v6518_v56  ;;  %v4773_v13 = vrot.slane %v1741_v1, %v6521_v43  ;;  %v6604_v32 = vadd.f32 %v2016_v47, %v1896_v35  ;;  %v2018_v53 = vrot.slane %v6563_v44, 4 }
 0x4dc   :  { %v1908_v39 = vadd.f32 %v1907_v34, %v1906_v29  ;;  %v1902_v41 = vrot.slane %v1901_v6, 2  ;;  %v8349_v55 = vmax.f32 %v8348_v59, 0.0  ;;  %v1877_v19 = vrot.slane %v1876_v50, 1 }
 0x4dd   :  { %v4778_v36 = vsel %vm4723_vm10, %v4777_v25, %v4773_v13  ;;  %v1917_v25 = vadd.f32 %v1916_v4, %v1915_v60  ;;  %v8354_v63 = vmax.f32 %v8353_v10, 0.0  ;;  %v2081_v20 = vpack.c.bf16 %v6604_v32, %v6604_v32  ;;  %v8359_v4 = vld [vmem:[#allocation25_spill] sm:$0xff] }
 0x4de   :  { %v1756_v38 = vpop.permute.xlu0 %1755  ;;  %v1751_v18 = vpop.permute.xlu1 %1750  ;;  %v4865_v16 = vsel %vm1070_vm7, %v4778_v36, %v4864_v37  ;;  %v1851_v57 = vmul.f32 %v1746_v40, %v8349_v55  ;;  %v8351_v37 = vld [vmem:[#allocation26_spill] sm:$0xff]  ;;  %v8355_v40 = vld [vmem:[#allocation29_spill] sm:$0xff]  ;;  %v1909_v5 = vrot.slane %v1908_v39, 4  ;;  %v1903_v28 = vadd.f32 %v1902_v41, %v1901_v6  ;;  %v8361_v6 = vld [vmem:[#allocation36_spill] sm:$0xff] }
 0x4df   :  { %v4786_v23 = vrot.slane %v1756_v38, %v6518_v56  ;;  %v4782_v7 = vrot.slane %v1751_v18, %v6521_v43  ;;  %v8352_v13 = vmax.f32 %v8351_v37, 0.0  ;;  %v8356_v42 = vmax.f32 %v8355_v40, 0.0 }
 0x4e0   :  { %v1925_v33 = vsel %vm420_vm0, %v1851_v57, 0.0  ;;  %v1918_v12 = vrot.slane %v1917_v25, 4  ;;  %v8360_v60 = vmax.f32 %v8359_v4, 0.0  ;;  %v8362_v41 = vmax.f32 %v8361_v6, 0.0 }
 0x4e1   :  { %v4787_v45 = vsel %vm4723_vm10, %v4786_v23, %v4782_v7  ;;  %v1850_v48 = vmul.f32 %v1741_v1, %v8352_v13  ;;  %v8357_v7 = vld [vmem:[#allocation27_spill] sm:$0xff]  ;;  %v1904_v40 = vrot.slane %v1903_v28, 1 }
 0x4e2   :  { %v6611_v49 = vsel %vm1072_vm8, %v4787_v45, %v4865_v16  ;;  %v8358_v34 = vmax.f32 %v8357_v7, 0.0  ;;  %v1852_v45 = vmul.f32 %v1751_v18, %v8360_v60 }
 0x4e3   :  { %8350 = vst [vmem:[#allocation47_spill] sm:$0xff] %v6611_v49  ;;  %v1924_v35 = vsel %vm420_vm0, %v1850_v48, 0.0  ;;  %v1878_v48 = vadd.f32 %v1877_v19, %v1876_v50  ;;  %v8365_v50 = vld [vmem:[#allocation32_spill] sm:$0xff] }
 0x4e4   :  { %v1853_v29 = vmul.f32 %v1756_v38, %v8358_v34  ;;  %v1933_v34 = vsel %vm420_vm0, %v1852_v45, 0.0 }
 0x4e6   :  { %v1934_v7 = vsel %vm420_vm0, %v1853_v29, 0.0 }
 0x4ea   :  { %v1776_v58 = vpop.permute.xlu0 %1775  ;;  %v1771_v52 = vpop.permute.xlu1 %1770 }
 0x4eb   :  { %v1857_v62 = vmul.f32 %v1776_v58, %v8354_v63  ;;  %v4804_v36 = vrot.slane %v1776_v58, %v6518_v56  ;;  %v1856_v30 = vmul.f32 %v1771_v52, %v8356_v42  ;;  %v4800_v1 = vrot.slane %v1771_v52, %v6521_v43  ;;  %v8363_v58 = vld [vmem:[#allocation34_spill] sm:$0xff] }
 0x4ec   :  { %v8364_v52 = vmax.f32 %v8363_v58, 0.0  ;;  %v6640_v63 = vunpack.c.l.b16 %v2081_v20 }
 0x4ed   :  { %v1952_v16 = vsel %vm420_vm0, %v1857_v62, 0.0  ;;  %v1951_v23 = vsel %vm420_vm0, %v1856_v30, 0.0  ;;  %v4805_v37 = vsel %vm4723_vm10, %v4804_v36, %v4800_v1  ;;  %v1910_v62 = vadd.f32 %v1909_v5, %v1908_v39 }
 0x4ee   :  { %v1786_v59 = vpop.permute.xlu0 %1785  ;;  %v1781_v55 = vpop.permute.xlu1 %1780  ;;  %v1953_v38 = vadd.f32 %v1952_v16, %v1951_v23  ;;  %v1919_v30 = vadd.f32 %v1918_v12, %v1917_v25  ;;  %v1926_v1 = vadd.f32 %v1925_v33, %v1924_v35  ;;  %v8366_v39 = vmax.f32 %v8365_v50, 0.0  ;;  %v8367_v16 = vld [vmem:[#allocation30_spill] sm:$0xff] }
 0x4ef   :  { %v1859_v57 = vmul.f32 %v1786_v59, %v8362_v41  ;;  %v4813_v13 = vrot.slane %v1786_v59, %v6518_v56  ;;  %v1858_v10 = vmul.f32 %v1781_v55, %v8364_v52  ;;  %v4809_v36 = vrot.slane %v1781_v55, %v6521_v43 }
 0x4f0   :  { %v8368_v23 = vmax.f32 %v8367_v16, 0.0  ;;  %v6654_v55 = vadd.f32 %v1878_v48, %v6563_v44  ;;  %v1911_v25 = vrot.slane %v1910_v62, 2  ;;  %v1954_v33 = vrot.slane %v1953_v38, 4 }
 0x4f1   :  { %v1961_v18 = vsel %vm420_vm0, %v1859_v57, 0.0  ;;  %v1960_v42 = vsel %vm420_vm0, %v1858_v10, 0.0  ;;  %v4814_v20 = vsel %vm4723_vm10, %v4813_v13, %v4809_v36  ;;  %v6656_v35 = vadd.f32 %v1904_v40, %v1903_v28  ;;  %v8369_v36 = vld [vmem:[#allocation35_spill] sm:$0xff]  ;;  %v8371_v40 = vld [vmem:[#allocation33_spill] sm:$0xff] }
 0x4f2   :  { %v1766_v4 = vpop.permute.xlu0 %1765  ;;  %v1761_v60 = vpop.permute.xlu1 %1760  ;;  %v1962_v12 = vadd.f32 %v1961_v18, %v1960_v42  ;;  %v1920_v41 = vrot.slane %v1919_v30, 2  ;;  %v1927_v57 = vrot.slane %v1926_v1, 4  ;;  %v1935_v13 = vadd.f32 %v1934_v7, %v1933_v34 }
 0x4f3   :  { %v1855_v19 = vmul.f32 %v1766_v4, %v8366_v39  ;;  %v4795_v5 = vrot.slane %v1766_v4, %v6518_v56  ;;  %v1854_v59 = vmul.f32 %v1761_v60, %v8368_v23  ;;  %v4791_v6 = vrot.slane %v1761_v60, %v6521_v43 }
 0x4f4   :  { %v8370_v4 = vmax.f32 %v8369_v36, 0.0  ;;  %v8372_v18 = vmax.f32 %v8371_v40, 0.0  ;;  %v1955_v39 = vadd.f32 %v1954_v33, %v1953_v38  ;;  %v8373_v33 = vld [vmem:[#allocation40_spill] sm:$0xff] }
 0x4f5   :  { %v1943_v29 = vsel %vm420_vm0, %v1855_v19, 0.0  ;;  %v1942_v45 = vsel %vm420_vm0, %v1854_v59, 0.0  ;;  %v4796_v48 = vsel %vm4723_vm10, %v4795_v5, %v4791_v6  ;;  %v1963_v19 = vrot.slane %v1962_v12, 4 }
 0x4f6   :  { %v1944_v58 = vadd.f32 %v1943_v29, %v1942_v45  ;;  %v1796_v52 = vpop.permute.xlu0 %1795  ;;  %v1791_v10 = vpop.permute.xlu1 %1790  ;;  %v4867_v60 = vsel %vm1060_vm2, %v4805_v37, %v4796_v48  ;;  %v1928_v59 = vadd.f32 %v1927_v57, %v1926_v1  ;;  %v1936_v29 = vrot.slane %v1935_v13, 4  ;;  %v8375_v48 = vld [vmem:[#allocation38_spill] sm:$0xff] }
 0x4f7   :  { %v1861_v50 = vmul.f32 %v1796_v52, %v8370_v4  ;;  %v4822_v28 = vrot.slane %v1796_v52, %v6518_v56  ;;  %v1860_v42 = vmul.f32 %v1791_v10, %v8372_v18  ;;  %v4868_v34 = vsel %vm1062_vm3, %v4814_v20, %v4867_v60 }
 0x4f8   :  { %v1945_v16 = vrot.slane %v1944_v58, 4  ;;  %v4818_v5 = vrot.slane %v1791_v10, %v6521_v43  ;;  %v8374_v4 = vmax.f32 %v8373_v33, 0.0  ;;  %v6678_v18 = vadd.f32 %v1911_v25, %v1910_v62 }
 0x4f9   :  { %v1970_v7 = vsel %vm420_vm0, %v1861_v50, 0.0  ;;  %v1969_v23 = vsel %vm420_vm0, %v1860_v42, 0.0  ;;  %v8376_v50 = vmax.f32 %v8375_v48, 0.0  ;;  %v1956_v42 = vrot.slane %v1955_v39, 2 }
 0x4fa   :  { %v1946_v45 = vadd.f32 %v1945_v16, %v1944_v58  ;;  %v1971_v6 = vadd.f32 %v1970_v7, %v1969_v23  ;;  %v1806_v52 = vpop.permute.xlu0 %1805  ;;  %v1801_v36 = vpop.permute.xlu1 %1800  ;;  %v4823_v38 = vsel %vm4723_vm10, %v4822_v28, %v4818_v5  ;;  %v1964_v10 = vadd.f32 %v1963_v19, %v1962_v12  ;;  %v8377_v19 = vld [vmem:[#allocation39_spill] sm:$0xff] }
 0x4fb   :  { %v1863_v40 = vmul.f32 %v1806_v52, %v8374_v4  ;;  %v4831_v37 = vrot.slane %v1806_v52, %v6518_v56  ;;  %v1862_v20 = vmul.f32 %v1801_v36, %v8376_v50  ;;  %v4869_v57 = vsel %vm1064_vm4, %v4823_v38, %v4868_v34 }
 0x4fc   :  { %v1972_v1 = vrot.slane %v1971_v6, 4  ;;  %v4827_v28 = vrot.slane %v1801_v36, %v6521_v43  ;;  %v6684_v60 = vadd.f32 %v1920_v41, %v1919_v30  ;;  %v1937_v7 = vadd.f32 %v1936_v29, %v1935_v13  ;;  %v8379_v13 = vld [vmem:[#allocation37_spill] sm:$0xff] }
 0x4fd   :  { %v1979_v58 = vsel %vm420_vm0, %v1863_v40, 0.0  ;;  %v1978_v16 = vsel %vm420_vm0, %v1862_v20, 0.0  ;;  %v1947_v23 = vrot.slane %v1946_v45, 2  ;;  %v1929_v62 = vrot.slane %v1928_v59, 2 }
 0x4fe   :  { %v1973_v5 = vadd.f32 %v1972_v1, %v1971_v6  ;;  %v1816_v52 = vpop.permute.xlu0 %1815  ;;  %v1811_v33 = vpop.permute.xlu1 %1810  ;;  %v1980_v25 = vadd.f32 %v1979_v58, %v1978_v16  ;;  %v4832_v12 = vsel %vm4723_vm10, %v4831_v37, %v4827_v28  ;;  %v8378_v4 = vmax.f32 %v8377_v19, 0.0  ;;  %v8381_v19 = vld [vmem:[#allocation44_spill] sm:$0xff] }
 0x4ff   :  { %v1957_v38 = vadd.f32 %v1956_v42, %v1955_v39  ;;  %v1965_v40 = vrot.slane %v1964_v10, 2  ;;  %v4840_v50 = vrot.slane %v1816_v52, %v6518_v56  ;;  %v4870_v30 = vsel %vm1066_vm5, %v4832_v12, %v4869_v57 }
 0x500   :  { %v1865_v34 = vmul.f32 %v1816_v52, %v8378_v4  ;;  %v1974_v48 = vrot.slane %v1973_v5, 2  ;;  %v1981_v36 = vrot.slane %v1980_v25, 4  ;;  %v8380_v29 = vmax.f32 %v8379_v13, 0.0 }
 0x501   :  { %v1913_v20 = vrot.slane %v6678_v18, 1  ;;  %v1922_v37 = vrot.slane %v6684_v60, 1  ;;  %v1938_v1 = vrot.slane %v1937_v7, 2  ;;  %v1948_v58 = vadd.f32 %v1947_v23, %v1946_v45 }
 0x502   :  { %v1988_v41 = vsel %vm420_vm0, %v1865_v34, 0.0  ;;  %v1864_v6 = vmul.f32 %v1811_v33, %v8380_v29  ;;  %v1826_v16 = vpop.permute.xlu0 %1825  ;;  %v1821_v39 = vpop.permute.xlu1 %1820  ;;  %v1982_v42 = vadd.f32 %v1981_v36, %v1980_v25  ;;  %v4836_v52 = vrot.slane %v1811_v33, %v6521_v43 }
 0x503   :  { %v8382_v57 = vmax.f32 %v8381_v19, 0.0  ;;  %v1930_v4 = vadd.f32 %v1929_v62, %v1928_v59  ;;  %v1958_v34 = vrot.slane %v1957_v38, 1  ;;  %v1975_v13 = vadd.f32 %v1974_v48, %v1973_v5  ;;  %v8384_v59 = vld [vmem:[#allocation42_spill] sm:$0xff] }
 0x504   :  { %v1987_v28 = vsel %vm420_vm0, %v1864_v6, 0.0  ;;  %v1966_v26 = vadd.f32 %v1965_v40, %v1964_v10  ;;  %v1983_v11 = vrot.slane %v1982_v42, 2  ;;  %v4841_v61 = vsel %vm4723_vm10, %v4840_v50, %v4836_v52 }
 0x505   :  { %v1867_v12 = vmul.f32 %v1826_v16, %v8382_v57  ;;  %v1989_v29 = vadd.f32 %v1988_v41, %v1987_v28  ;;  %v4849_v45 = vrot.slane %v1826_v16, %v6518_v56  ;;  %v1939_v23 = vadd.f32 %v1938_v1, %v1937_v7  ;;  %v8386_v41 = vld [vmem:[#allocation43_spill] sm:$0xff] }
 0x506   :  { %v1949_v24 = vrot.slane %v1948_v58, 1  ;;  %v6703_v6 = vpop.permute.xlu0 %1835  ;;  %v1984_v33 = vadd.f32 %v1983_v11, %v1982_v42  ;;  %v4871_v19 = vsel %vm1068_vm6, %v4841_v61, %v4870_v30  ;;  %v8385_v62 = vmax.f32 %v8384_v59, 0.0  ;;  %v6712_v1 = vpop.permute.xlu1 %1830 }
 0x507   :  { %v1990_v25 = vrot.slane %v1989_v29, 4  ;;  %v1997_v36 = vsel %vm420_vm0, %v1867_v12, 0.0  ;;  %8383 = vst [vmem:[#allocation45_spill] sm:$0xff] %v6703_v6  ;;  %v4845_v10 = vrot.slane %v1821_v39, %v6521_v43  ;;  %v1959_v40 = vadd.f32 %v1958_v34, %v1957_v38  ;;  %8388 = vst [vmem:[#allocation12_spill] sm:$0xff] %v6712_v1 }
 0x508   :  { %v1866_v5 = vmul.f32 %v1821_v39, %v8385_v62  ;;  %v1976_v48 = vrot.slane %v1975_v13, 1  ;;  %v8387_v16 = vmax.f32 %v8386_v41, 0.0  ;;  %v1967_v28 = vrot.slane %v1966_v26, 1 }
 0x509   :  { %v1991_v50 = vadd.f32 %v1990_v25, %v1989_v29  ;;  %v1985_v52 = vrot.slane %v1984_v33, 1  ;;  %v4850_v61 = vsel %vm4723_vm10, %v4849_v45, %v4845_v10  ;;  %v1931_v30 = vrot.slane %v1930_v4, 1  ;;  %v8390_v29 = vld [vmem:[#allocation41_spill] sm:$0xff] }
 0x50a   :  { %v1869_v7 = vmul.f32 %v6703_v6, %v8387_v16  ;;  %v1996_v11 = vsel %vm420_vm0, %v1866_v5, 0.0  ;;  %v1940_v42 = vrot.slane %v1939_v23, 1  ;;  %v1950_v39 = vadd.f32 %v1949_v24, %v1948_v58 }
 0x50b   :  { %v1992_v57 = vrot.slane %v1991_v50, 2  ;;  %v1998_v12 = vadd.f32 %v1997_v36, %v1996_v11  ;;  %v6717_v38 = vsel %vm1070_vm7, %v4850_v61, %v4871_v19  ;;  %v8391_v25 = vmax.f32 %v8390_v29, 0.0 }
 0x50c   :  { %8389 = vst [vmem:[#allocation15_spill] sm:$0xff] %v6717_v38  ;;  %v2006_v34 = vsel %vm420_vm0, %v1869_v7, 0.0  ;;  %v1914_v62 = vadd.f32 %v1913_v20, %v6678_v18  ;;  %v1977_v41 = vadd.f32 %v1976_v48, %v1975_v13  ;;  %v6726_v45 = vadd.f32 %v2015_v27, %v1959_v40 }
 0x50d   :  { %v1868_v59 = vmul.f32 %v6712_v1, %v8391_v25  ;;  %v1993_v5 = vadd.f32 %v1992_v57, %v1991_v50  ;;  %v1999_v16 = vrot.slane %v1998_v12, 4  ;;  %v1968_v36 = vadd.f32 %v1967_v28, %v1966_v26 }
 0x50e   :  { %v1986_v24 = vadd.f32 %v1985_v52, %v1984_v33  ;;  %v1923_v19 = vadd.f32 %v1922_v37, %v6684_v60  ;;  %v6733_v18 = vadd.f32 %v2017_v0, %v6656_v35  ;;  %v1932_v20 = vadd.f32 %v1931_v30, %v1930_v4 }
 0x50f   :  { %v2005_v58 = vsel %vm420_vm0, %v1868_v59, 0.0  ;;  %v1994_v10 = vrot.slane %v1993_v5, 1  ;;  %v2000_v7 = vadd.f32 %v1999_v16, %v1998_v12  ;;  %v1941_v13 = vadd.f32 %v1940_v42, %v1939_v23 }
 0x510   :  { %v2007_v11 = vadd.f32 %v2006_v34, %v2005_v58  ;;  %v6736_v48 = vadd.f32 %v1950_v39, %v6563_v44  ;;  %v6740_v27 = vadd.f32 %v2017_v0, %v1977_v41  ;;  %v6744_v37 = vadd.f32 %v2018_v53, %v1914_v62 }
 0x511   :  { %v1995_v26 = vadd.f32 %v1994_v10, %v1993_v5  ;;  %v2001_v33 = vrot.slane %v2000_v7, 2  ;;  %v2088_v35 = vpack.c.bf16 %v6726_v45, %v6726_v45  ;;  %v6750_v4 = vadd.f32 %v2016_v47, %v1968_v36 }
 0x512   :  { %v2008_v60 = vrot.slane %v2007_v11, 4  ;;  %v6754_v23 = vadd.f32 %v2018_v53, %v1986_v24  ;;  %v8392_v0 = vrot.slane %v6563_v44, 5  ;;  %v2079_v30 = vpack.c.bf16 %v6654_v55, %v6654_v55 }
 0x513   :  { %v2002_v52 = vadd.f32 %v2001_v33, %v2000_v7  ;;  %v2082_v47 = vpack.c.bf16 %v6733_v18, %v6733_v18  ;;  %v8394_v42 = vrot.slane %v6563_v44, 6  ;;  %v2087_v57 = vpack.c.bf16 %v6736_v48, %v6736_v48 }
 0x514   :  { %v6758_v40 = vadd.f32 %v8392_v0, %v1923_v19  ;;  %v8393_v50 = vmov %v8392_v0  ;;  %v2009_v61 = vadd.f32 %v2008_v60, %v2007_v11  ;;  %v8395_v12 = vrot.slane %v6563_v44, 7 }
 0x515   :  { %v6762_v28 = vadd.f32 %v8393_v50, %v1995_v26  ;;  %v6770_v53 = vadd.f32 %v8394_v42, %v1932_v20  ;;  %v2090_v34 = vpack.c.bf16 %v6740_v27, %v6740_v27  ;;  %v2003_v29 = vrot.slane %v2002_v52, 1 }
 0x516   :  { %v6776_v39 = vadd.f32 %v8395_v12, %v1941_v13  ;;  %v2010_v25 = vrot.slane %v2009_v61, 2  ;;  %v2083_v59 = vpack.c.bf16 %v6744_v37, %v6744_v37  ;;  %v2120_v62 = vunpack.c.l.b16 %v2088_v35 }
 0x517   :  { %v2089_v41 = vpack.c.bf16 %v6750_v4, %v6750_v4  ;;  %v2091_v5 = vpack.c.bf16 %v6754_v23, %v6754_v23  ;;  %v2084_v16 = vpack.c.bf16 %v6758_v40, %v6758_v40  ;;  %v2092_v36 = vpack.c.bf16 %v6762_v28, %v6762_v28 }
 0x518   :  { %v2004_v24 = vadd.f32 %v2003_v29, %v2002_v52  ;;  %v2011_v58 = vadd.f32 %v2010_v25, %v2009_v61  ;;  %v2111_v19 = vunpack.c.l.b16 %v2079_v30  ;;  %v2114_v10 = vunpack.c.l.b16 %v2082_v47 }
 0x519   :  { %v2085_v7 = vpack.c.bf16 %v6770_v53, %v6770_v53  ;;  %v2119_v11 = vunpack.c.l.b16 %v2087_v57  ;;  %v2122_v20 = vunpack.c.l.b16 %v2090_v34  ;;  %v8396_v13 = vmov %v8394_v42 }
 0x51a   :  { %v6794_v26 = vadd.f32 %v8396_v13, %v2004_v24  ;;  %v2012_v33 = vrot.slane %v2011_v58, 1  ;;  %v2086_v60 = vpack.c.bf16 %v6776_v39, %v6776_v39  ;;  %v2115_v35 = vunpack.c.l.b16 %v2083_v59 }
 0x51b   :  { %v2141_v0 = vrot.slane %v2120_v62, 7  ;;  %v2121_v50 = vunpack.c.l.b16 %v2089_v41  ;;  %v2123_v52 = vunpack.c.l.b16 %v2091_v5  ;;  %v2116_v61 = vunpack.c.l.b16 %v2084_v16 }
 0x51c   :  { %v2124_v30 = vunpack.c.l.b16 %v2092_v36  ;;  %v2093_v47 = vpack.c.bf16 %v6794_v26, %v6794_v26  ;;  %v2013_v42 = vadd.f32 %v2012_v33, %v2011_v58  ;;  %v8397_v57 = vrot.slane %v6600_v46, 7 }
 0x51d   :  { %v2131_v34 = vrot.slane %v2114_v10, 5  ;;  %v2117_v29 = vunpack.c.l.b16 %v2085_v7  ;;  %v2142_v25 = vsel %vm1060_vm2, %v2141_v0, %v2119_v11  ;;  %v2145_v24 = vrot.slane %v2122_v20, 5 }
 0x51e   :  { %v2128_v12 = vsel %vm1060_vm2, %v8397_v57, %v2111_v19  ;;  %v2125_v13 = vunpack.c.l.b16 %v2093_v47  ;;  %v8398_v59 = vrot.slane %v6563_v44, 7  ;;  %v2118_v41 = vunpack.c.l.b16 %v2086_v60 }
 0x51f   :  { %v2129_v5 = vrot.slane %v6640_v63, 6  ;;  %v2133_v16 = vrot.slane %v2115_v35, 4  ;;  %v2143_v36 = vrot.slane %v2121_v50, 6  ;;  %v2147_v58 = vrot.slane %v2123_v52, 4 }
 0x520   :  { %v6806_v62 = vadd.f32 %v8398_v59, %v2013_v42  ;;  %v2135_v33 = vrot.slane %v2116_v61, 3  ;;  %v2149_v46 = vrot.slane %v2124_v30, 3  ;;  %v2137_v7 = vrot.slane %v2117_v29, 2 }
 0x521   :  { %v2130_v10 = vsel %vm1062_vm3, %v2129_v5, %v2128_v12  ;;  %v2144_v11 = vsel %vm1062_vm3, %v2143_v36, %v2142_v25  ;;  %v2151_v20 = vrot.slane %v2125_v13, 2  ;;  %v2139_v60 = vrot.slane %v2118_v41, 1  ;;  %v6827_v25 = vld [vmem:[#allocation6 + $0x24] ss:$8 sps:$4 sm:$0xff]  }
 0x522   :  { %v2094_v19 = vpack.c.bf16 %v6806_v62, %v6806_v62  ;;  %v2132_v0 = vsel %vm1064_vm4, %v2131_v34, %v2130_v10  ;;  %v2146_v63 = vsel %vm1064_vm4, %v2145_v24, %v2144_v11  ;;  %v6823_v34 = vld [vmem:[#allocation6 + $0x14] ss:$8 sps:$4 sm:$0xff]   ;;  %v6837_v13 = vld [vmem:[#allocation7] sm:$0xff] }
 0x523   :  { %v2134_v35 = vsel %vm1066_vm5, %v2133_v16, %v2132_v0  ;;  %v2148_v50 = vsel %vm1066_vm5, %v2147_v58, %v2146_v63  ;;  %v6831_v24 = vld [vmem:[#allocation6 + $0x34] ss:$8 sps:$4 sm:$0xff]   ;;  %v2251_v59 = vrot.slane %v6837_v13, %v5648_v2 }
 0x524   :  { %v2126_v44 = vunpack.c.l.b16 %v2094_v19  ;;  %v2136_v52 = vsel %vm1068_vm6, %v2135_v33, %v2134_v35  ;;  %v2150_v61 = vsel %vm1068_vm6, %v2149_v46, %v2148_v50  ;;  %v84_v50 = vld [vmem:[#allocation4 + $0x28] sm:$0xff] }
 0x525   :  { %v2138_v47 = vsel %vm1070_vm7, %v2137_v7, %v2136_v52  ;;  %v2152_v42 = vsel %vm1070_vm7, %v2151_v20, %v2150_v61 }
 0x526   :  { %v2153_v30 = vrot.slane %v2126_v44, 1  ;;  %v2140_v57 = vsel %vm1072_vm8, %v2139_v60, %v2138_v47 }
 0x528   :  { %v2154_v12 = vsel %vm1072_vm8, %v2153_v30, %v2152_v42  ;;  %v82_v30 = vld [vmem:[#allocation4 + $0x18] sm:$0xff] }
 0x529   :  { %v2155_v29 = vpack.c.b16 %v2154_v12, %v2140_v57  ;;  %v85_v57 = vld [vmem:[#allocation4 + $0x30] sm:$0xff] }
 0x52b   :  { %4918 = vmatmul.mubr.msk.bf16.vlgmr.msra.gmra.mrb[0].mxu1 %vm420_vm0, %v2155_v29 }
 0x52c   :  { %5113 = vmatpush3.bf16.msra.mxu1 %v6511_v9  ;;  %v2245_v9 = vrot.slane %v6837_v13, %v5651_v3 }
 0x52d   :  { %5114 = vmatprep.subr.bf16.mxu1 %v6823_v34 }
 0x530   :  { %5115 = vmatpush3.bf16.msra.mxu1 %v6823_v34 }
 0x531   :  { %5116 = vmatprep.subr.bf16.mxu1 %v6827_v25 }
 0x534   :  { %5117 = vmatpush3.bf16.msra.mxu1 %v6827_v25 }
 0x535   :  { %5118 = vmatprep.subr.bf16.mxu1 %v6831_v24 }
 0x538   :  { %5119 = vmatpush3.bf16.msra.mxu1 %v6831_v24 }
 0x5fe   :  { %v2233_v41 = vpop.f32.mrb[0].mxu1 }
 0x5ff   :  { %v2246_v5 = vadd.f32 %v2245_v9, %v2233_v41  ;;  %v2235_v16 = vpop.f32.mrb[1].mxu1 }
 0x600   :  { %v6843_v36 = vadd.f32 %v2251_v59, %v2235_v16  ;;  %v2237_v58 = vpop.f32.mrb[2].mxu1 }
 0x601   :  { %v2247_v33 = vadd.f32 %v2245_v9, %v2237_v58  ;;  %2256 = vrot.lane.b32.xlu1 %v2246_v5, %s5530_s5  ;;  %v2239_v46 = vpop.f32.mrb[3].mxu1 }
 0x602   :  { %v6846_v19 = vadd.f32 %v2251_v59, %v2239_v46 }
 0x603   :  { %2258 = vrot.lane.b32.xlu0 %v2247_v33, %s5530_s5 }
 0x605   :  { %2388 = vrot.lane.b32.xlu1 %v6479_v21, %s5530_s5 }
 0x607   :  { %2390 = vrot.lane.b32.xlu0 %v6487_v22, %s5530_s5  ;;  %v8278_v22 = vmov 0.0  }
 0x608   :  { %5124 = vmatprep.subr.bf16.mxu1 %v8278_v22  ;;  %5148 = vmatprep.subr.bf16.mxu0 %v8278_v22 }
 0x609   :  { %2392 = vrot.lane.b32.xlu1 %v6497_v54, %s5530_s5  ;;  %5164 = vmatprep.mubr.msk.bf16.mxu0 %vm5534_vm11, %v8278_v22 }
 0x60b   :  { %2394 = vrot.lane.b32.xlu0 %v6506_v31, %s5530_s5 }
 0x60d   :  { %2401 = vrot.lane.b32.xlu1 %v2251_v59, %s5530_s5  ;;  %v83_v59 = vld [vmem:[#allocation4 + $0x20] sm:$0xff] }
 0x673   :  { %v2257_v10 = vpop.permute.xlu1 %2256 }
 0x674   :  { %v2262_v11 = vmul.f32 %v2257_v10, %v2246_v5  ;;  %v2264_v20 = vmul.f32 %v2257_v10, %v2247_v33 }
 0x675   :  { %v2259_v7 = vpop.permute.xlu0 %2258 }
 0x676   :  { %v2263_v44 = vmul.f32 %v2259_v7, %v2246_v5  ;;  %v2265_v0 = vmul.f32 %v2259_v7, %v2247_v33 }
 0x677   :  { %v2389_v21 = vpop.permute.xlu1 %2388 }
 0x678   :  { %v2266_v60 = vpack.c.bf16 %v2263_v44, %v2262_v11  ;;  %v2267_v63 = vpack.c.bf16 %v2265_v0, %v2264_v20 }
 0x679   :  { %v2391_v54 = vpop.permute.xlu0 %2390 }
 0x67a   :  { %5120 = vmatprep.mubr.msk.bf16.mxu1 %vm420_vm0, %v2266_v60 }
 0x67b   :  { %5121 = vmatmul.mubr.msk.bf16.vlgmr.msra.gmra.mrb[4].mxu1 %vm420_vm0, %v2267_v63  ;;  %v2393_v31 = vpop.permute.xlu1 %2392 }
 0x67c   :  { %5132 = vmatprep.mubr.msk.bf16.mxu1 %vm5534_vm11, %v8278_v22  ;;  %5125 = vmatpush3.bf16.msra.mxu1 %v2389_v21 }
 0x67d   :  { %5126 = vmatprep.subr.bf16.mxu1 %v8278_v22  ;;  %v2395_v35 = vpop.permute.xlu0 %2394 }
 0x680   :  { %5127 = vmatpush3.bf16.msra.mxu1 %v2391_v54 }
 0x681   :  { %5128 = vmatprep.subr.bf16.mxu1 %v8278_v22 }
 0x684   :  { %5129 = vmatpush3.bf16.msra.mxu1 %v2393_v31 }
 0x685   :  { %5130 = vmatprep.subr.bf16.mxu1 %v8278_v22 }
 0x688   :  { %5131 = vmatpush3.bf16.msra.mxu1 %v2395_v35 }
 0x689   :  { %5136 = vmatprep.subr.bf16.mxu1 %v8278_v22 }
 0x74e   :  { %v5122_v52 = vpop.f32.mrb[4].mxu1 }
 0x74f   :  { %v2341_v61 = vmul.f32 0.25, %v5122_v52  ;;  %v2324_v47 = vpop.f32.mrb[5].mxu1 }
 0x750   :  { %v2339_v42 = vmul.f32 0.25, %v2324_v47  ;;  %v5123_v12 = vpop.f32.mrb[6].mxu1 }
 0x751   :  { %v2345_v29 = vadd.f32 %v2341_v61, %v84_v50  ;;  %v2342_v9 = vmul.f32 0.25, %v5123_v12  ;;  %v2327_v41 = vpop.f32.mrb[7].mxu1 }
 0x752   :  { %v2343_v5 = vadd.f32 %v2339_v42, %v82_v30  ;;  %v2340_v16 = vmul.f32 0.25, %v2327_v41 }
 0x753   :  { %v2346_v58 = vadd.f32 %v2342_v9, %v85_v57  ;;  %v2350_v46 = vsel %vm420_vm0, %v2345_v29, -inf }
 0x754   :  { %v2344_v33 = vadd.f32 %v2340_v16, %v83_v59  ;;  %v2347_v7 = vsel %vm420_vm0, %v2343_v5, -inf }
 0x755   :  { %v2351_v10 = vsel %vm420_vm0, %v2346_v58, -inf }
 0x756   :  { %v2352_v11 = vmax.f32 %v2350_v46, %v2351_v10  ;;  %v2348_v20 = vsel %vm420_vm0, %v2344_v33, -inf }
 0x757   :  { %v2349_v44 = vmax.f32 %v2347_v7, %v2348_v20 }
 0x758   :  { %v2355_v0 = vsub.f32 %v2345_v29, %v2352_v11  ;;  %v2356_v60 = vsub.f32 %v2346_v58, %v2352_v11 }
 0x759   :  { %v2353_v63 = vsub.f32 %v2343_v5, %v2349_v44  ;;  %v2354_v21 = vsub.f32 %v2344_v33, %v2349_v44 }
 0x75a   :  { %v2361_v54 = vmul.f32 1.442695, %v2355_v0  ;;  %v2363_v31 = vmul.f32 1.442695, %v2356_v60 }
 0x75b   :  { %v2357_v35 = vmul.f32 1.442695, %v2353_v63  ;;  %v2359_v50 = vmul.f32 1.442695, %v2354_v21 }
 0x75c   :  { %5378 = vpow2.f32 %v2361_v54 }
 0x75d   :  { %5380 = vpow2.f32 %v2363_v31 }
 0x75e   :  { %5382 = vpow2.f32 %v2357_v35  ;;  %v2402_v35 = vpop.permute.xlu1 %2401 }
 0x75f   :  { %5384 = vpow2.f32 %v2359_v50 }
 0x766   :  { %v5379_v52 = vpop.eup %5378 }
 0x767   :  { %v5381_v61 = vpop.eup %5380  ;;  %v2368_v30 = vsel %vm420_vm0, %v5379_v52, 0.0 }
 0x768   :  { %v5383_v47 = vpop.eup %5382  ;;  %v2369_v42 = vsel %vm420_vm0, %v5381_v61, 0.0 }
 0x769   :  { %v5385_v57 = vpop.eup %5384  ;;  %v2370_v12 = vadd.f32 %v2369_v42, %v2368_v30  ;;  %v2365_v29 = vsel %vm420_vm0, %v5383_v47, 0.0 }
 0x76a   :  { %v2366_v9 = vsel %vm420_vm0, %v5385_v57, 0.0 }
 0x76b   :  { %5386 = vrcp.f32 %v2370_v12  ;;  %v2367_v59 = vadd.f32 %v2366_v9, %v2365_v29 }
 0x76d   :  { %5388 = vrcp.f32 %v2367_v59 }
 0x775   :  { %v5387_v41 = vpop.eup %5386 }
 0x776   :  { %v2376_v5 = vmul.f32 %v5387_v41, %v5381_v61  ;;  %v2375_v16 = vmul.f32 %v5387_v41, %v5379_v52 }
 0x777   :  { %v5389_v58 = vpop.eup %5388 }
 0x778   :  { %v2374_v33 = vmul.f32 %v5389_v58, %v5385_v57  ;;  %v2373_v46 = vmul.f32 %v5389_v58, %v5383_v47  ;;  %v2379_v10 = vmul.f32 %v2375_v16, %v6843_v36  ;;  %v2380_v7 = vmul.f32 %v2376_v5, %v6846_v19 }
 0x77a   :  { %v2377_v11 = vmul.f32 %v2373_v46, %v6843_v36  ;;  %v2378_v20 = vmul.f32 %v2374_v33, %v6846_v19  ;;  %v2384_v44 = vsel %vm420_vm0, %v2379_v10, 0.0  ;;  %v2385_v0 = vsel %vm420_vm0, %v2380_v7, 0.0 }
 0x77b   :  { %v2386_v60 = vadd.f32 %v2385_v0, %v2384_v44 }
 0x77c   :  { %v2381_v63 = vsel %vm420_vm0, %v2377_v11, 0.0  ;;  %v2382_v21 = vsel %vm420_vm0, %v2378_v20, 0.0 }
 0x77d   :  { %v2383_v54 = vadd.f32 %v2382_v21, %v2381_v63 }
 0x77f   :  { %v2387_v31 = vpack.c.bf16 %v2386_v60, %v2383_v54 }
 0x781   :  { %5133 = vmatmul.mubr.msk.bf16.vlgmr.msra.gmra.mrb[8].mxu1 %vm420_vm0, %v2387_v31 }
 0x782   :  { %5144 = vmatprep.mubr.msk.bf16.mxu1 %vm5534_vm11, %v8278_v22 }
 0x854   :  { %v2441_v36 = vpop.f32.mrb[8].mxu1 }
 0x855   :  { %v2442_v50 = vadd.f32 %v2441_v36, %v2402_v35  ;;  %v5134_v19 = vpop.f32.mrb[9].mxu1 }
 0x856   :  { %v2444_v52 = vpop.f32.mrb[10].mxu1 }
 0x857   :  { %v2445_v61 = vadd.f32 %v2444_v52, %v2402_v35  ;;  %v5135_v30 = vpop.f32.mrb[11].mxu1  ;;  %v2450_v47 = vrot.slane %v2442_v50, 1  ;;  %v2451_v42 = vrot.slane %v2442_v50, 2  ;;  %v2452_v57 = vrot.slane %v2442_v50, 3 }
 0x858   :  { %v2453_v12 = vrot.slane %v2442_v50, 4  ;;  %v2454_v29 = vrot.slane %v2442_v50, 5  ;;  %v2455_v9 = vrot.slane %v2442_v50, 6  ;;  %v2456_v59 = vrot.slane %v2442_v50, 7 }
 0x859   :  { %v6890_v41 = vadd.f32 %v2450_v47, %v6577_v51  ;;  %v6893_v5 = vadd.f32 %v2451_v42, %v6604_v32  ;;  %v6896_v16 = vadd.f32 %v2452_v57, %v6733_v18  ;;  %v2480_v10 = vadd.f32 %v2442_v50, %v6654_v55 }
 0x85a   :  { %v6899_v58 = vadd.f32 %v2453_v12, %v6744_v37  ;;  %v6902_v33 = vadd.f32 %v2454_v29, %v6758_v40  ;;  %v6905_v46 = vadd.f32 %v2455_v9, %v6770_v53  ;;  %v2457_v32 = vrot.slane %v2445_v61, 1 }
 0x85b   :  { %v2512_v51 = vrot.slane %v6890_v41, 7  ;;  %v2514_v7 = vrot.slane %v6893_v5, 6  ;;  %v6911_v11 = vadd.f32 %v2456_v59, %v6776_v39  ;;  %v2516_v18 = vrot.slane %v6896_v16, 5 }
 0x85c   :  { %v2518_v37 = vrot.slane %v6899_v58, 4  ;;  %v2520_v40 = vrot.slane %v6902_v33, 3  ;;  %v2458_v53 = vrot.slane %v2445_v61, 2  ;;  %v2459_v44 = vrot.slane %v2445_v61, 3 }
 0x85d   :  { %v2513_v20 = vsel %vm1060_vm2, %v2512_v51, %v2480_v10  ;;  %v2460_v0 = vrot.slane %v2445_v61, 4  ;;  %v2522_v60 = vrot.slane %v6905_v46, 2  ;;  %v2461_v63 = vrot.slane %v2445_v61, 5 }
 0x85e   :  { %v2515_v55 = vsel %vm1062_vm3, %v2514_v7, %v2513_v20  ;;  %v2462_v21 = vrot.slane %v2445_v61, 6  ;;  %v2463_v54 = vrot.slane %v2445_v61, 7  ;;  %v6921_v31 = vadd.f32 %v2457_v32, %v6726_v45 }
 0x85f   :  { %v2517_v39 = vsel %vm1064_vm4, %v2516_v18, %v2515_v55  ;;  %v6924_v35 = vadd.f32 %v2458_v53, %v6750_v4  ;;  %v2524_v50 = vrot.slane %v6911_v11, 1  ;;  %v6929_v19 = vadd.f32 %v2459_v44, %v6740_v27 }
 0x860   :  { %v2519_v36 = vsel %vm1066_vm5, %v2518_v37, %v2517_v39  ;;  %v6932_v52 = vadd.f32 %v2460_v0, %v6754_v23  ;;  %v6936_v47 = vadd.f32 %v2445_v61, %v6736_v48  ;;  %v6939_v45 = vadd.f32 %v2461_v63, %v6762_v28 }
 0x861   :  { %v2521_v30 = vsel %vm1068_vm6, %v2520_v40, %v2519_v36  ;;  %v2526_v4 = vrot.slane %v6921_v31, 7  ;;  %v6944_v57 = vadd.f32 %v2462_v21, %v6794_v26  ;;  %v2528_v27 = vrot.slane %v6924_v35, 6 }
 0x862   :  { %v2523_v42 = vsel %vm1070_vm7, %v2522_v60, %v2521_v30  ;;  %v6949_v12 = vadd.f32 %v2463_v54, %v6806_v62  ;;  %v2530_v28 = vrot.slane %v6929_v19, 5  ;;  %v2532_v9 = vrot.slane %v6932_v52, 4 }
 0x863   :  { %v2525_v23 = vsel %vm1072_vm8, %v2524_v50, %v2523_v42  ;;  %v2527_v48 = vsel %vm1060_vm2, %v2526_v4, %v6936_v47  ;;  %v2534_v59 = vrot.slane %v6939_v45, 3  ;;  %v2536_v62 = vrot.slane %v6944_v57, 2 }
 0x864   :  { %v2542_v61 = vsel %vm420_vm0, %v2525_v23, 0.0  ;;  %v2529_v29 = vsel %vm1062_vm3, %v2528_v27, %v2527_v48  ;;  %v2538_v32 = vrot.slane %v6949_v12, 1  ;;  %v6968_v20 = vrot.slane %v6837_v13, %v5666_v14 }
 0x865   :  { %2543 = vadd.xlane.f32.xlu0 %v2542_v61  ;;  %v2531_v26 = vsel %vm1064_vm4, %v2530_v28, %v2529_v29 }
 0x866   :  { %v2533_v51 = vsel %vm1066_vm5, %v2532_v9, %v2531_v26 }
 0x867   :  { %v2535_v7 = vsel %vm1068_vm6, %v2534_v59, %v2533_v51 }
 0x868   :  { %v2537_v18 = vsel %vm1070_vm7, %v2536_v62, %v2535_v7 }
 0x869   :  { %v2539_v37 = vsel %vm1072_vm8, %v2538_v32, %v2537_v18 }
 0x86a   :  { %v2545_v40 = vsel %vm420_vm0, %v2539_v37, 0.0 }
 0x86b   :  { %2546 = vadd.xlane.f32.xlu1 %v2545_v40 }
 0x87c   :  { %2726 = vrot.lane.b32.xlu1 %v6968_v20, %s5530_s5 }
 0x8f2   :  { %v2544_v53 = vpop.xlane.xlu0 %2543 }
 0x8f3   :  { %v2549_v44 = vmul.f32 0.015625, %v2544_v53 }
 0x8f5   :  { %v2553_v0 = vrot.slane %v2549_v44, 1  ;;  %v2554_v55 = vrot.slane %v2549_v44, 2  ;;  %v2555_v60 = vrot.slane %v2549_v44, 3  ;;  %v2556_v63 = vrot.slane %v2549_v44, 4 }
 0x8f6   :  { %v2557_v21 = vrot.slane %v2549_v44, 5  ;;  %v2558_v39 = vrot.slane %v2549_v44, 6  ;;  %v2559_v54 = vrot.slane %v2549_v44, 7  ;;  %v6972_v36 = vsub.f32 %v2480_v10, %v2549_v44 }
 0x8f7   :  { %v6975_v50 = vsub.f32 %v6890_v41, %v2553_v0  ;;  %v6978_v30 = vsub.f32 %v6893_v5, %v2554_v55  ;;  %v6981_v4 = vsub.f32 %v6896_v16, %v2555_v60  ;;  %v6984_v42 = vsub.f32 %v6899_v58, %v2556_v63 }
 0x8f8   :  { %v2547_v27 = vpop.xlane.xlu1 %2546  ;;  %v6987_v23 = vsub.f32 %v6902_v33, %v2557_v21  ;;  %v6990_v48 = vsub.f32 %v6905_v46, %v2558_v39  ;;  %v6993_v10 = vsub.f32 %v6911_v11, %v2559_v54  ;;  %v2599_v33 = vmul.f32 %v6972_v36, %v6972_v36 }
 0x8f9   :  { %v2550_v41 = vmul.f32 0.015625, %v2547_v27  ;;  %v2600_v5 = vmul.f32 %v6975_v50, %v6975_v50  ;;  %v2601_v16 = vmul.f32 %v6978_v30, %v6978_v30  ;;  %v2602_v58 = vmul.f32 %v6981_v4, %v6981_v4 }
 0x8fa   :  { %v2603_v46 = vmul.f32 %v6984_v42, %v6984_v42  ;;  %v2604_v11 = vmul.f32 %v6987_v23, %v6987_v23  ;;  %v2605_v28 = vmul.f32 %v6990_v48, %v6990_v48  ;;  %v2606_v61 = vmul.f32 %v6993_v10, %v6993_v10 }
 0x8fb   :  { %v2631_v29 = vrot.slane %v2600_v5, 7  ;;  %v2633_v9 = vrot.slane %v2601_v16, 6  ;;  %v2560_v26 = vrot.slane %v2550_v41, 1  ;;  %v2635_v59 = vrot.slane %v2602_v58, 5 }
 0x8fc   :  { %v2637_v51 = vrot.slane %v2603_v46, 4  ;;  %v2639_v62 = vrot.slane %v2604_v11, 3  ;;  %v2641_v7 = vrot.slane %v2605_v28, 2  ;;  %v2561_v18 = vrot.slane %v2550_v41, 2 }
 0x8fd   :  { %v2632_v32 = vsel %vm1060_vm2, %v2631_v29, %v2599_v33  ;;  %v2562_v37 = vrot.slane %v2550_v41, 3  ;;  %v2563_v40 = vrot.slane %v2550_v41, 4  ;;  %v2564_v44 = vrot.slane %v2550_v41, 5 }
 0x8fe   :  { %v2634_v53 = vsel %vm1062_vm3, %v2633_v9, %v2632_v32  ;;  %v2565_v0 = vrot.slane %v2550_v41, 6  ;;  %v2566_v55 = vrot.slane %v2550_v41, 7  ;;  %v7015_v63 = vsub.f32 %v6936_v47, %v2550_v41 }
 0x8ff   :  { %v2636_v60 = vsel %vm1064_vm4, %v2635_v59, %v2634_v53  ;;  %v7018_v21 = vsub.f32 %v6921_v31, %v2560_v26  ;;  %v7021_v39 = vsub.f32 %v6924_v35, %v2561_v18  ;;  %v7025_v27 = vsub.f32 %v6929_v19, %v2562_v37 }
 0x900   :  { %v2638_v54 = vsel %vm1066_vm5, %v2637_v51, %v2636_v60  ;;  %v7028_v5 = vsub.f32 %v6932_v52, %v2563_v40  ;;  %v7031_v16 = vsub.f32 %v6939_v45, %v2564_v44  ;;  %v2643_v41 = vrot.slane %v2606_v61, 1  ;;  %v5274_v60 = vld [vmem:[%s8203_s3 + $0x8] ss:$12 sps:$4 sm:$0xff]  }
 0x901   :  { %v2640_v47 = vsel %vm1068_vm6, %v2639_v62, %v2638_v54  ;;  %v7035_v31 = vsub.f32 %v6944_v57, %v2565_v0  ;;  %v7038_v35 = vsub.f32 %v6949_v12, %v2566_v55  ;;  %v2608_v19 = vmul.f32 %v7018_v21, %v7018_v21  ;;  %5137 = vmatpush3.bf16.msra.mxu1 %v5274_v60  ;;  %v5275_v54 = vld [vmem:[%s8203_s3 + $0x20] ss:$12 sps:$4 sm:$0xff]  }
 0x902   :  { %v2642_v58 = vsel %vm1070_vm7, %v2641_v7, %v2640_v47  ;;  %v2609_v52 = vmul.f32 %v7021_v39, %v7021_v39  ;;  %v2610_v45 = vmul.f32 %v7025_v27, %v7025_v27  ;;  %v2607_v57 = vmul.f32 %v7015_v63, %v7015_v63  ;;  %5138 = vmatprep.subr.bf16.mxu1 %v8278_v22  ;;  %v5276_v47 = vld [vmem:[%s8203_s3 + $0x38] ss:$12 sps:$4 sm:$0xff]  }
 0x903   :  { %v2644_v33 = vsel %vm1072_vm8, %v2643_v41, %v2642_v58  ;;  %v2611_v12 = vmul.f32 %v7028_v5, %v7028_v5  ;;  %v2612_v11 = vmul.f32 %v7031_v16, %v7031_v16  ;;  %v2645_v28 = vrot.slane %v2608_v19, 7  ;;  %v5277_v41 = vld [vmem:[%s8203_s3 + $0x50] ss:$12 sps:$4 sm:$0xff]   ;;  %v5278_v58 = vld [vmem:[%s8204_s4] sm:$0xff]   ;;  %v5279_v19 = vld [vmem:[%s8204_s4 + $0x8] sm:$0xff]  }
 0x904   :  { %v2661_v46 = vsel %vm420_vm0, %v2644_v33, 0.0  ;;  %v2647_v61 = vrot.slane %v2609_v52, 6  ;;  %v2613_v29 = vmul.f32 %v7035_v31, %v7035_v31  ;;  %v2614_v9 = vmul.f32 %v7038_v35, %v7038_v35  ;;  %5149 = vmatpush3.bf16.msra.mxu0 %v5278_v58  ;;  %v5280_v52 = vld [vmem:[%s8204_s4 + $0x10] sm:$0xff]   ;;  %v5282_v33 = vld [vmem:[%s8204_s4 + $0x20] sm:$0xff]  }
 0x905   :  { %2662 = vadd.xlane.f32.xlu0 %v2661_v46  ;;  %v2646_v26 = vsel %vm1060_vm2, %v2645_v28, %v2607_v57  ;;  %v2649_v59 = vrot.slane %v2610_v45, 5  ;;  %v2651_v62 = vrot.slane %v2611_v12, 4  ;;  %v2653_v32 = vrot.slane %v2612_v11, 3  ;;  %5139 = vmatpush3.bf16.msra.mxu1 %v5275_v54  ;;  %v5281_v45 = vld [vmem:[%s8204_s4 + $0x18] sm:$0xff]   ;;  %v5283_v57 = vld [vmem:[%s8204_s4 + $0x28] sm:$0xff]   ;;  %v5284_v12 = vld [vmem:[%s8204_s4 + $0x30] sm:$0xff]  }
 0x906   :  { %v2648_v51 = vsel %vm1062_vm3, %v2647_v61, %v2646_v26  ;;  %v2655_v37 = vrot.slane %v2613_v29, 2  ;;  %v2657_v53 = vrot.slane %v2614_v9, 1  ;;  %5140 = vmatprep.subr.bf16.mxu1 %v8278_v22  ;;  %5150 = vmatprep.subr.bf16.mxu0 %v8278_v22 }
 0x907   :  { %v2650_v7 = vsel %vm1064_vm4, %v2649_v59, %v2648_v51  ;;  %v7112_v59 = vrot.slane %v6837_v13, %v5669_v15  ;;  %v2727_v51 = vpop.permute.xlu1 %2726 }
 0x908   :  { %v2652_v18 = vsel %vm1066_vm5, %v2651_v62, %v2650_v7  ;;  %5151 = vmatpush3.bf16.msra.mxu0 %v5279_v19 }
 0x909   :  { %v2654_v40 = vsel %vm1068_vm6, %v2653_v32, %v2652_v18  ;;  %5141 = vmatpush3.bf16.msra.mxu1 %v5276_v47  ;;  %5152 = vmatprep.subr.bf16.mxu0 %v8278_v22 }
 0x90a   :  { %v2656_v44 = vsel %vm1070_vm7, %v2655_v37, %v2654_v40  ;;  %5142 = vmatprep.subr.bf16.mxu1 %v8278_v22 }
 0x90b   :  { %v2658_v0 = vsel %vm1072_vm8, %v2657_v53, %v2656_v44 }
 0x90c   :  { %v2664_v55 = vsel %vm420_vm0, %v2658_v0, 0.0  ;;  %5153 = vmatpush3.bf16.msra.mxu0 %v5280_v52 }
 0x90d   :  { %2665 = vadd.xlane.f32.xlu0 %v2664_v55  ;;  %5143 = vmatpush3.bf16.msra.mxu1 %v5277_v41 }
 0x90e   :  { %5154 = vmatprep.subr.bf16.mxu0 %v8278_v22 }
 0x910   :  { %5155 = vmatpush3.bf16.msra.mxu0 %v5281_v45 }
 0x911   :  { %5156 = vmatprep.subr.bf16.mxu0 %v8278_v22 }
 0x914   :  { %5157 = vmatpush3.bf16.msra.mxu0 %v5282_v33 }
 0x915   :  { %5158 = vmatprep.subr.bf16.mxu0 %v8278_v22 }
 0x918   :  { %5159 = vmatpush3.bf16.msra.mxu0 %v5283_v57 }
 0x919   :  { %5160 = vmatprep.subr.bf16.mxu0 %v8278_v22 }
 0x91c   :  { %5161 = vmatpush3.bf16.msra.mxu0 %v5284_v12 }
 0x91d   :  { %5162 = vmatprep.subr.bf16.mxu0 %v8278_v22 }
 0x992   :  { %v2663_v46 = vpop.xlane.xlu0 %2662 }
 0x993   :  { %v2667_v11 = vmul.f32 0.015625, %v2663_v46 }
 0x995   :  { %v2669_v28 = vadd.f32 1e-05, %v2667_v11 }
 0x997   :  { %5390 = vrsqrt.f32 %v2669_v28 }
 0x99a   :  { %v2666_v61 = vpop.xlane.xlu0 %2665 }
 0x99b   :  { %v2668_v29 = vmul.f32 0.015625, %v2666_v61 }
 0x99d   :  { %v2670_v9 = vadd.f32 1e-05, %v2668_v29 }
 0x99f   :  { %5392 = vrsqrt.f32 %v2670_v9 }
 0x9a1   :  { %v5391_v26 = vpop.eup %5390 }
 0x9a2   :  { %v2675_v62 = vrot.slane %v5391_v26, 1  ;;  %v2676_v7 = vrot.slane %v5391_v26, 2  ;;  %v2677_v32 = vrot.slane %v5391_v26, 3  ;;  %v2678_v18 = vrot.slane %v5391_v26, 4 }
 0x9a3   :  { %v2679_v37 = vrot.slane %v5391_v26, 5  ;;  %v2680_v40 = vrot.slane %v5391_v26, 6  ;;  %v2681_v53 = vrot.slane %v5391_v26, 7  ;;  %v2705_v44 = vmul.f32 %v5391_v26, %v6972_v36 }
 0x9a4   :  { %v2706_v0 = vmul.f32 %v2675_v62, %v6975_v50  ;;  %v2707_v55 = vmul.f32 %v2676_v7, %v6978_v30  ;;  %v2708_v60 = vmul.f32 %v2677_v32, %v6981_v4  ;;  %v2709_v54 = vmul.f32 %v2678_v18, %v6984_v42 }
 0x9a5   :  { %v2710_v47 = vmul.f32 %v2679_v37, %v6987_v23  ;;  %v2711_v41 = vmul.f32 %v2680_v40, %v6990_v48  ;;  %v2712_v58 = vmul.f32 %v2681_v53, %v6993_v10  ;;  %v2729_v19 = vmul.f32 %v2727_v51, %v2705_v44 }
 0x9a6   :  { %v2730_v52 = vmul.f32 %v2727_v51, %v2706_v0  ;;  %v2731_v45 = vmul.f32 %v2727_v51, %v2707_v55  ;;  %v2732_v33 = vmul.f32 %v2727_v51, %v2708_v60  ;;  %v2733_v57 = vmul.f32 %v2727_v51, %v2709_v54 }
 0x9a7   :  { %v2734_v36 = vmul.f32 %v2727_v51, %v2710_v47  ;;  %v2735_v12 = vmul.f32 %v2727_v51, %v2711_v41  ;;  %v2736_v50 = vmul.f32 %v2727_v51, %v2712_v58  ;;  %v7123_v30 = vadd.f32 %v7112_v59, %v2729_v19 }
 0x9a8   :  { %v7126_v4 = vadd.f32 %v7112_v59, %v2730_v52  ;;  %v7129_v42 = vadd.f32 %v7112_v59, %v2731_v45  ;;  %v7132_v48 = vadd.f32 %v7112_v59, %v2732_v33  ;;  %v7135_v10 = vadd.f32 %v7112_v59, %v2733_v57 }
 0x9a9   :  { %v5393_v23 = vpop.eup %5392  ;;  %v7138_v46 = vadd.f32 %v7112_v59, %v2734_v36  ;;  %v7141_v11 = vadd.f32 %v7112_v59, %v2735_v12 }
 0x9aa   :  { %v2682_v28 = vrot.slane %v5393_v23, 1  ;;  %v2683_v61 = vrot.slane %v5393_v23, 2  ;;  %v2684_v29 = vrot.slane %v5393_v23, 3  ;;  %v2685_v9 = vrot.slane %v5393_v23, 4 }
 0x9ab   :  { %v2686_v26 = vrot.slane %v5393_v23, 5  ;;  %v2687_v62 = vrot.slane %v5393_v23, 6  ;;  %v2688_v7 = vrot.slane %v5393_v23, 7  ;;  %v2713_v32 = vmul.f32 %v5393_v23, %v7015_v63 }
 0x9ac   :  { %v2714_v18 = vmul.f32 %v2682_v28, %v7018_v21  ;;  %v2715_v37 = vmul.f32 %v2683_v61, %v7021_v39  ;;  %v2716_v40 = vmul.f32 %v2684_v29, %v7025_v27  ;;  %v2717_v53 = vmul.f32 %v2685_v9, %v7028_v5 }
 0x9ad   :  { %v2718_v44 = vmul.f32 %v2686_v26, %v7031_v16  ;;  %v2719_v0 = vmul.f32 %v2687_v62, %v7035_v31  ;;  %v2720_v55 = vmul.f32 %v2688_v7, %v7038_v35  ;;  %v2737_v60 = vmul.f32 %v2727_v51, %v2713_v32 }
 0x9ae   :  { %v2738_v54 = vmul.f32 %v2727_v51, %v2714_v18  ;;  %v2739_v47 = vmul.f32 %v2727_v51, %v2715_v37  ;;  %v2740_v41 = vmul.f32 %v2727_v51, %v2716_v40  ;;  %v2741_v58 = vmul.f32 %v2727_v51, %v2717_v53 }
 0x9af   :  { %v2742_v63 = vmul.f32 %v2727_v51, %v2718_v44  ;;  %v2743_v19 = vmul.f32 %v2727_v51, %v2719_v0  ;;  %v2744_v21 = vmul.f32 %v2727_v51, %v2720_v55  ;;  %v7152_v39 = vadd.f32 %v7112_v59, %v2736_v50 }
 0x9b0   :  { %v7155_v27 = vadd.f32 %v7112_v59, %v2738_v54  ;;  %v7158_v5 = vadd.f32 %v7112_v59, %v2739_v47  ;;  %v7161_v16 = vadd.f32 %v7112_v59, %v2740_v41  ;;  %v2766_v31 = vpack.c.bf16 %v7126_v4, %v7126_v4 }
 0x9b1   :  { %v7166_v35 = vadd.f32 %v7112_v59, %v2737_v60  ;;  %v7169_v51 = vadd.f32 %v7112_v59, %v2741_v58  ;;  %v7172_v52 = vadd.f32 %v7112_v59, %v2742_v63  ;;  %v2767_v45 = vpack.c.bf16 %v7129_v42, %v7129_v42 }
 0x9b2   :  { %v7177_v33 = vadd.f32 %v7112_v59, %v2743_v19  ;;  %v7180_v57 = vadd.f32 %v7112_v59, %v2744_v21  ;;  %v2768_v36 = vpack.c.bf16 %v7132_v48, %v7132_v48  ;;  %v2774_v12 = vpack.c.bf16 %v7155_v27, %v7155_v27 }
 0x9b3   :  { %v2765_v50 = vpack.c.bf16 %v7123_v30, %v7123_v30  ;;  %v2769_v23 = vpack.c.bf16 %v7135_v10, %v7135_v10  ;;  %v2770_v28 = vpack.c.bf16 %v7138_v46, %v7138_v46  ;;  %v2775_v61 = vpack.c.bf16 %v7158_v5, %v7158_v5 }
 0x9b4   :  { %v2771_v29 = vpack.c.bf16 %v7141_v11, %v7141_v11  ;;  %v2772_v9 = vpack.c.bf16 %v7152_v39, %v7152_v39  ;;  %v2776_v26 = vpack.c.bf16 %v7161_v16, %v7161_v16  ;;  %v2802_v62 = vunpack.c.l.b16 %v2766_v31 }
 0x9b5   :  { %v2773_v7 = vpack.c.bf16 %v7166_v35, %v7166_v35  ;;  %v2777_v32 = vpack.c.bf16 %v7169_v51, %v7169_v51  ;;  %v2778_v18 = vpack.c.bf16 %v7172_v52, %v7172_v52  ;;  %v2803_v37 = vunpack.c.l.b16 %v2767_v45 }
 0x9b6   :  { %v2779_v40 = vpack.c.bf16 %v7177_v33, %v7177_v33  ;;  %v2780_v53 = vpack.c.bf16 %v7180_v57, %v7180_v57  ;;  %v2804_v44 = vunpack.c.l.b16 %v2768_v36  ;;  %v2810_v0 = vunpack.c.l.b16 %v2774_v12 }
 0x9b7   :  { %v2801_v55 = vunpack.c.l.b16 %v2765_v50  ;;  %v2805_v60 = vunpack.c.l.b16 %v2769_v23  ;;  %v2806_v54 = vunpack.c.l.b16 %v2770_v28  ;;  %v2811_v47 = vunpack.c.l.b16 %v2775_v61 }
 0x9b8   :  { %v2807_v41 = vunpack.c.l.b16 %v2771_v29  ;;  %v2812_v58 = vunpack.c.l.b16 %v2776_v26  ;;  %v2817_v63 = vrot.slane %v2802_v62, 7  ;;  %v2819_v19 = vrot.slane %v2803_v37, 6 }
 0x9b9   :  { %v2808_v21 = vunpack.c.l.b16 %v2772_v9  ;;  %v2809_v31 = vunpack.c.l.b16 %v2773_v7  ;;  %v2813_v22 = vunpack.c.l.b16 %v2777_v32  ;;  %v2814_v45 = vunpack.c.l.b16 %v2778_v18 }
 0x9ba   :  { %v2818_v38 = vsel %vm1060_vm2, %v2817_v63, %v2801_v55  ;;  %v2821_v49 = vrot.slane %v2804_v44, 5  ;;  %v2831_v1 = vrot.slane %v2810_v0, 7  ;;  %v2833_v43 = vrot.slane %v2811_v47, 6 }
 0x9bb   :  { %v2815_v6 = vunpack.c.l.b16 %v2779_v40  ;;  %v2816_v36 = vunpack.c.l.b16 %v2780_v53  ;;  %v2820_v12 = vsel %vm1062_vm3, %v2819_v19, %v2818_v38  ;;  %v2823_v50 = vrot.slane %v2805_v60, 4 }
 0x9bc   :  { %v2822_v23 = vsel %vm1064_vm4, %v2821_v49, %v2820_v12  ;;  %v2825_v28 = vrot.slane %v2806_v54, 3  ;;  %v2832_v61 = vsel %vm1060_vm2, %v2831_v1, %v2809_v31  ;;  %v2835_v29 = vrot.slane %v2812_v58, 5  ;;  %v5285_v54 = vld [vmem:[%s8204_s4 + $0x38] sm:$0xff]  }
 0x9bd   :  { %v2824_v9 = vsel %vm1066_vm5, %v2823_v50, %v2822_v23  ;;  %v2827_v26 = vrot.slane %v2807_v41, 2  ;;  %v2834_v62 = vsel %vm1062_vm3, %v2833_v43, %v2832_v61  ;;  %v2837_v7 = vrot.slane %v2813_v22, 4  ;;  %5163 = vmatpush3.bf16.msra.mxu0 %v5285_v54 }
 0x9be   :  { %v2826_v32 = vsel %vm1068_vm6, %v2825_v28, %v2824_v9  ;;  %v2836_v18 = vsel %vm1064_vm4, %v2835_v29, %v2834_v62  ;;  %v2839_v37 = vrot.slane %v2814_v45, 3  ;;  %v2841_v49 = vrot.slane %v2815_v6, 2  ;;  %v5418_v6 = vld [vmem:[#allocation6 + $0x4] ss:$8 sps:$4 sm:$0xff]  }
 0x9bf   :  { %v2828_v38 = vsel %vm1070_vm7, %v2827_v26, %v2826_v32  ;;  %v2838_v40 = vsel %vm1066_vm5, %v2837_v7, %v2836_v18  ;;  %v2829_v53 = vrot.slane %v2808_v21, 1  ;;  %v2843_v44 = vrot.slane %v2816_v36, 1  ;;  %5168 = vmatprep.subr.bf16.mxu0 %v5418_v6 }
 0x9c0   :  { %v2840_v1 = vsel %vm1068_vm6, %v2839_v37, %v2838_v40  ;;  %v8399_v60 = vmov 0   ;;  %v2784_v47 = vrot.slane %v6837_v13, %v5656_v8  ;;  %v8400_v13 = vmov 0.0  }
 0x9c1   :  { %v2842_v0 = vsel %vm1070_vm7, %v2841_v49, %v2840_v1  ;;  %v2830_v55 = vsel %vm1072_vm8, %v2829_v53, %v2828_v38 }
 0x9c2   :  { %v2844_v43 = vsel %vm1072_vm8, %v2843_v44, %v2842_v0 }
 0x9c3   :  { %v2845_v22 = vpack.c.b16 %v2844_v43, %v2830_v55 }
 0x9c5   :  { %5145 = vmatmul.mubr.msk.bf16.vlgmr.msra.gmra.mrb[12].mxu1 %vm420_vm0, %v2845_v22 }
 0x9c6   :  { %3506 = vmatprep.mubr.bf16.mxu1 %v8399_v60 }
 0xa98   :  { %v2907_v41 = vpop.f32.mrb[12].mxu1 }
 0xa99   :  { %v2908_v58 = vadd.f32 %v2907_v41, %v2784_v47  ;;  %v5146_v63 = vpop.f32.mrb[13].mxu1 }
 0xa9a   :  { %v2910_v19 = vpop.f32.mrb[14].mxu1 }
 0xa9b   :  { %v2911_v21 = vadd.f32 %v2910_v19, %v2784_v47  ;;  %v5147_v31 = vpop.f32.mrb[15].mxu1  ;;  %v2914_v45 = vmax.f32 %v2908_v58, 0.0 }
 0xa9d   :  { %v2915_v36 = vmax.f32 %v2911_v21, 0.0 }
 0xa9f   :  { %v2916_v12 = vpack.c.bf16 %v2915_v36, %v2914_v45 }
 0xaa1   :  { %5165 = vmatmul.mubr.bf16.vlgmr.msra.gmra.mrb[32].mxu0 %v2916_v12 }
 0xaa2   :  { %5169 = vmatpush3.bf16.msra.mxu0 %v5418_v6 }
 0xaa3   :  { %5170 = vmatprep.subr.bf16.mxu0 %v6823_v34 }
 0xaa6   :  { %5171 = vmatpush3.bf16.msra.mxu0 %v6823_v34 }
 0xaa7   :  { %5172 = vmatprep.subr.bf16.mxu0 %v6827_v25 }
 0xaaa   :  { %5173 = vmatpush3.bf16.msra.mxu0 %v6827_v25 }
 0xaab   :  { %5174 = vmatprep.subr.bf16.mxu0 %v6831_v24 }
 0xaae   :  { %5175 = vmatpush3.bf16.msra.mxu0 %v6831_v24 }
 0xaaf   :  { %5192 = vmatprep.subr.bf16.mxu0 %v8400_v13 }
 0xb74   :  { %v2999_v50 = vpop.f32.mrb[32].mxu0 }
 0xb75   :  { %v3000_v23 = vadd.f32 %v2999_v50, %v6968_v20  ;;  %v5166_v28 = vpop.f32.mrb[33].mxu0 }
 0xb76   :  { %v3002_v61 = vpop.f32.mrb[34].mxu0 }
 0xb77   :  { %v3003_v29 = vadd.f32 %v3002_v61, %v6968_v20  ;;  %v5167_v9 = vpop.f32.mrb[35].mxu0  ;;  %v3008_v26 = vrot.slane %v3000_v23, 1  ;;  %v3009_v34 = vrot.slane %v3000_v23, 2  ;;  %v3010_v62 = vrot.slane %v3000_v23, 3 }
 0xb78   :  { %v3011_v7 = vrot.slane %v3000_v23, 4  ;;  %v3012_v32 = vrot.slane %v3000_v23, 5  ;;  %v3013_v25 = vrot.slane %v3000_v23, 6  ;;  %v3014_v18 = vrot.slane %v3000_v23, 7 }
 0xb79   :  { %v7241_v37 = vadd.f32 %v3008_v26, %v7126_v4  ;;  %v7244_v24 = vadd.f32 %v3009_v34, %v7129_v42  ;;  %v7247_v38 = vadd.f32 %v3010_v62, %v7132_v48  ;;  %v3038_v53 = vadd.f32 %v3000_v23, %v7123_v30 }
 0xb7a   :  { %v7250_v40 = vadd.f32 %v3011_v7, %v7135_v10  ;;  %v7253_v20 = vadd.f32 %v3012_v32, %v7138_v46  ;;  %v7256_v49 = vadd.f32 %v3013_v25, %v7141_v11  ;;  %v3015_v42 = vrot.slane %v3003_v29, 1 }
 0xb7b   :  { %v3070_v4 = vrot.slane %v7241_v37, 7  ;;  %v3072_v1 = vrot.slane %v7244_v24, 6  ;;  %v3045_v44 = vadd.f32 %v3014_v18, %v7152_v39  ;;  %v3074_v48 = vrot.slane %v7247_v38, 5 }
 0xb7c   :  { %v3076_v10 = vrot.slane %v7250_v40, 4  ;;  %v3078_v0 = vrot.slane %v7253_v20, 3  ;;  %v3016_v55 = vrot.slane %v3003_v29, 2  ;;  %v3017_v11 = vrot.slane %v3003_v29, 3 }
 0xb7d   :  { %v3071_v46 = vsel %vm1060_vm2, %v3070_v4, %v3038_v53  ;;  %v3018_v43 = vrot.slane %v3003_v29, 4  ;;  %v3080_v22 = vrot.slane %v7256_v49, 2  ;;  %v3019_v60 = vrot.slane %v3003_v29, 5 }
 0xb7e   :  { %v3073_v30 = vsel %vm1062_vm3, %v3072_v1, %v3071_v46  ;;  %v3020_v54 = vrot.slane %v3003_v29, 6  ;;  %v3021_v39 = vrot.slane %v3003_v29, 7  ;;  %v7270_v47 = vadd.f32 %v3015_v42, %v7155_v27 }
 0xb7f   :  { %v3075_v6 = vsel %vm1064_vm4, %v3074_v48, %v3073_v30  ;;  %v7273_v41 = vadd.f32 %v3016_v55, %v7158_v5  ;;  %v3082_v63 = vrot.slane %v3045_v44, 1  ;;  %v7277_v19 = vadd.f32 %v3017_v11, %v7161_v16 }
 0xb80   :  { %v3077_v58 = vsel %vm1066_vm5, %v3076_v10, %v3075_v6  ;;  %v7280_v21 = vadd.f32 %v3018_v43, %v7169_v51  ;;  %v7284_v45 = vadd.f32 %v3003_v29, %v7166_v35  ;;  %v7287_v27 = vadd.f32 %v3019_v60, %v7172_v52 }
 0xb81   :  { %v3079_v31 = vsel %vm1068_vm6, %v3078_v0, %v3077_v58  ;;  %v3084_v5 = vrot.slane %v7270_v47, 7  ;;  %v7292_v12 = vadd.f32 %v3020_v54, %v7177_v33  ;;  %v3086_v16 = vrot.slane %v7273_v41, 6 }
 0xb82   :  { %v3081_v36 = vsel %vm1070_vm7, %v3080_v22, %v3079_v31  ;;  %v7297_v50 = vadd.f32 %v3021_v39, %v7180_v57  ;;  %v3088_v52 = vrot.slane %v7277_v19, 5  ;;  %v3090_v61 = vrot.slane %v7280_v21, 4 }
 0xb83   :  { %v3083_v51 = vsel %vm1072_vm8, %v3082_v63, %v3081_v36  ;;  %v3085_v35 = vsel %vm1060_vm2, %v3084_v5, %v7284_v45  ;;  %v3092_v29 = vrot.slane %v7287_v27, 3  ;;  %v3094_v57 = vrot.slane %v7292_v12, 2 }
 0xb84   :  { %v3100_v23 = vsel %vm420_vm0, %v3083_v51, 0.0  ;;  %v3087_v28 = vsel %vm1062_vm3, %v3086_v16, %v3085_v35  ;;  %v3096_v34 = vrot.slane %v7297_v50, 1 }
 0xb85   :  { %3101 = vadd.xlane.f32.xlu0 %v3100_v23  ;;  %v3089_v33 = vsel %vm1064_vm4, %v3088_v52, %v3087_v28 }
 0xb86   :  { %v3091_v9 = vsel %vm1066_vm5, %v3090_v61, %v3089_v33 }
 0xb87   :  { %v3093_v26 = vsel %vm1068_vm6, %v3092_v29, %v3091_v9 }
 0xb88   :  { %v3095_v62 = vsel %vm1070_vm7, %v3094_v57, %v3093_v26 }
 0xb89   :  { %v3097_v7 = vsel %vm1072_vm8, %v3096_v34, %v3095_v62 }
 0xb8a   :  { %v3103_v32 = vsel %vm420_vm0, %v3097_v7, 0.0 }
 0xb8b   :  { %3104 = vadd.xlane.f32.xlu0 %v3103_v32 }
 0xc12   :  { %v3102_v25 = vpop.xlane.xlu0 %3101 }
 0xc13   :  { %v3106_v18 = vmul.f32 0.015625, %v3102_v25 }
 0xc15   :  { %v3110_v4 = vrot.slane %v3106_v18, 1  ;;  %v3111_v1 = vrot.slane %v3106_v18, 2  ;;  %v3112_v42 = vrot.slane %v3106_v18, 3  ;;  %v3113_v48 = vrot.slane %v3106_v18, 4 }
 0xc16   :  { %v3114_v10 = vrot.slane %v3106_v18, 5  ;;  %v3115_v0 = vrot.slane %v3106_v18, 6  ;;  %v3116_v46 = vrot.slane %v3106_v18, 7  ;;  %v7314_v55 = vsub.f32 %v3038_v53, %v3106_v18 }
 0xc17   :  { %v7317_v11 = vsub.f32 %v7241_v37, %v3110_v4  ;;  %v7320_v43 = vsub.f32 %v7244_v24, %v3111_v1  ;;  %v7323_v30 = vsub.f32 %v7247_v38, %v3112_v42  ;;  %v7326_v22 = vsub.f32 %v7250_v40, %v3113_v48 }
 0xc18   :  { %v3105_v60 = vpop.xlane.xlu0 %3104  ;;  %v7329_v54 = vsub.f32 %v7253_v20, %v3114_v10  ;;  %v7332_v6 = vsub.f32 %v7256_v49, %v3115_v0  ;;  %v7334_v53 = vsub.f32 %v3045_v44, %v3116_v46  ;;  %v3156_v39 = vmul.f32 %v7314_v55, %v7314_v55 }
 0xc19   :  { %v3107_v37 = vmul.f32 0.015625, %v3105_v60  ;;  %v3157_v24 = vmul.f32 %v7317_v11, %v7317_v11  ;;  %v3158_v38 = vmul.f32 %v7320_v43, %v7320_v43  ;;  %v3159_v40 = vmul.f32 %v7323_v30, %v7323_v30 }
 0xc1a   :  { %v3160_v20 = vmul.f32 %v7326_v22, %v7326_v22  ;;  %v3161_v49 = vmul.f32 %v7329_v54, %v7329_v54  ;;  %v3162_v44 = vmul.f32 %v7332_v6, %v7332_v6  ;;  %v3163_v58 = vmul.f32 %v7334_v53, %v7334_v53 }
 0xc1b   :  { %v3188_v63 = vrot.slane %v3157_v24, 7  ;;  %v3190_v31 = vrot.slane %v3158_v38, 6  ;;  %v3117_v5 = vrot.slane %v3107_v37, 1  ;;  %v3192_v36 = vrot.slane %v3159_v40, 5 }
 0xc1c   :  { %v3194_v16 = vrot.slane %v3160_v20, 4  ;;  %v3196_v51 = vrot.slane %v3161_v49, 3  ;;  %v3198_v35 = vrot.slane %v3162_v44, 2  ;;  %v3118_v23 = vrot.slane %v3107_v37, 2 }
 0xc1d   :  { %v3189_v52 = vsel %vm1060_vm2, %v3188_v63, %v3156_v39  ;;  %v3119_v28 = vrot.slane %v3107_v37, 3  ;;  %v3120_v61 = vrot.slane %v3107_v37, 4  ;;  %v3121_v29 = vrot.slane %v3107_v37, 5 }
 0xc1e   :  { %v3191_v33 = vsel %vm1062_vm3, %v3190_v31, %v3189_v52  ;;  %v3122_v9 = vrot.slane %v3107_v37, 6  ;;  %v3123_v57 = vrot.slane %v3107_v37, 7  ;;  %v7356_v34 = vsub.f32 %v7284_v45, %v3107_v37  ;;  %v7414_v52 = vld [vmem:[%s8203_s3 + $0x64] ss:$12 sps:$4 sm:$0xff]  }
 0xc1f   :  { %v3193_v26 = vsel %vm1064_vm4, %v3192_v36, %v3191_v33  ;;  %v7359_v62 = vsub.f32 %v7270_v47, %v3117_v5  ;;  %v7362_v7 = vsub.f32 %v7273_v41, %v3118_v23  ;;  %v7366_v25 = vsub.f32 %v7277_v19, %v3119_v28  ;;  %v7419_v23 = vld [vmem:[%s8203_s3 + $0x7c] ss:$12 sps:$4 sm:$0xff]   ;;  %3474 = vmatprep.subr.bf16.mxu1 %v7414_v52  ;;  %v5289_v28 = vld [vmem:[%s8203_s3 + $0x78] ss:$12 sps:$4 sm:$0xff]  }
 0xc20   :  { %v3195_v32 = vsel %vm1066_vm5, %v3194_v16, %v3193_v26  ;;  %v7369_v18 = vsub.f32 %v7280_v21, %v3120_v61  ;;  %v7372_v4 = vsub.f32 %v7287_v27, %v3121_v29  ;;  %v3200_v1 = vrot.slane %v3163_v58, 1  ;;  %v7431_v61 = vld [vmem:[%s8203_s3 + $0x94] ss:$12 sps:$4 sm:$0xff]   ;;  %v5292_v33 = vld [vmem:[%s8203_s3 + $0x90] ss:$12 sps:$4 sm:$0xff]  }
 0xc21   :  { %v3197_v45 = vsel %vm1068_vm6, %v3196_v51, %v3195_v32  ;;  %v7376_v47 = vsub.f32 %v7292_v12, %v3122_v9  ;;  %v7379_v41 = vsub.f32 %v7297_v50, %v3123_v57  ;;  %v3165_v19 = vmul.f32 %v7359_v62, %v7359_v62  ;;  %v7440_v29 = vld [vmem:[%s8203_s3 + $0xac] ss:$12 sps:$4 sm:$0xff]  }
 0xc22   :  { %v3199_v42 = vsel %vm1070_vm7, %v3198_v35, %v3197_v45  ;;  %v3166_v21 = vmul.f32 %v7362_v7, %v7362_v7  ;;  %v3167_v27 = vmul.f32 %v7366_v25, %v7366_v25  ;;  %v3164_v12 = vmul.f32 %v7356_v34, %v7356_v34  ;;  %v5286_v35 = vld [vmem:[%s8203_s3 + $0x60] ss:$12 sps:$4 sm:$0xff]  }
 0xc23   :  { %v3201_v48 = vsel %vm1072_vm8, %v3200_v1, %v3199_v42  ;;  %v3168_v50 = vmul.f32 %v7369_v18, %v7369_v18  ;;  %v3169_v0 = vmul.f32 %v7372_v4, %v7372_v4  ;;  %v3202_v46 = vrot.slane %v3165_v19, 7  ;;  %3475 = vmatpush1.bf16.msra.mxu1 %v5286_v35  ;;  %v5419_v19 = vld [vmem:[#allocation7] sm:$0xff] }
 0xc24   :  { %v3218_v10 = vsel %vm420_vm0, %v3201_v48, 0.0  ;;  %v3204_v60 = vrot.slane %v3166_v21, 6  ;;  %v3170_v37 = vmul.f32 %v7376_v47, %v7376_v47  ;;  %v3171_v24 = vmul.f32 %v7379_v41, %v7379_v41  ;;  %3476 = vmatprep.subr.bf16.mxu1 %v7419_v23 }
 0xc25   :  { %3219 = vadd.xlane.f32.xlu0 %v3218_v10  ;;  %v3203_v38 = vsel %vm1060_vm2, %v3202_v46, %v3164_v12  ;;  %v3206_v40 = vrot.slane %v3167_v27, 5  ;;  %v3208_v20 = vrot.slane %v3168_v50, 4  ;;  %v3210_v44 = vrot.slane %v3169_v0, 3 }
 0xc26   :  { %v3205_v39 = vsel %vm1062_vm3, %v3204_v60, %v3203_v38  ;;  %v3212_v63 = vrot.slane %v3170_v37, 2  ;;  %v3214_v5 = vrot.slane %v3171_v24, 1  ;;  %v7448_v21 = vrot.slane %v5419_v19, %v5672_v17 }
 0xc27   :  { %v3207_v49 = vsel %vm1064_vm4, %v3206_v40, %v3205_v39  ;;  %3477 = vmatpush1.bf16.msra.mxu1 %v5289_v28 }
 0xc28   :  { %v3209_v58 = vsel %vm1066_vm5, %v3208_v20, %v3207_v49  ;;  %3478 = vmatprep.subr.bf16.mxu1 %v7431_v61 }
 0xc29   :  { %v3211_v31 = vsel %vm1068_vm6, %v3210_v44, %v3209_v58 }
 0xc2a   :  { %v3213_v36 = vsel %vm1070_vm7, %v3212_v63, %v3211_v31 }
 0xc2b   :  { %v3215_v16 = vsel %vm1072_vm8, %v3214_v5, %v3213_v36  ;;  %3479 = vmatpush1.bf16.msra.mxu1 %v5292_v33 }
 0xc2c   :  { %v3221_v51 = vsel %vm420_vm0, %v3215_v16, 0.0  ;;  %3480 = vmatprep.subr.bf16.mxu1 %v7440_v29 }
 0xc2d   :  { %3222 = vadd.xlane.f32.xlu0 %v3221_v51 }
 0xc43   :  { %3279 = vrot.lane.b32.xlu0 %v7112_v59, %s5530_s5  ;;  %v5295_v59 = vld [vmem:[%s8203_s3 + $0xa8] ss:$12 sps:$4 sm:$0xff]  }
 0xc44   :  { %3481 = vmatpush1.bf16.msra.mxu1 %v5295_v59 }
 0xc45   :  { %5180 = vmatprep.subr.bf16.mxu1 %v8400_v13 }
 0xcb2   :  { %v3220_v9 = vpop.xlane.xlu0 %3219 }
 0xcb3   :  { %v3224_v57 = vmul.f32 0.015625, %v3220_v9 }
 0xcb5   :  { %v3226_v26 = vadd.f32 1e-05, %v3224_v57 }
 0xcb7   :  { %5394 = vrsqrt.f32 %v3226_v26 }
 0xcba   :  { %v3223_v32 = vpop.xlane.xlu0 %3222 }
 0xcbb   :  { %v3225_v45 = vmul.f32 0.015625, %v3223_v32 }
 0xcbd   :  { %v3227_v1 = vadd.f32 1e-05, %v3225_v45 }
 0xcbe   :  { %v3280_v27 = vpop.permute.xlu0 %3279 }
 0xcbf   :  { %5396 = vrsqrt.f32 %v3227_v1 }
 0xcc1   :  { %v5395_v42 = vpop.eup %5394 }
 0xcc2   :  { %v3232_v48 = vrot.slane %v5395_v42, 1  ;;  %v3233_v12 = vrot.slane %v5395_v42, 2  ;;  %v3234_v50 = vrot.slane %v5395_v42, 3  ;;  %v3235_v10 = vrot.slane %v5395_v42, 4 }
 0xcc3   :  { %v3236_v0 = vrot.slane %v5395_v42, 5  ;;  %v3237_v46 = vrot.slane %v5395_v42, 6  ;;  %v3238_v60 = vrot.slane %v5395_v42, 7  ;;  %v3262_v37 = vmul.f32 %v5395_v42, %v7314_v55 }
 0xcc4   :  { %v3263_v24 = vmul.f32 %v3232_v48, %v7317_v11  ;;  %v3264_v38 = vmul.f32 %v3233_v12, %v7320_v43  ;;  %v3265_v40 = vmul.f32 %v3234_v50, %v7323_v30  ;;  %v3266_v39 = vmul.f32 %v3235_v10, %v7326_v22 }
 0xcc5   :  { %v3267_v20 = vmul.f32 %v3236_v0, %v7329_v54  ;;  %v3268_v49 = vmul.f32 %v3237_v46, %v7332_v6  ;;  %v3269_v44 = vmul.f32 %v3238_v60, %v7334_v53  ;;  %v3282_v58 = vmul.f32 %v3280_v27, %v3262_v37 }
 0xcc6   :  { %v3283_v63 = vmul.f32 %v3280_v27, %v3263_v24  ;;  %v3284_v31 = vmul.f32 %v3280_v27, %v3264_v38  ;;  %v3285_v5 = vmul.f32 %v3280_v27, %v3265_v40  ;;  %v3286_v36 = vmul.f32 %v3280_v27, %v3266_v39 }
 0xcc7   :  { %v3287_v55 = vmul.f32 %v3280_v27, %v3267_v20  ;;  %v3288_v16 = vmul.f32 %v3280_v27, %v3268_v49  ;;  %v3289_v11 = vmul.f32 %v3280_v27, %v3269_v44  ;;  %v7459_v43 = vadd.f32 %v7448_v21, %v3282_v58 }
 0xcc8   :  { %v7462_v30 = vadd.f32 %v7448_v21, %v3283_v63  ;;  %v7465_v22 = vadd.f32 %v7448_v21, %v3284_v31  ;;  %v7468_v6 = vadd.f32 %v7448_v21, %v3285_v5  ;;  %v7471_v53 = vadd.f32 %v7448_v21, %v3286_v36 }
 0xcc9   :  { %v5397_v54 = vpop.eup %5396  ;;  %v7474_v51 = vadd.f32 %v7448_v21, %v3287_v55  ;;  %v7477_v35 = vadd.f32 %v7448_v21, %v3288_v16  ;;  %v3354_v63 = vpack.c.bf16 %v7459_v43, %v7459_v43 }
 0xcca   :  { %v3239_v28 = vrot.slane %v5397_v54, 1  ;;  %v3240_v33 = vrot.slane %v5397_v54, 2  ;;  %v3241_v59 = vrot.slane %v5397_v54, 3  ;;  %v3242_v9 = vrot.slane %v5397_v54, 4 }
 0xccb   :  { %v3243_v57 = vrot.slane %v5397_v54, 5  ;;  %v3244_v26 = vrot.slane %v5397_v54, 6  ;;  %v3245_v32 = vrot.slane %v5397_v54, 7  ;;  %v3270_v45 = vmul.f32 %v5397_v54, %v7356_v34 }
 0xccc   :  { %v3271_v1 = vmul.f32 %v3239_v28, %v7359_v62  ;;  %v3272_v42 = vmul.f32 %v3240_v33, %v7362_v7  ;;  %v3273_v19 = vmul.f32 %v3241_v59, %v7366_v25  ;;  %v3274_v48 = vmul.f32 %v3242_v9, %v7369_v18 }
 0xccd   :  { %v3275_v12 = vmul.f32 %v3243_v57, %v7372_v4  ;;  %v3276_v50 = vmul.f32 %v3244_v26, %v7376_v47  ;;  %v3277_v10 = vmul.f32 %v3245_v32, %v7379_v41  ;;  %v3290_v0 = vmul.f32 %v3280_v27, %v3270_v45 }
 0xcce   :  { %v3291_v46 = vmul.f32 %v3280_v27, %v3271_v1  ;;  %v3292_v60 = vmul.f32 %v3280_v27, %v3272_v42  ;;  %v3293_v37 = vmul.f32 %v3280_v27, %v3273_v19  ;;  %v3294_v24 = vmul.f32 %v3280_v27, %v3274_v48 }
 0xccf   :  { %v3295_v34 = vmul.f32 %v3280_v27, %v3275_v12  ;;  %v3296_v38 = vmul.f32 %v3280_v27, %v3276_v50  ;;  %v3297_v62 = vmul.f32 %v3280_v27, %v3277_v10  ;;  %v7488_v7 = vadd.f32 %v7448_v21, %v3289_v11 }
 0xcd0   :  { %v7491_v25 = vadd.f32 %v7448_v21, %v3291_v46  ;;  %v7494_v18 = vadd.f32 %v7448_v21, %v3292_v60  ;;  %v7497_v4 = vadd.f32 %v7448_v21, %v3293_v37  ;;  %v3355_v47 = vpack.c.bf16 %v7462_v30, %v7462_v30 }
 0xcd1   :  { %v7502_v41 = vadd.f32 %v7448_v21, %v3290_v0  ;;  %v7505_v27 = vadd.f32 %v7448_v21, %v3294_v24  ;;  %v7508_v40 = vadd.f32 %v7448_v21, %v3295_v34  ;;  %v3356_v39 = vpack.c.bf16 %v7465_v22, %v7465_v22 }
 0xcd2   :  { %v7513_v20 = vadd.f32 %v7448_v21, %v3296_v38  ;;  %v7516_v49 = vadd.f32 %v7448_v21, %v3297_v62  ;;  %v3357_v44 = vpack.c.bf16 %v7468_v6, %v7468_v6  ;;  %v3363_v58 = vpack.c.bf16 %v7491_v25, %v7491_v25 }
 0xcd3   :  { %v3358_v31 = vpack.c.bf16 %v7471_v53, %v7471_v53  ;;  %v3359_v5 = vpack.c.bf16 %v7474_v51, %v7474_v51  ;;  %v3364_v36 = vpack.c.bf16 %v7494_v18, %v7494_v18  ;;  %v3360_v21 = vpack.c.bf16 %v7477_v35, %v7477_v35 }
 0xcd4   :  { %v3361_v55 = vpack.c.bf16 %v7488_v7, %v7488_v7  ;;  %v3365_v16 = vpack.c.bf16 %v7497_v4, %v7497_v4  ;;  %v3387_v11 = vunpack.c.l.b16 %v3355_v47  ;;  %v3362_v54 = vpack.c.bf16 %v7502_v41, %v7502_v41 }
 0xcd5   :  { %v3366_v28 = vpack.c.bf16 %v7505_v27, %v7505_v27  ;;  %v3367_v33 = vpack.c.bf16 %v7508_v40, %v7508_v40  ;;  %v3388_v59 = vunpack.c.l.b16 %v3356_v39  ;;  %v3368_v9 = vpack.c.bf16 %v7513_v20, %v7513_v20 }
 0xcd6   :  { %v3369_v57 = vpack.c.bf16 %v7516_v49, %v7516_v49  ;;  %v3389_v26 = vunpack.c.l.b16 %v3357_v44  ;;  %v3395_v32 = vunpack.c.l.b16 %v3363_v58  ;;  %v3386_v45 = vunpack.c.l.b16 %v3354_v63 }
 0xcd7   :  { %v3390_v1 = vunpack.c.l.b16 %v3358_v31  ;;  %v3391_v42 = vunpack.c.l.b16 %v3359_v5  ;;  %v3396_v19 = vunpack.c.l.b16 %v3364_v36  ;;  %v3392_v48 = vunpack.c.l.b16 %v3360_v21 }
 0xcd8   :  { %v3397_v12 = vunpack.c.l.b16 %v3365_v16  ;;  %v3402_v50 = vrot.slane %v3387_v11, 7  ;;  %v3404_v10 = vrot.slane %v3388_v59, 6  ;;  %v3393_v0 = vunpack.c.l.b16 %v3361_v55 }
 0xcd9   :  { %v3394_v46 = vunpack.c.l.b16 %v3362_v54  ;;  %v3398_v60 = vunpack.c.l.b16 %v3366_v28  ;;  %v3399_v37 = vunpack.c.l.b16 %v3367_v33  ;;  %v3406_v34 = vrot.slane %v3389_v26, 5 }
 0xcda   :  { %v3403_v24 = vsel %vm1060_vm2, %v3402_v50, %v3386_v45  ;;  %v3416_v38 = vrot.slane %v3395_v32, 7  ;;  %v3418_v62 = vrot.slane %v3396_v19, 6  ;;  %v3400_v47 = vunpack.c.l.b16 %v3368_v9 }
 0xcdb   :  { %v3401_v39 = vunpack.c.l.b16 %v3369_v57  ;;  %v3405_v44 = vsel %vm1062_vm3, %v3404_v10, %v3403_v24  ;;  %v3408_v58 = vrot.slane %v3390_v1, 4  ;;  %v3410_v31 = vrot.slane %v3391_v42, 3 }
 0xcdc   :  { %v3407_v63 = vsel %vm1064_vm4, %v3406_v34, %v3405_v44  ;;  %v3417_v5 = vsel %vm1060_vm2, %v3416_v38, %v3394_v46  ;;  %v3420_v36 = vrot.slane %v3397_v12, 5  ;;  %v3412_v55 = vrot.slane %v3392_v48, 2  ;;  %v7563_v12 = vld [vmem:[#allocation7 + $0x8] sm:$0xff] }
 0xcdd   :  { %v3409_v21 = vsel %vm1066_vm5, %v3408_v58, %v3407_v63  ;;  %v3419_v16 = vsel %vm1062_vm3, %v3418_v62, %v3417_v5  ;;  %v3422_v11 = vrot.slane %v3398_v60, 4  ;;  %v3424_v33 = vrot.slane %v3399_v37, 3 }
 0xcde   :  { %v3411_v54 = vsel %vm1068_vm6, %v3410_v31, %v3409_v21  ;;  %v3421_v28 = vsel %vm1064_vm4, %v3420_v36, %v3419_v16  ;;  %v3426_v57 = vrot.slane %v3400_v47, 2  ;;  %v3414_v26 = vrot.slane %v3393_v0, 1 }
 0xcdf   :  { %v3413_v59 = vsel %vm1070_vm7, %v3412_v55, %v3411_v54  ;;  %v3423_v9 = vsel %vm1066_vm5, %v3422_v11, %v3421_v28  ;;  %v3428_v45 = vrot.slane %v3401_v39, 1  ;;  %v7567_v50 = vrot.slane %v7563_v12, %v5648_v2  ;;  %v5420_v55 = vld [vmem:[#allocation4 + $0x28] sm:$0xff]  ;;  %v5421_v28 = vld [vmem:[#allocation4 + $0x18] sm:$0xff] }
 0xce0   :  { %v3425_v32 = vsel %vm1068_vm6, %v3424_v33, %v3423_v9  ;;  %v3415_v42 = vsel %vm1072_vm8, %v3414_v26, %v3413_v59  ;;  %v3520_v10 = vrot.slane %v7563_v12, %v5651_v3  ;;  %v5422_v9 = vld [vmem:[#allocation4 + $0x30] sm:$0xff]  ;;  %v5423_v26 = vld [vmem:[#allocation4 + $0x20] sm:$0xff] }
 0xce1   :  { %v3427_v1 = vsel %vm1070_vm7, %v3426_v57, %v3425_v32  ;;  %3660 = vrot.lane.b32.xlu0 %v7567_v50, %s5530_s5 }
 0xce2   :  { %v3429_v19 = vsel %vm1072_vm8, %v3428_v45, %v3427_v1 }
 0xce3   :  { %v3430_v48 = vpack.c.b16 %v3429_v19, %v3415_v42 }
 0xce5   :  { %4979 = vmatmul.mubr.msk.bf16.vlgmr.msra.gmra.mrb[16].mxu1 %vm420_vm0, %v3430_v48 }
 0xce6   :  { %5188 = vmatprep.mubr.msk.bf16.mxu1 %vm5534_vm11, %v8400_v13 }
 0xdb8   :  { %v3508_v0 = vpop.f32.mrb[16].mxu1 }
 0xdb9   :  { %v3521_v46 = vadd.f32 %v3520_v10, %v3508_v0  ;;  %v7573_v60 = vpop.f32.mrb[17].mxu1 }
 0xdba   :  { %v3512_v37 = vpop.f32.mrb[18].mxu1 }
 0xdbb   :  { %3531 = vrot.lane.b32.xlu1 %v3521_v46, %s5530_s5  ;;  %v7576_v24 = vpop.f32.mrb[19].mxu1  ;;  %v3522_v34 = vadd.f32 %v3520_v10, %v3512_v37 }
 0xdbf   :  { %3533 = vrot.lane.b32.xlu1 %v3522_v34, %s5530_s5 }
 0xdc3   :  { %3647 = vrot.lane.b32.xlu1 %v7414_v52, %s5530_s5 }
 0xdc7   :  { %3649 = vrot.lane.b32.xlu1 %v7419_v23, %s5530_s5 }
 0xdcb   :  { %3651 = vrot.lane.b32.xlu1 %v7431_v61, %s5530_s5 }
 0xdcf   :  { %3653 = vrot.lane.b32.xlu1 %v7440_v29, %s5530_s5 }
 0xe2d   :  { %v3532_v2 = vpop.permute.xlu1 %3531 }
 0xe2e   :  { %v3537_v38 = vmul.f32 %v3532_v2, %v3521_v46  ;;  %v3539_v62 = vmul.f32 %v3532_v2, %v3522_v34 }
 0xe31   :  { %v3534_v3 = vpop.permute.xlu1 %3533 }
 0xe32   :  { %v3538_v47 = vmul.f32 %v3534_v3, %v3521_v46  ;;  %v3540_v39 = vmul.f32 %v3534_v3, %v3522_v34 }
 0xe34   :  { %v3541_v44 = vpack.c.bf16 %v3538_v47, %v3537_v38  ;;  %v3542_v58 = vpack.c.bf16 %v3540_v39, %v3539_v62 }
 0xe35   :  { %v3648_v52 = vpop.permute.xlu1 %3647 }
 0xe36   :  { %5176 = vmatprep.mubr.msk.bf16.mxu0 %vm420_vm0, %v3541_v44  ;;  %5181 = vmatpush3.bf16.msra.mxu1 %v3648_v52 }
 0xe37   :  { %5177 = vmatmul.mubr.msk.bf16.vlgmr.msra.gmra.mrb[36].mxu0 %vm420_vm0, %v3542_v58  ;;  %5182 = vmatprep.subr.bf16.mxu1 %v8400_v13 }
 0xe38   :  { %5200 = vmatprep.mubr.msk.bf16.mxu0 %vm5534_vm11, %v8400_v13 }
 0xe39   :  { %v3650_v23 = vpop.permute.xlu1 %3649 }
 0xe3a   :  { %5183 = vmatpush3.bf16.msra.mxu1 %v3650_v23 }
 0xe3b   :  { %5184 = vmatprep.subr.bf16.mxu1 %v8400_v13 }
 0xe3d   :  { %v3652_v61 = vpop.permute.xlu1 %3651 }
 0xe3e   :  { %5185 = vmatpush3.bf16.msra.mxu1 %v3652_v61 }
 0xe3f   :  { %5186 = vmatprep.subr.bf16.mxu1 %v8400_v13 }
 0xe41   :  { %v3654_v29 = vpop.permute.xlu1 %3653 }
 0xe42   :  { %5187 = vmatpush3.bf16.msra.mxu1 %v3654_v29 }
 0xe43   :  { %5204 = vmatprep.subr.bf16.mxu1 %v8400_v13 }
 0xf0a   :  { %v5178_v63 = vpop.f32.mrb[36].mxu0 }
 0xf0b   :  { %v3600_v31 = vmul.f32 0.25, %v5178_v63  ;;  %v3583_v5 = vpop.f32.mrb[37].mxu0 }
 0xf0c   :  { %v3598_v36 = vmul.f32 0.25, %v3583_v5  ;;  %v5179_v21 = vpop.f32.mrb[38].mxu0 }
 0xf0d   :  { %v3604_v16 = vadd.f32 %v5420_v55, %v3600_v31  ;;  %v3601_v11 = vmul.f32 0.25, %v5179_v21  ;;  %v3586_v54 = vpop.f32.mrb[39].mxu0  ;;  %v3528_v21 = vadd.f32 %v7567_v50, %v7576_v24  ;;  %v3661_v24 = vpop.permute.xlu0 %3660 }
 0xf0e   :  { %v3602_v33 = vadd.f32 %v5421_v28, %v3598_v36  ;;  %v3599_v59 = vmul.f32 0.25, %v3586_v54  ;;  %v3527_v36 = vadd.f32 %v7567_v50, %v7573_v60 }
 0xf0f   :  { %v3605_v57 = vadd.f32 %v5422_v9, %v3601_v11  ;;  %v3609_v45 = vsel %vm420_vm0, %v3604_v16, -inf }
 0xf10   :  { %v3603_v32 = vadd.f32 %v5423_v26, %v3599_v59  ;;  %v3606_v42 = vsel %vm420_vm0, %v3602_v33, -inf }
 0xf11   :  { %v3610_v1 = vsel %vm420_vm0, %v3605_v57, -inf }
 0xf12   :  { %v3611_v19 = vmax.f32 %v3609_v45, %v3610_v1  ;;  %v3607_v48 = vsel %vm420_vm0, %v3603_v32, -inf }
 0xf13   :  { %v3608_v10 = vmax.f32 %v3606_v42, %v3607_v48 }
 0xf14   :  { %v3614_v0 = vsub.f32 %v3604_v16, %v3611_v19  ;;  %v3615_v46 = vsub.f32 %v3605_v57, %v3611_v19 }
 0xf15   :  { %v3612_v37 = vsub.f32 %v3602_v33, %v3608_v10  ;;  %v3613_v34 = vsub.f32 %v3603_v32, %v3608_v10 }
 0xf16   :  { %v3620_v2 = vmul.f32 1.442695, %v3614_v0  ;;  %v3622_v3 = vmul.f32 1.442695, %v3615_v46 }
 0xf17   :  { %v3616_v38 = vmul.f32 1.442695, %v3612_v37  ;;  %v3618_v62 = vmul.f32 1.442695, %v3613_v34 }
 0xf18   :  { %5398 = vpow2.f32 %v3620_v2 }
 0xf19   :  { %5400 = vpow2.f32 %v3622_v3 }
 0xf1a   :  { %5402 = vpow2.f32 %v3616_v38 }
 0xf1b   :  { %5404 = vpow2.f32 %v3618_v62 }
 0xf22   :  { %v5399_v47 = vpop.eup %5398 }
 0xf23   :  { %v5401_v39 = vpop.eup %5400  ;;  %v3627_v44 = vsel %vm420_vm0, %v5399_v47, 0.0 }
 0xf24   :  { %v5403_v58 = vpop.eup %5402  ;;  %v3628_v52 = vsel %vm420_vm0, %v5401_v39, 0.0 }
 0xf25   :  { %v5405_v23 = vpop.eup %5404  ;;  %v3629_v61 = vadd.f32 %v3628_v52, %v3627_v44  ;;  %v3624_v29 = vsel %vm420_vm0, %v5403_v58, 0.0 }
 0xf26   :  { %v3625_v63 = vsel %vm420_vm0, %v5405_v23, 0.0 }
 0xf27   :  { %5406 = vrcp.f32 %v3629_v61  ;;  %v3626_v31 = vadd.f32 %v3625_v63, %v3624_v29 }
 0xf29   :  { %5408 = vrcp.f32 %v3626_v31 }
 0xf31   :  { %v5407_v5 = vpop.eup %5406 }
 0xf32   :  { %v3635_v55 = vmul.f32 %v5407_v5, %v5401_v39  ;;  %v3634_v16 = vmul.f32 %v5407_v5, %v5399_v47 }
 0xf33   :  { %v5409_v11 = vpop.eup %5408 }
 0xf34   :  { %v3633_v54 = vmul.f32 %v5409_v11, %v5405_v23  ;;  %v3632_v28 = vmul.f32 %v5409_v11, %v5403_v58  ;;  %v3638_v33 = vmul.f32 %v3634_v16, %v3527_v36  ;;  %v3639_v59 = vmul.f32 %v3635_v55, %v3528_v21 }
 0xf36   :  { %v3636_v9 = vmul.f32 %v3632_v28, %v3527_v36  ;;  %v3637_v57 = vmul.f32 %v3633_v54, %v3528_v21  ;;  %v3643_v26 = vsel %vm420_vm0, %v3638_v33, 0.0  ;;  %v3644_v32 = vsel %vm420_vm0, %v3639_v59, 0.0 }
 0xf37   :  { %v3645_v45 = vadd.f32 %v3644_v32, %v3643_v26 }
 0xf38   :  { %v3640_v1 = vsel %vm420_vm0, %v3636_v9, 0.0  ;;  %v3641_v60 = vsel %vm420_vm0, %v3637_v57, 0.0 }
 0xf39   :  { %v3642_v42 = vadd.f32 %v3641_v60, %v3640_v1 }
 0xf3b   :  { %v3646_v50 = vpack.c.bf16 %v3645_v45, %v3642_v42 }
 0xf3d   :  { %5189 = vmatmul.mubr.msk.bf16.vlgmr.msra.gmra.mrb[20].mxu1 %vm420_vm0, %v3646_v50 }
 0xf3e   :  { %5220 = vmatprep.mubr.msk.bf16.mxu1 %vm5534_vm11, %v8400_v13 }
0x1010   :  { %v3700_v19 = vpop.f32.mrb[20].mxu1 }
0x1011   :  { %v3701_v48 = vadd.f32 %v3700_v19, %v3661_v24  ;;  %v5190_v10 = vpop.f32.mrb[21].mxu1 }
0x1012   :  { %v3703_v0 = vpop.f32.mrb[22].mxu1 }
0x1013   :  { %v3704_v46 = vadd.f32 %v3703_v0, %v3661_v24  ;;  %v5191_v37 = vpop.f32.mrb[23].mxu1  ;;  %v3709_v34 = vrot.slane %v3701_v48, 1  ;;  %v3710_v2 = vrot.slane %v3701_v48, 2  ;;  %v3711_v3 = vrot.slane %v3701_v48, 3 }
0x1014   :  { %v3712_v38 = vrot.slane %v3701_v48, 4  ;;  %v3713_v62 = vrot.slane %v3701_v48, 5  ;;  %v3714_v47 = vrot.slane %v3701_v48, 6  ;;  %v3715_v39 = vrot.slane %v3701_v48, 7 }
0x1015   :  { %v7615_v44 = vadd.f32 %v3709_v34, %v7462_v30  ;;  %v7618_v58 = vadd.f32 %v3710_v2, %v7465_v22  ;;  %v7621_v52 = vadd.f32 %v3711_v3, %v7468_v6  ;;  %v3739_v63 = vadd.f32 %v3701_v48, %v7459_v43 }
0x1016   :  { %v7624_v23 = vadd.f32 %v3712_v38, %v7471_v53  ;;  %v7627_v61 = vadd.f32 %v3713_v62, %v7474_v51  ;;  %v7630_v29 = vadd.f32 %v3714_v47, %v7477_v35  ;;  %v3716_v22 = vrot.slane %v3704_v46, 1 }
0x1017   :  { %v3771_v30 = vrot.slane %v7615_v44, 7  ;;  %v3773_v31 = vrot.slane %v7618_v58, 6  ;;  %v3746_v5 = vadd.f32 %v3715_v39, %v7488_v7  ;;  %v3775_v6 = vrot.slane %v7621_v52, 5 }
0x1018   :  { %v3777_v53 = vrot.slane %v7624_v23, 4  ;;  %v3779_v36 = vrot.slane %v7627_v61, 3  ;;  %v3717_v21 = vrot.slane %v3704_v46, 2  ;;  %v3718_v35 = vrot.slane %v3704_v46, 3 }
0x1019   :  { %v3772_v51 = vsel %vm1060_vm2, %v3771_v30, %v3739_v63  ;;  %v3719_v55 = vrot.slane %v3704_v46, 4  ;;  %v3781_v16 = vrot.slane %v7630_v29, 2  ;;  %v3720_v11 = vrot.slane %v3704_v46, 5 }
0x101a   :  { %v3774_v43 = vsel %vm1062_vm3, %v3773_v31, %v3772_v51  ;;  %v3721_v54 = vrot.slane %v3704_v46, 6  ;;  %v3722_v7 = vrot.slane %v3704_v46, 7  ;;  %v7644_v33 = vadd.f32 %v3716_v22, %v7491_v25 }
0x101b   :  { %v3776_v28 = vsel %vm1064_vm4, %v3775_v6, %v3774_v43  ;;  %v7647_v59 = vadd.f32 %v3717_v21, %v7494_v18  ;;  %v3783_v57 = vrot.slane %v3746_v5, 1  ;;  %v7651_v26 = vadd.f32 %v3718_v35, %v7497_v4 }
0x101c   :  { %v3778_v9 = vsel %vm1066_vm5, %v3777_v53, %v3776_v28  ;;  %v7654_v32 = vadd.f32 %v3719_v55, %v7505_v27  ;;  %v7658_v1 = vadd.f32 %v3704_v46, %v7502_v41  ;;  %v7661_v25 = vadd.f32 %v3720_v11, %v7508_v40 }
0x101d   :  { %v3780_v45 = vsel %vm1068_vm6, %v3779_v36, %v3778_v9  ;;  %v3785_v18 = vrot.slane %v7644_v33, 7  ;;  %v7666_v42 = vadd.f32 %v3721_v54, %v7513_v20  ;;  %v3787_v4 = vrot.slane %v7647_v59, 6 }
0x101e   :  { %v3782_v60 = vsel %vm1070_vm7, %v3781_v16, %v3780_v45  ;;  %v7671_v50 = vadd.f32 %v3722_v7, %v7516_v49  ;;  %v3789_v40 = vrot.slane %v7651_v26, 5  ;;  %v3791_v48 = vrot.slane %v7654_v32, 4 }
0x101f   :  { %v3784_v27 = vsel %vm1072_vm8, %v3783_v57, %v3782_v60  ;;  %v3786_v41 = vsel %vm1060_vm2, %v3785_v18, %v7658_v1  ;;  %v3793_v10 = vrot.slane %v7661_v25, 3  ;;  %v3795_v49 = vrot.slane %v7666_v42, 2 }
0x1020   :  { %v3801_v24 = vsel %vm420_vm0, %v3784_v27, 0.0  ;;  %v3788_v19 = vsel %vm1062_vm3, %v3787_v4, %v3786_v41  ;;  %v3797_v37 = vrot.slane %v7671_v50, 1 }
0x1021   :  { %3802 = vadd.xlane.f32.xlu1 %v3801_v24  ;;  %v3790_v20 = vsel %vm1064_vm4, %v3789_v40, %v3788_v19 }
0x1022   :  { %v3792_v0 = vsel %vm1066_vm5, %v3791_v48, %v3790_v20 }
0x1023   :  { %v3794_v46 = vsel %vm1068_vm6, %v3793_v10, %v3792_v0 }
0x1024   :  { %v3796_v34 = vsel %vm1070_vm7, %v3795_v49, %v3794_v46 }
0x1025   :  { %v3798_v2 = vsel %vm1072_vm8, %v3797_v37, %v3796_v34 }
0x1026   :  { %v3804_v3 = vsel %vm420_vm0, %v3798_v2, 0.0 }
0x1027   :  { %3805 = vadd.xlane.f32.xlu0 %v3804_v3 }
0x10ae   :  { %v3803_v38 = vpop.xlane.xlu1 %3802 }
0x10af   :  { %v3807_v62 = vmul.f32 0.015625, %v3803_v38 }
0x10b1   :  { %v3811_v47 = vrot.slane %v3807_v62, 1  ;;  %v3812_v39 = vrot.slane %v3807_v62, 2  ;;  %v3813_v30 = vrot.slane %v3807_v62, 3  ;;  %v3814_v31 = vrot.slane %v3807_v62, 4 }
0x10b2   :  { %v3815_v22 = vrot.slane %v3807_v62, 5  ;;  %v3816_v6 = vrot.slane %v3807_v62, 6  ;;  %v3817_v53 = vrot.slane %v3807_v62, 7  ;;  %v7688_v36 = vsub.f32 %v3739_v63, %v3807_v62 }
0x10b3   :  { %v7691_v51 = vsub.f32 %v7615_v44, %v3811_v47  ;;  %v7694_v21 = vsub.f32 %v7618_v58, %v3812_v39  ;;  %v7697_v35 = vsub.f32 %v7621_v52, %v3813_v30  ;;  %v7700_v55 = vsub.f32 %v7624_v23, %v3814_v31 }
0x10b4   :  { %v3806_v43 = vpop.xlane.xlu0 %3805  ;;  %v7703_v16 = vsub.f32 %v7627_v61, %v3815_v22  ;;  %v7706_v11 = vsub.f32 %v7630_v29, %v3816_v6  ;;  %v7708_v63 = vsub.f32 %v3746_v5, %v3817_v53  ;;  %v3857_v54 = vmul.f32 %v7688_v36, %v7688_v36 }
0x10b5   :  { %v3808_v44 = vmul.f32 0.015625, %v3806_v43  ;;  %v3858_v58 = vmul.f32 %v7691_v51, %v7691_v51  ;;  %v3859_v52 = vmul.f32 %v7694_v21, %v7694_v21  ;;  %v3860_v23 = vmul.f32 %v7697_v35, %v7697_v35 }
0x10b6   :  { %v3861_v61 = vmul.f32 %v7700_v55, %v7700_v55  ;;  %v3862_v29 = vmul.f32 %v7703_v16, %v7703_v16  ;;  %v3863_v5 = vmul.f32 %v7706_v11, %v7706_v11  ;;  %v3864_v28 = vmul.f32 %v7708_v63, %v7708_v63 }
0x10b7   :  { %v3889_v7 = vrot.slane %v3858_v58, 7  ;;  %v3891_v9 = vrot.slane %v3859_v52, 6  ;;  %v3818_v57 = vrot.slane %v3808_v44, 1  ;;  %v3893_v45 = vrot.slane %v3860_v23, 5 }
0x10b8   :  { %v3895_v18 = vrot.slane %v3861_v61, 4  ;;  %v3897_v60 = vrot.slane %v3862_v29, 3  ;;  %v3899_v4 = vrot.slane %v3863_v5, 2  ;;  %v3819_v41 = vrot.slane %v3808_v44, 2 }
0x10b9   :  { %v3890_v27 = vsel %vm1060_vm2, %v3889_v7, %v3857_v54  ;;  %v3820_v40 = vrot.slane %v3808_v44, 3  ;;  %v3821_v24 = vrot.slane %v3808_v44, 4  ;;  %v3822_v48 = vrot.slane %v3808_v44, 5 }
0x10ba   :  { %v3892_v19 = vsel %vm1062_vm3, %v3891_v9, %v3890_v27  ;;  %v3823_v20 = vrot.slane %v3808_v44, 6  ;;  %v3824_v10 = vrot.slane %v3808_v44, 7  ;;  %v7730_v49 = vsub.f32 %v7658_v1, %v3808_v44  ;;  %v5299_v27 = vld [vmem:[%s8203_s3 + $0x80] ss:$12 sps:$4 sm:$0xff]  }
0x10bb   :  { %v3894_v0 = vsel %vm1064_vm4, %v3893_v45, %v3892_v19  ;;  %v7733_v46 = vsub.f32 %v7644_v33, %v3818_v57  ;;  %v7736_v37 = vsub.f32 %v7647_v59, %v3819_v41  ;;  %v7740_v2 = vsub.f32 %v7651_v26, %v3820_v40  ;;  %v5425_v41 = vld [vmem:[#allocation6 + $0x14] ss:$8 sps:$4 sm:$0xff]   ;;  %v5426_v40 = vld [vmem:[#allocation6 + $0x24] ss:$8 sps:$4 sm:$0xff]  }
0x10bc   :  { %v3896_v34 = vsel %vm1066_vm5, %v3895_v18, %v3894_v0  ;;  %v7743_v3 = vsub.f32 %v7654_v32, %v3821_v24  ;;  %v7746_v38 = vsub.f32 %v7661_v25, %v3822_v48  ;;  %v3901_v62 = vrot.slane %v3864_v28, 1  ;;  %v5301_v24 = vld [vmem:[%s8203_s3 + $0xb0] ss:$12 sps:$4 sm:$0xff]   ;;  %v5302_v48 = vld [vmem:[%s8204_s4 + $0x40] sm:$0xff]  }
0x10bd   :  { %v3898_v1 = vsel %vm1068_vm6, %v3897_v60, %v3896_v34  ;;  %v7750_v33 = vsub.f32 %v7666_v42, %v3823_v20  ;;  %v7753_v59 = vsub.f32 %v7671_v50, %v3824_v10  ;;  %v3866_v26 = vmul.f32 %v7733_v46, %v7733_v46  ;;  %v5424_v60 = vld [vmem:[#allocation6 + $0x4] ss:$8 sps:$4 sm:$0xff]   ;;  %v5427_v19 = vld [vmem:[#allocation6 + $0x34] ss:$8 sps:$4 sm:$0xff]   ;;  %5205 = vmatpush3.bf16.msra.mxu1 %v5302_v48 }
0x10be   :  { %v3900_v47 = vsel %vm1070_vm7, %v3899_v4, %v3898_v1  ;;  %v3867_v32 = vmul.f32 %v7736_v37, %v7736_v37  ;;  %v3868_v25 = vmul.f32 %v7740_v2, %v7740_v2  ;;  %v3865_v42 = vmul.f32 %v7730_v49, %v7730_v49  ;;  %v5298_v4 = vld [vmem:[%s8203_s3 + $0x68] ss:$12 sps:$4 sm:$0xff]   ;;  %5206 = vmatprep.subr.bf16.mxu1 %v8400_v13  ;;  %v5305_v0 = vld [vmem:[%s8204_s4 + $0x58] sm:$0xff]   ;;  %v5306_v34 = vld [vmem:[%s8204_s4 + $0x60] sm:$0xff]  }
0x10bf   :  { %v3902_v39 = vsel %vm1072_vm8, %v3901_v62, %v3900_v47  ;;  %v3869_v50 = vmul.f32 %v7743_v3, %v7743_v3  ;;  %v3870_v31 = vmul.f32 %v7746_v38, %v7746_v38  ;;  %v3903_v22 = vrot.slane %v3866_v26, 7  ;;  %5193 = vmatpush3.bf16.msra.mxu0 %v5298_v4  ;;  %v5303_v20 = vld [vmem:[%s8204_s4 + $0x48] sm:$0xff]   ;;  %v5304_v10 = vld [vmem:[%s8204_s4 + $0x50] sm:$0xff]  }
0x10c0   :  { %v3919_v30 = vsel %vm420_vm0, %v3902_v39, 0.0  ;;  %v3905_v6 = vrot.slane %v3867_v32, 6  ;;  %v3871_v53 = vmul.f32 %v7750_v33, %v7750_v33  ;;  %v3872_v43 = vmul.f32 %v7753_v59, %v7753_v59  ;;  %5194 = vmatprep.subr.bf16.mxu0 %v8400_v13  ;;  %v5307_v1 = vld [vmem:[%s8204_s4 + $0x68] sm:$0xff]  }
0x10c1   :  { %3920 = vadd.xlane.f32.xlu0 %v3919_v30  ;;  %v3904_v44 = vsel %vm1060_vm2, %v3903_v22, %v3865_v42  ;;  %v3907_v58 = vrot.slane %v3868_v25, 5  ;;  %v3909_v23 = vrot.slane %v3869_v50, 4  ;;  %v3911_v61 = vrot.slane %v3870_v31, 3  ;;  %5207 = vmatpush3.bf16.msra.mxu1 %v5303_v20 }
0x10c2   :  { %v3906_v52 = vsel %vm1062_vm3, %v3905_v6, %v3904_v44  ;;  %v3913_v5 = vrot.slane %v3871_v53, 2  ;;  %v3915_v7 = vrot.slane %v3872_v43, 1  ;;  %v7784_v18 = vrot.slane %v7563_v12, %v5666_v14  ;;  %v5300_v14 = vld [vmem:[%s8203_s3 + $0x98] ss:$12 sps:$4 sm:$0xff]   ;;  %5208 = vmatprep.subr.bf16.mxu1 %v8400_v13 }
0x10c3   :  { %v3908_v54 = vsel %vm1064_vm4, %v3907_v58, %v3906_v52  ;;  %5195 = vmatpush3.bf16.msra.mxu0 %v5299_v27  ;;  %v7834_v50 = vrot.slane %v7563_v12, %v5669_v15 }
0x10c4   :  { %v3910_v29 = vsel %vm1066_vm5, %v3909_v23, %v3908_v54  ;;  %5196 = vmatprep.subr.bf16.mxu0 %v8400_v13 }
0x10c5   :  { %v3912_v28 = vsel %vm1068_vm6, %v3911_v61, %v3910_v29  ;;  %5209 = vmatpush3.bf16.msra.mxu1 %v5304_v10 }
0x10c6   :  { %v3914_v9 = vsel %vm1070_vm7, %v3913_v5, %v3912_v28  ;;  %5210 = vmatprep.subr.bf16.mxu1 %v8400_v13 }
0x10c7   :  { %v3916_v57 = vsel %vm1072_vm8, %v3915_v7, %v3914_v9  ;;  %5197 = vmatpush3.bf16.msra.mxu0 %v5300_v14 }
0x10c8   :  { %v3922_v45 = vsel %vm420_vm0, %v3916_v57, 0.0  ;;  %5198 = vmatprep.subr.bf16.mxu0 %v8400_v13 }
0x10c9   :  { %3923 = vadd.xlane.f32.xlu1 %v3922_v45  ;;  %5211 = vmatpush3.bf16.msra.mxu1 %v5305_v0 }
0x10ca   :  { %5212 = vmatprep.subr.bf16.mxu1 %v8400_v13 }
0x10cb   :  { %5199 = vmatpush3.bf16.msra.mxu0 %v5301_v24 }
0x10cc   :  { %5224 = vmatprep.subr.bf16.mxu0 %v8400_v13 }
0x10cd   :  { %5213 = vmatpush3.bf16.msra.mxu1 %v5306_v34 }
0x10ce   :  { %5214 = vmatprep.subr.bf16.mxu1 %v8400_v13 }
0x10d1   :  { %5215 = vmatpush3.bf16.msra.mxu1 %v5307_v1 }
0x10d2   :  { %5216 = vmatprep.subr.bf16.mxu1 %v8400_v13 }
0x10d7   :  { %3984 = vrot.lane.b32.xlu0 %v7784_v18, %s5530_s5 }
0x10db   :  { %4657 = vrot.lane.b32.xlu0 %v5424_v60, %s5530_s5 }
0x10df   :  { %4659 = vrot.lane.b32.xlu0 %v5425_v41, %s5530_s5 }
0x10e3   :  { %4661 = vrot.lane.b32.xlu0 %v5426_v40, %s5530_s5 }
0x10e7   :  { %4663 = vrot.lane.b32.xlu0 %v5427_v19, %s5530_s5 }
0x114e   :  { %v3921_v62 = vpop.xlane.xlu0 %3920 }
0x114f   :  { %v3925_v47 = vmul.f32 0.015625, %v3921_v62 }
0x1151   :  { %v3927_v26 = vadd.f32 1e-05, %v3925_v47 }
0x1152   :  { %v3985_v30 = vpop.permute.xlu0 %3984 }
0x1153   :  { %5410 = vrsqrt.f32 %v3927_v26 }
0x1156   :  { %v3924_v32 = vpop.xlane.xlu1 %3923 }
0x1157   :  { %v3926_v25 = vmul.f32 0.015625, %v3924_v32 }
0x1159   :  { %v3928_v39 = vadd.f32 1e-05, %v3926_v25 }
0x115b   :  { %5412 = vrsqrt.f32 %v3928_v39 }
0x115d   :  { %v5411_v42 = vpop.eup %5410 }
0x115e   :  { %v3933_v31 = vrot.slane %v5411_v42, 1  ;;  %v3934_v22 = vrot.slane %v5411_v42, 2  ;;  %v3935_v6 = vrot.slane %v5411_v42, 3  ;;  %v3936_v53 = vrot.slane %v5411_v42, 4 }
0x115f   :  { %v3937_v43 = vrot.slane %v5411_v42, 5  ;;  %v3938_v44 = vrot.slane %v5411_v42, 6  ;;  %v3939_v58 = vrot.slane %v5411_v42, 7  ;;  %v3963_v52 = vmul.f32 %v5411_v42, %v7688_v36 }
0x1160   :  { %v3964_v23 = vmul.f32 %v3933_v31, %v7691_v51  ;;  %v3965_v54 = vmul.f32 %v3934_v22, %v7694_v21  ;;  %v3966_v61 = vmul.f32 %v3935_v6, %v7697_v35  ;;  %v3967_v29 = vmul.f32 %v3936_v53, %v7700_v55 }
0x1161   :  { %v3968_v15 = vmul.f32 %v3937_v43, %v7703_v16  ;;  %v3969_v5 = vmul.f32 %v3938_v44, %v7706_v11  ;;  %v3970_v28 = vmul.f32 %v3939_v58, %v7708_v63  ;;  %v3987_v7 = vmul.f32 %v3985_v30, %v3963_v52 }
0x1162   :  { %v3988_v9 = vmul.f32 %v3985_v30, %v3964_v23  ;;  %v3989_v57 = vmul.f32 %v3985_v30, %v3965_v54  ;;  %v3990_v45 = vmul.f32 %v3985_v30, %v3966_v61  ;;  %v3991_v60 = vmul.f32 %v3985_v30, %v3967_v29 }
0x1163   :  { %v3992_v36 = vmul.f32 %v3985_v30, %v3968_v15  ;;  %v3993_v4 = vmul.f32 %v3985_v30, %v3969_v5  ;;  %v3994_v51 = vmul.f32 %v3985_v30, %v3970_v28  ;;  %v7845_v21 = vadd.f32 %v7834_v50, %v3987_v7 }
0x1164   :  { %v7848_v35 = vadd.f32 %v7834_v50, %v3988_v9  ;;  %v7851_v55 = vadd.f32 %v7834_v50, %v3989_v57  ;;  %v7854_v11 = vadd.f32 %v7834_v50, %v3990_v45  ;;  %v7857_v63 = vadd.f32 %v7834_v50, %v3991_v60 }
0x1165   :  { %v5413_v16 = vpop.eup %5412  ;;  %v7860_v27 = vadd.f32 %v7834_v50, %v3992_v36  ;;  %v7863_v41 = vadd.f32 %v7834_v50, %v3993_v4  ;;  %v4023_v61 = vpack.c.bf16 %v7845_v21, %v7845_v21 }
0x1166   :  { %v3940_v14 = vrot.slane %v5413_v16, 1  ;;  %v3941_v40 = vrot.slane %v5413_v16, 2  ;;  %v3942_v24 = vrot.slane %v5413_v16, 3  ;;  %v3943_v19 = vrot.slane %v5413_v16, 4 }
0x1167   :  { %v3944_v48 = vrot.slane %v5413_v16, 5  ;;  %v3945_v20 = vrot.slane %v5413_v16, 6  ;;  %v3946_v10 = vrot.slane %v5413_v16, 7  ;;  %v3971_v0 = vmul.f32 %v5413_v16, %v7730_v49 }
0x1168   :  { %v3972_v34 = vmul.f32 %v3940_v14, %v7733_v46  ;;  %v3973_v1 = vmul.f32 %v3941_v40, %v7736_v37  ;;  %v3974_v62 = vmul.f32 %v3942_v24, %v7740_v2  ;;  %v3975_v47 = vmul.f32 %v3943_v19, %v7743_v3 }
0x1169   :  { %v3976_v26 = vmul.f32 %v3944_v48, %v7746_v38  ;;  %v3977_v32 = vmul.f32 %v3945_v20, %v7750_v33  ;;  %v3978_v25 = vmul.f32 %v3946_v10, %v7753_v59  ;;  %v3995_v39 = vmul.f32 %v3985_v30, %v3971_v0 }
0x116a   :  { %v3996_v42 = vmul.f32 %v3985_v30, %v3972_v34  ;;  %v3997_v31 = vmul.f32 %v3985_v30, %v3973_v1  ;;  %v3998_v22 = vmul.f32 %v3985_v30, %v3974_v62  ;;  %v3999_v6 = vmul.f32 %v3985_v30, %v3975_v47 }
0x116b   :  { %v4000_v49 = vmul.f32 %v3985_v30, %v3976_v26  ;;  %v4001_v53 = vmul.f32 %v3985_v30, %v3977_v32  ;;  %v4002_v46 = vmul.f32 %v3985_v30, %v3978_v25  ;;  %v7874_v37 = vadd.f32 %v7834_v50, %v3994_v51 }
0x116c   :  { %v7877_v2 = vadd.f32 %v7834_v50, %v3996_v42  ;;  %v7880_v3 = vadd.f32 %v7834_v50, %v3997_v31  ;;  %v7883_v38 = vadd.f32 %v7834_v50, %v3998_v22  ;;  %v4024_v33 = vpack.c.bf16 %v7848_v35, %v7848_v35 }
0x116d   :  { %v7888_v59 = vadd.f32 %v7834_v50, %v3995_v39  ;;  %v7891_v30 = vadd.f32 %v7834_v50, %v3999_v6  ;;  %v7894_v43 = vadd.f32 %v7834_v50, %v4000_v49  ;;  %v4025_v44 = vpack.c.bf16 %v7851_v55, %v7851_v55 }
0x116e   :  { %v7899_v58 = vadd.f32 %v7834_v50, %v4001_v53  ;;  %v7902_v52 = vadd.f32 %v7834_v50, %v4002_v46  ;;  %v4026_v23 = vpack.c.bf16 %v7854_v11, %v7854_v11  ;;  %v4032_v54 = vpack.c.bf16 %v7877_v2, %v7877_v2 }
0x116f   :  { %v4027_v29 = vpack.c.bf16 %v7857_v63, %v7857_v63  ;;  %v4028_v15 = vpack.c.bf16 %v7860_v27, %v7860_v27  ;;  %v4033_v5 = vpack.c.bf16 %v7880_v3, %v7880_v3  ;;  %v4029_v28 = vpack.c.bf16 %v7863_v41, %v7863_v41 }
0x1170   :  { %v4030_v7 = vpack.c.bf16 %v7874_v37, %v7874_v37  ;;  %v4034_v9 = vpack.c.bf16 %v7883_v38, %v7883_v38  ;;  %v4060_v57 = vunpack.c.l.b16 %v4024_v33  ;;  %v4031_v45 = vpack.c.bf16 %v7888_v59, %v7888_v59 }
0x1171   :  { %v4035_v60 = vpack.c.bf16 %v7891_v30, %v7891_v30  ;;  %v4036_v36 = vpack.c.bf16 %v7894_v43, %v7894_v43  ;;  %v4061_v4 = vunpack.c.l.b16 %v4025_v44  ;;  %v4037_v51 = vpack.c.bf16 %v7899_v58, %v7899_v58 }
0x1172   :  { %v4038_v16 = vpack.c.bf16 %v7902_v52, %v7902_v52  ;;  %v4062_v14 = vunpack.c.l.b16 %v4026_v23  ;;  %v4068_v40 = vunpack.c.l.b16 %v4032_v54  ;;  %v4059_v24 = vunpack.c.l.b16 %v4023_v61 }
0x1173   :  { %v4063_v19 = vunpack.c.l.b16 %v4027_v29  ;;  %v4064_v48 = vunpack.c.l.b16 %v4028_v15  ;;  %v4069_v20 = vunpack.c.l.b16 %v4033_v5  ;;  %v4065_v10 = vunpack.c.l.b16 %v4029_v28 }
0x1174   :  { %v4070_v0 = vunpack.c.l.b16 %v4034_v9  ;;  %v4075_v34 = vrot.slane %v4060_v57, 7  ;;  %v4077_v1 = vrot.slane %v4061_v4, 6  ;;  %v4066_v62 = vunpack.c.l.b16 %v4030_v7 }
0x1175   :  { %v4067_v47 = vunpack.c.l.b16 %v4031_v45  ;;  %v4071_v26 = vunpack.c.l.b16 %v4035_v60  ;;  %v4072_v32 = vunpack.c.l.b16 %v4036_v36  ;;  %v4079_v39 = vrot.slane %v4062_v14, 5 }
0x1176   :  { %v4076_v25 = vsel %vm1060_vm2, %v4075_v34, %v4059_v24  ;;  %v4089_v42 = vrot.slane %v4068_v40, 7  ;;  %v4091_v31 = vrot.slane %v4069_v20, 6  ;;  %v4073_v22 = vunpack.c.l.b16 %v4037_v51  ;;  %v5308_v24 = vld [vmem:[%s8204_s4 + $0x70] sm:$0xff]  }
0x1177   :  { %v4074_v6 = vunpack.c.l.b16 %v4038_v16  ;;  %v4078_v49 = vsel %vm1062_vm3, %v4077_v1, %v4076_v25  ;;  %v4081_v53 = vrot.slane %v4063_v19, 4  ;;  %v4083_v33 = vrot.slane %v4064_v48, 3  ;;  %5217 = vmatpush3.bf16.msra.mxu1 %v5308_v24  ;;  %v5309_v19 = vld [vmem:[%s8204_s4 + $0x78] sm:$0xff]  }
0x1178   :  { %v4080_v46 = vsel %vm1064_vm4, %v4079_v39, %v4078_v49  ;;  %v4090_v44 = vsel %vm1060_vm2, %v4089_v42, %v4067_v47  ;;  %v4093_v23 = vrot.slane %v4070_v0, 5  ;;  %v4085_v61 = vrot.slane %v4065_v10, 2  ;;  %5218 = vmatprep.subr.bf16.mxu1 %v8400_v13 }
0x1179   :  { %v4082_v54 = vsel %vm1066_vm5, %v4081_v53, %v4080_v46  ;;  %v4092_v29 = vsel %vm1062_vm3, %v4091_v31, %v4090_v44  ;;  %v4095_v15 = vrot.slane %v4071_v26, 4  ;;  %v4097_v7 = vrot.slane %v4072_v32, 3 }
0x117a   :  { %v4084_v5 = vsel %vm1068_vm6, %v4083_v33, %v4082_v54  ;;  %v4094_v28 = vsel %vm1064_vm4, %v4093_v23, %v4092_v29  ;;  %v4099_v45 = vrot.slane %v4073_v22, 2  ;;  %v4087_v60 = vrot.slane %v4066_v62, 1 }
0x117b   :  { %v4086_v9 = vsel %vm1070_vm7, %v4085_v61, %v4084_v5  ;;  %v4096_v57 = vsel %vm1066_vm5, %v4095_v15, %v4094_v28  ;;  %v4101_v4 = vrot.slane %v4074_v6, 1  ;;  %5219 = vmatpush3.bf16.msra.mxu1 %v5309_v19  ;;  %v4042_v48 = vrot.slane %v7563_v12, %v5656_v8 }
0x117c   :  { %v4098_v36 = vsel %vm1068_vm6, %v4097_v7, %v4096_v57  ;;  %v4088_v16 = vsel %vm1072_vm8, %v4087_v60, %v4086_v9 }
0x117d   :  { %v4100_v51 = vsel %vm1070_vm7, %v4099_v45, %v4098_v36 }
0x117e   :  { %v4102_v14 = vsel %vm1072_vm8, %v4101_v4, %v4100_v51 }
0x117f   :  { %v4103_v40 = vpack.c.b16 %v4102_v14, %v4088_v16 }
0x1181   :  { %5201 = vmatmul.mubr.msk.bf16.vlgmr.msra.gmra.mrb[40].mxu0 %vm420_vm0, %v4103_v40 }
0x1182   :  { %5232 = vmatprep.mubr.msk.bf16.mxu0 %vm5534_vm11, %v8400_v13 }
0x1254   :  { %v4165_v20 = vpop.f32.mrb[40].mxu0 }
0x1255   :  { %v4166_v10 = vadd.f32 %v4165_v20, %v4042_v48  ;;  %v5202_v0 = vpop.f32.mrb[41].mxu0 }
0x1256   :  { %v4168_v34 = vpop.f32.mrb[42].mxu0 }
0x1257   :  { %v4169_v1 = vadd.f32 %v4168_v34, %v4042_v48  ;;  %v5203_v62 = vpop.f32.mrb[43].mxu0  ;;  %v4172_v47 = vmax.f32 %v4166_v10, 0.0 }
0x1259   :  { %v4173_v26 = vmax.f32 %v4169_v1, 0.0 }
0x125b   :  { %v4174_v32 = vpack.c.bf16 %v4173_v26, %v4172_v47 }
0x125d   :  { %5221 = vmatmul.mubr.bf16.vlgmr.msra.gmra.mrb[24].mxu1 %v4174_v32 }
0x1330   :  { %v4257_v25 = vpop.f32.mrb[24].mxu1 }
0x1331   :  { %v4258_v39 = vadd.f32 %v4257_v25, %v7784_v18  ;;  %v5222_v42 = vpop.f32.mrb[25].mxu1 }
0x1332   :  { %v4260_v31 = vpop.f32.mrb[26].mxu1 }
0x1333   :  { %v4261_v22 = vadd.f32 %v4260_v31, %v7784_v18  ;;  %v5223_v6 = vpop.f32.mrb[27].mxu1  ;;  %v4266_v49 = vrot.slane %v4258_v39, 1  ;;  %v4267_v12 = vrot.slane %v4258_v39, 2  ;;  %v4268_v53 = vrot.slane %v4258_v39, 3 }
0x1334   :  { %v4269_v46 = vrot.slane %v4258_v39, 4  ;;  %v4270_v33 = vrot.slane %v4258_v39, 5  ;;  %v4271_v44 = vrot.slane %v4258_v39, 6  ;;  %v4272_v23 = vrot.slane %v4258_v39, 7 }
0x1335   :  { %v7961_v54 = vadd.f32 %v4266_v49, %v7848_v35  ;;  %v7964_v61 = vadd.f32 %v4267_v12, %v7851_v55  ;;  %v7967_v29 = vadd.f32 %v4268_v53, %v7854_v11  ;;  %v4296_v28 = vadd.f32 %v4258_v39, %v7845_v21 }
0x1336   :  { %v7970_v15 = vadd.f32 %v4269_v46, %v7857_v63  ;;  %v7973_v18 = vadd.f32 %v4270_v33, %v7860_v27  ;;  %v7976_v5 = vadd.f32 %v4271_v44, %v7863_v41  ;;  %v4273_v55 = vrot.slane %v4261_v22, 1 }
0x1337   :  { %v4328_v35 = vrot.slane %v7961_v54, 7  ;;  %v4330_v7 = vrot.slane %v7964_v61, 6  ;;  %v4303_v9 = vadd.f32 %v4272_v23, %v7874_v37  ;;  %v4332_v11 = vrot.slane %v7967_v29, 5 }
0x1338   :  { %v4334_v63 = vrot.slane %v7970_v15, 4  ;;  %v4336_v57 = vrot.slane %v7973_v18, 3  ;;  %v4274_v45 = vrot.slane %v4261_v22, 2  ;;  %v4275_v41 = vrot.slane %v4261_v22, 3 }
0x1339   :  { %v4329_v27 = vsel %vm1060_vm2, %v4328_v35, %v4296_v28  ;;  %v4276_v60 = vrot.slane %v4261_v22, 4  ;;  %v4338_v36 = vrot.slane %v7976_v5, 2  ;;  %v4277_v4 = vrot.slane %v4261_v22, 5 }
0x133a   :  { %v4331_v21 = vsel %vm1062_vm3, %v4330_v7, %v4329_v27  ;;  %v4278_v51 = vrot.slane %v4261_v22, 6  ;;  %v4279_v37 = vrot.slane %v4261_v22, 7  ;;  %v7990_v14 = vadd.f32 %v4273_v55, %v7877_v2 }
0x133b   :  { %v4333_v16 = vsel %vm1064_vm4, %v4332_v11, %v4331_v21  ;;  %v7993_v40 = vadd.f32 %v4274_v45, %v7880_v3  ;;  %v4340_v19 = vrot.slane %v4303_v9, 1  ;;  %v7997_v48 = vadd.f32 %v4275_v41, %v7883_v38 }
0x133c   :  { %v4335_v24 = vsel %vm1066_vm5, %v4334_v63, %v4333_v16  ;;  %v8000_v20 = vadd.f32 %v4276_v60, %v7891_v30  ;;  %v8004_v0 = vadd.f32 %v4261_v22, %v7888_v59  ;;  %v8007_v2 = vadd.f32 %v4277_v4, %v7894_v43 }
0x133d   :  { %v4337_v10 = vsel %vm1068_vm6, %v4336_v57, %v4335_v24  ;;  %v4342_v3 = vrot.slane %v7990_v14, 7  ;;  %v8012_v1 = vadd.f32 %v4278_v51, %v7899_v58  ;;  %v4344_v38 = vrot.slane %v7993_v40, 6 }
0x133e   :  { %v4339_v34 = vsel %vm1070_vm7, %v4338_v36, %v4337_v10  ;;  %v8017_v62 = vadd.f32 %v4279_v37, %v7902_v52  ;;  %v4346_v43 = vrot.slane %v7997_v48, 5  ;;  %v4348_v32 = vrot.slane %v8000_v20, 4 }
0x133f   :  { %v4341_v30 = vsel %vm1072_vm8, %v4340_v19, %v4339_v34  ;;  %v4343_v59 = vsel %vm1060_vm2, %v4342_v3, %v8004_v0  ;;  %v4350_v25 = vrot.slane %v8007_v2, 3  ;;  %v4352_v52 = vrot.slane %v8012_v1, 2 }
0x1340   :  { %v4358_v47 = vsel %vm420_vm0, %v4341_v30, 0.0  ;;  %v4345_v26 = vsel %vm1062_vm3, %v4344_v38, %v4343_v59  ;;  %v4354_v31 = vrot.slane %v8017_v62, 1 }
0x1341   :  { %4359 = vadd.xlane.f32.xlu1 %v4358_v47  ;;  %v4347_v58 = vsel %vm1064_vm4, %v4346_v43, %v4345_v26 }
0x1342   :  { %v4349_v39 = vsel %vm1066_vm5, %v4348_v32, %v4347_v58 }
0x1343   :  { %v4351_v42 = vsel %vm1068_vm6, %v4350_v25, %v4349_v39 }
0x1344   :  { %v4353_v22 = vsel %vm1070_vm7, %v4352_v52, %v4351_v42 }
0x1345   :  { %v4355_v6 = vsel %vm1072_vm8, %v4354_v31, %v4353_v22 }
0x1346   :  { %v4361_v49 = vsel %vm420_vm0, %v4355_v6, 0.0 }
0x1347   :  { %4362 = vadd.xlane.f32.xlu1 %v4361_v49 }
0x13ce   :  { %v4360_v12 = vpop.xlane.xlu1 %4359 }
0x13cf   :  { %v4364_v53 = vmul.f32 0.015625, %v4360_v12 }
0x13d1   :  { %v4368_v46 = vrot.slane %v4364_v53, 1  ;;  %v4369_v33 = vrot.slane %v4364_v53, 2  ;;  %v4370_v44 = vrot.slane %v4364_v53, 3  ;;  %v4371_v23 = vrot.slane %v4364_v53, 4 }
0x13d2   :  { %v4372_v35 = vrot.slane %v4364_v53, 5  ;;  %v4373_v7 = vrot.slane %v4364_v53, 6  ;;  %v4374_v55 = vrot.slane %v4364_v53, 7  ;;  %v8034_v11 = vsub.f32 %v4296_v28, %v4364_v53 }
0x13d3   :  { %v8037_v63 = vsub.f32 %v7961_v54, %v4368_v46  ;;  %v8040_v57 = vsub.f32 %v7964_v61, %v4369_v33  ;;  %v8043_v27 = vsub.f32 %v7967_v29, %v4370_v44  ;;  %v8046_v45 = vsub.f32 %v7970_v15, %v4371_v23 }
0x13d4   :  { %v4363_v41 = vpop.xlane.xlu1 %4362  ;;  %v8049_v60 = vsub.f32 %v7973_v18, %v4372_v35  ;;  %v8052_v21 = vsub.f32 %v7976_v5, %v4373_v7  ;;  %v8054_v28 = vsub.f32 %v4303_v9, %v4374_v55  ;;  %v4414_v36 = vmul.f32 %v8034_v11, %v8034_v11 }
0x13d5   :  { %v4365_v54 = vmul.f32 0.015625, %v4363_v41  ;;  %v4415_v61 = vmul.f32 %v8037_v63, %v8037_v63  ;;  %v4416_v29 = vmul.f32 %v8040_v57, %v8040_v57  ;;  %v4417_v15 = vmul.f32 %v8043_v27, %v8043_v27 }
0x13d6   :  { %v4418_v18 = vmul.f32 %v8046_v45, %v8046_v45  ;;  %v4419_v5 = vmul.f32 %v8049_v60, %v8049_v60  ;;  %v4420_v9 = vmul.f32 %v8052_v21, %v8052_v21  ;;  %v4421_v4 = vmul.f32 %v8054_v28, %v8054_v28 }
0x13d7   :  { %v4446_v51 = vrot.slane %v4415_v61, 7  ;;  %v4448_v16 = vrot.slane %v4416_v29, 6  ;;  %v4375_v37 = vrot.slane %v4365_v54, 1  ;;  %v4450_v24 = vrot.slane %v4417_v15, 5 }
0x13d8   :  { %v4452_v19 = vrot.slane %v4418_v18, 4  ;;  %v4454_v10 = vrot.slane %v4419_v5, 3  ;;  %v4456_v3 = vrot.slane %v4420_v9, 2  ;;  %v4376_v38 = vrot.slane %v4365_v54, 2 }
0x13d9   :  { %v4447_v34 = vsel %vm1060_vm2, %v4446_v51, %v4414_v36  ;;  %v4377_v30 = vrot.slane %v4365_v54, 3  ;;  %v4378_v59 = vrot.slane %v4365_v54, 4  ;;  %v4379_v47 = vrot.slane %v4365_v54, 5 }
0x13da   :  { %v4449_v43 = vsel %vm1062_vm3, %v4448_v16, %v4447_v34  ;;  %v4380_v26 = vrot.slane %v4365_v54, 6  ;;  %v4381_v32 = vrot.slane %v4365_v54, 7  ;;  %v8076_v25 = vsub.f32 %v8004_v0, %v4365_v54 }
0x13db   :  { %v4451_v58 = vsel %vm1064_vm4, %v4450_v24, %v4449_v43  ;;  %v8079_v39 = vsub.f32 %v7990_v14, %v4375_v37  ;;  %v8082_v52 = vsub.f32 %v7993_v40, %v4376_v38  ;;  %v8086_v31 = vsub.f32 %v7997_v48, %v4377_v30  ;;  %v4658_v37 = vpop.permute.xlu0 %4657 }
0x13dc   :  { %v4453_v42 = vsel %vm1066_vm5, %v4452_v19, %v4451_v58  ;;  %v8089_v22 = vsub.f32 %v8000_v20, %v4378_v59  ;;  %v8092_v6 = vsub.f32 %v8007_v2, %v4379_v47  ;;  %v4458_v49 = vrot.slane %v4421_v4, 1  ;;  %5225 = vmatpush3.bf16.msra.mxu0 %v4658_v37  ;;  %v5428_v47 = vld [vmem:[#allocation7 + $0x8] sm:$0xff] }
0x13dd   :  { %v4455_v0 = vsel %vm1068_vm6, %v4454_v10, %v4453_v42  ;;  %v8096_v14 = vsub.f32 %v8012_v1, %v4380_v26  ;;  %v8099_v40 = vsub.f32 %v8017_v62, %v4381_v32  ;;  %v4423_v48 = vmul.f32 %v8079_v39, %v8079_v39  ;;  %5226 = vmatprep.subr.bf16.mxu0 %v8400_v13 }
0x13de   :  { %v4457_v12 = vsel %vm1070_vm7, %v4456_v3, %v4455_v0  ;;  %v4424_v20 = vmul.f32 %v8082_v52, %v8082_v52  ;;  %v4425_v2 = vmul.f32 %v8086_v31, %v8086_v31  ;;  %v4422_v1 = vmul.f32 %v8076_v25, %v8076_v25 }
0x13df   :  { %v4459_v53 = vsel %vm1072_vm8, %v4458_v49, %v4457_v12  ;;  %v4426_v62 = vmul.f32 %v8089_v22, %v8089_v22  ;;  %v4427_v33 = vmul.f32 %v8092_v6, %v8092_v6  ;;  %v4460_v44 = vrot.slane %v4423_v48, 7  ;;  %v4660_v24 = vpop.permute.xlu0 %4659 }
0x13e0   :  { %v4476_v46 = vsel %vm420_vm0, %v4459_v53, 0.0  ;;  %v4462_v23 = vrot.slane %v4424_v20, 6  ;;  %v4428_v35 = vmul.f32 %v8096_v14, %v8096_v14  ;;  %v4429_v7 = vmul.f32 %v8099_v40, %v8099_v40  ;;  %5227 = vmatpush3.bf16.msra.mxu0 %v4660_v24 }
0x13e1   :  { %4477 = vadd.xlane.f32.xlu1 %v4476_v46  ;;  %v4461_v55 = vsel %vm1060_vm2, %v4460_v44, %v4422_v1  ;;  %v4464_v41 = vrot.slane %v4425_v2, 5  ;;  %v4466_v61 = vrot.slane %v4426_v62, 4  ;;  %v4468_v15 = vrot.slane %v4427_v33, 3  ;;  %5228 = vmatprep.subr.bf16.mxu0 %v8400_v13 }
0x13e2   :  { %v4463_v54 = vsel %vm1062_vm3, %v4462_v23, %v4461_v55  ;;  %v4470_v18 = vrot.slane %v4428_v35, 2  ;;  %v4472_v9 = vrot.slane %v4429_v7, 1  ;;  %v8134_v26 = vrot.slane %v5428_v47, %v5672_v17 }
0x13e3   :  { %v4465_v29 = vsel %vm1064_vm4, %v4464_v41, %v4463_v54  ;;  %v4662_v19 = vpop.permute.xlu0 %4661 }
0x13e4   :  { %v4467_v36 = vsel %vm1066_vm5, %v4466_v61, %v4465_v29  ;;  %5229 = vmatpush3.bf16.msra.mxu0 %v4662_v19 }
0x13e5   :  { %v4469_v5 = vsel %vm1068_vm6, %v4468_v15, %v4467_v36  ;;  %5230 = vmatprep.subr.bf16.mxu0 %v8400_v13 }
0x13e6   :  { %v4471_v4 = vsel %vm1070_vm7, %v4470_v18, %v4469_v5 }
0x13e7   :  { %v4473_v51 = vsel %vm1072_vm8, %v4472_v9, %v4471_v4  ;;  %v4664_v10 = vpop.permute.xlu0 %4663 }
0x13e8   :  { %v4479_v16 = vsel %vm420_vm0, %v4473_v51, 0.0  ;;  %5231 = vmatpush3.bf16.msra.mxu0 %v4664_v10 }
0x13e9   :  { %4480 = vadd.xlane.f32.xlu1 %v4479_v16 }
0x13fa   :  { %4537 = vrot.lane.b32.xlu1 %v7834_v50, %s5530_s5 }
0x146e   :  { %v4478_v3 = vpop.xlane.xlu1 %4477 }
0x146f   :  { %v4482_v34 = vmul.f32 0.015625, %v4478_v3 }
0x1471   :  { %v4484_v38 = vadd.f32 1e-05, %v4482_v34 }
0x1473   :  { %5414 = vrsqrt.f32 %v4484_v38 }
0x1476   :  { %v4481_v30 = vpop.xlane.xlu1 %4480 }
0x1477   :  { %v4483_v50 = vmul.f32 0.015625, %v4481_v30 }
0x1479   :  { %v4485_v59 = vadd.f32 1e-05, %v4483_v50 }
0x147a   :  { %v4538_v32 = vpop.permute.xlu1 %4537 }
0x147b   :  { %5416 = vrsqrt.f32 %v4485_v59 }
0x147d   :  { %v5415_v43 = vpop.eup %5414 }
0x147e   :  { %v4490_v58 = vrot.slane %v5415_v43, 1  ;;  %v4491_v42 = vrot.slane %v5415_v43, 2  ;;  %v4492_v0 = vrot.slane %v5415_v43, 3  ;;  %v4493_v13 = vrot.slane %v5415_v43, 4 }
0x147f   :  { %v4494_v49 = vrot.slane %v5415_v43, 5  ;;  %v4495_v12 = vrot.slane %v5415_v43, 6  ;;  %v4496_v48 = vrot.slane %v5415_v43, 7  ;;  %v4520_v20 = vmul.f32 %v5415_v43, %v8034_v11 }
0x1480   :  { %v4521_v2 = vmul.f32 %v4490_v58, %v8037_v63  ;;  %v4522_v53 = vmul.f32 %v4491_v42, %v8040_v57  ;;  %v4523_v1 = vmul.f32 %v4492_v0, %v8043_v27  ;;  %v4524_v62 = vmul.f32 %v4493_v13, %v8046_v45 }
0x1481   :  { %v4525_v17 = vmul.f32 %v4494_v49, %v8049_v60  ;;  %v4526_v46 = vmul.f32 %v4495_v12, %v8052_v21  ;;  %v4527_v33 = vmul.f32 %v4496_v48, %v8054_v28  ;;  %v4540_v44 = vmul.f32 %v4538_v32, %v4520_v20 }
0x1482   :  { %v4541_v23 = vmul.f32 %v4538_v32, %v4521_v2  ;;  %v4542_v35 = vmul.f32 %v4538_v32, %v4522_v53  ;;  %v4543_v7 = vmul.f32 %v4538_v32, %v4523_v1  ;;  %v4544_v55 = vmul.f32 %v4538_v32, %v4524_v62 }
0x1483   :  { %v4545_v11 = vmul.f32 %v4538_v32, %v4525_v17  ;;  %v4546_v41 = vmul.f32 %v4538_v32, %v4526_v46  ;;  %v4547_v63 = vmul.f32 %v4538_v32, %v4527_v33  ;;  %v4560_v57 = vadd.f32 %v8134_v26, %v4540_v44 }
0x1484   :  { %v4561_v27 = vadd.f32 %v8134_v26, %v4541_v23  ;;  %v4562_v45 = vadd.f32 %v8134_v26, %v4542_v35  ;;  %v4563_v60 = vadd.f32 %v8134_v26, %v4543_v7  ;;  %v4564_v21 = vadd.f32 %v8134_v26, %v4544_v55 }
0x1485   :  { %v5417_v54 = vpop.eup %5416  ;;  %v4565_v28 = vadd.f32 %v8134_v26, %v4545_v11  ;;  %v4566_v61 = vadd.f32 %v8134_v26, %v4546_v41  ;;  %v4576_v48 = vpack.c.bf16 %v4560_v57, %v4560_v57 }
0x1486   :  { %v4497_v29 = vrot.slane %v5417_v54, 1  ;;  %v4498_v15 = vrot.slane %v5417_v54, 2  ;;  %v4499_v36 = vrot.slane %v5417_v54, 3  ;;  %v4500_v18 = vrot.slane %v5417_v54, 4 }
0x1487   :  { %v4501_v5 = vrot.slane %v5417_v54, 5  ;;  %v4502_v9 = vrot.slane %v5417_v54, 6  ;;  %v4503_v4 = vrot.slane %v5417_v54, 7  ;;  %v4528_v51 = vmul.f32 %v5417_v54, %v8076_v25 }
0x1488   :  { %v4529_v16 = vmul.f32 %v4497_v29, %v8079_v39  ;;  %v4530_v37 = vmul.f32 %v4498_v15, %v8082_v52  ;;  %v4531_v24 = vmul.f32 %v4499_v36, %v8086_v31  ;;  %v4532_v19 = vmul.f32 %v4500_v18, %v8089_v22 }
0x1489   :  { %v4533_v10 = vmul.f32 %v4501_v5, %v8092_v6  ;;  %v4534_v3 = vmul.f32 %v4502_v9, %v8096_v14  ;;  %v4535_v34 = vmul.f32 %v4503_v4, %v8099_v40  ;;  %v4548_v38 = vmul.f32 %v4538_v32, %v4528_v51 }
0x148a   :  { %v4549_v30 = vmul.f32 %v4538_v32, %v4529_v16  ;;  %v4550_v50 = vmul.f32 %v4538_v32, %v4530_v37  ;;  %v4551_v59 = vmul.f32 %v4538_v32, %v4531_v24  ;;  %v4552_v43 = vmul.f32 %v4538_v32, %v4532_v19 }
0x148b   :  { %v4553_v25 = vmul.f32 %v4538_v32, %v4533_v10  ;;  %v4554_v47 = vmul.f32 %v4538_v32, %v4534_v3  ;;  %v4555_v39 = vmul.f32 %v4538_v32, %v4535_v34  ;;  %v4567_v52 = vadd.f32 %v8134_v26, %v4547_v63 }
0x148c   :  { %v4569_v31 = vadd.f32 %v8134_v26, %v4549_v30  ;;  %v4570_v22 = vadd.f32 %v8134_v26, %v4550_v50  ;;  %v4571_v6 = vadd.f32 %v8134_v26, %v4551_v59  ;;  %v4577_v58 = vpack.c.bf16 %v4561_v27, %v4561_v27 }
0x148d   :  { %v4568_v14 = vadd.f32 %v8134_v26, %v4548_v38  ;;  %v4572_v40 = vadd.f32 %v8134_v26, %v4552_v43  ;;  %v4573_v42 = vadd.f32 %v8134_v26, %v4553_v25  ;;  %v4578_v0 = vpack.c.bf16 %v4562_v45, %v4562_v45 }
0x148e   :  { %v4574_v13 = vadd.f32 %v8134_v26, %v4554_v47  ;;  %v4575_v32 = vadd.f32 %v8134_v26, %v4555_v39  ;;  %v4579_v49 = vpack.c.bf16 %v4563_v60, %v4563_v60  ;;  %v4585_v12 = vpack.c.bf16 %v4569_v31, %v4569_v31 }
0x148f   :  { %v4580_v20 = vpack.c.bf16 %v4564_v21, %v4564_v21  ;;  %v4581_v2 = vpack.c.bf16 %v4565_v28, %v4565_v28  ;;  %v4586_v53 = vpack.c.bf16 %v4570_v22, %v4570_v22  ;;  %v4582_v1 = vpack.c.bf16 %v4566_v61, %v4566_v61 }
0x1490   :  { %v4583_v62 = vpack.c.bf16 %v4567_v52, %v4567_v52  ;;  %v4587_v17 = vpack.c.bf16 %v4571_v6, %v4571_v6  ;;  %v4613_v46 = vunpack.c.l.b16 %v4577_v58  ;;  %v4584_v33 = vpack.c.bf16 %v4568_v14, %v4568_v14 }
0x1491   :  { %v4588_v44 = vpack.c.bf16 %v4572_v40, %v4572_v40  ;;  %v4589_v23 = vpack.c.bf16 %v4573_v42, %v4573_v42  ;;  %v4614_v35 = vunpack.c.l.b16 %v4578_v0  ;;  %v4590_v7 = vpack.c.bf16 %v4574_v13, %v4574_v13  ;;  %v8401_v0 = vld [vmem:[#allocation45_spill] sm:$0xff] }
0x1492   :  { %v4591_v55 = vpack.c.bf16 %v4575_v32, %v4575_v32  ;;  %v4615_v11 = vunpack.c.l.b16 %v4579_v49  ;;  %v4621_v41 = vunpack.c.l.b16 %v4585_v12  ;;  %v4612_v63 = vunpack.c.l.b16 %v4576_v48  ;;  %v8402_v32 = vld [vmem:[#allocation46_spill] sm:$0xff]  ;;  %v8403_v49 = vld [vmem:[#allocation12_spill] sm:$0xff]  ;;  %v5429_v48 = vld [vmem:[#allocation4] sm:$0xff] }
0x1493   :  { %v4616_v26 = vunpack.c.l.b16 %v4580_v20  ;;  %v4617_v27 = vunpack.c.l.b16 %v4581_v2  ;;  %v4622_v45 = vunpack.c.l.b16 %v4586_v53  ;;  %v4618_v57 = vunpack.c.l.b16 %v4582_v1 }
0x1494   :  { %v4623_v54 = vunpack.c.l.b16 %v4587_v17  ;;  %v4628_v60 = vrot.slane %v4613_v46, 7  ;;  %v4630_v21 = vrot.slane %v4614_v35, 6  ;;  %v4619_v28 = vunpack.c.l.b16 %v4583_v62  ;;  %v8404_v46 = vld [vmem:[#allocation47_spill] sm:$0xff] }
0x1495   :  { %v4620_v61 = vunpack.c.l.b16 %v4584_v33  ;;  %v4624_v29 = vunpack.c.l.b16 %v4588_v44  ;;  %v4625_v15 = vunpack.c.l.b16 %v4589_v23  ;;  %v4632_v18 = vrot.slane %v4615_v11, 5 }
0x1496   :  { %v4629_v36 = vsel %vm1060_vm2, %v4628_v60, %v4612_v63  ;;  %v4642_v5 = vrot.slane %v4621_v41, 7  ;;  %v4644_v9 = vrot.slane %v4622_v45, 6  ;;  %v4626_v4 = vunpack.c.l.b16 %v4590_v7 }
0x1497   :  { %v4627_v51 = vunpack.c.l.b16 %v4591_v55  ;;  %v4631_v16 = vsel %vm1062_vm3, %v4630_v21, %v4629_v36  ;;  %v4634_v37 = vrot.slane %v4616_v26, 4  ;;  %v4636_v19 = vrot.slane %v4617_v27, 3 }
0x1498   :  { %v4633_v24 = vsel %vm1064_vm4, %v4632_v18, %v4631_v16  ;;  %v4643_v10 = vsel %vm1060_vm2, %v4642_v5, %v4620_v61  ;;  %v4646_v3 = vrot.slane %v4623_v54, 5  ;;  %v4638_v38 = vrot.slane %v4618_v57, 2 }
0x1499   :  { %v4635_v34 = vsel %vm1066_vm5, %v4634_v37, %v4633_v24  ;;  %v4645_v30 = vsel %vm1062_vm3, %v4644_v9, %v4643_v10  ;;  %v4648_v50 = vrot.slane %v4624_v29, 4  ;;  %v4650_v25 = vrot.slane %v4625_v15, 3 }
0x149a   :  { %v4637_v59 = vsel %vm1068_vm6, %v4636_v19, %v4635_v34  ;;  %v4647_v43 = vsel %vm1064_vm4, %v4646_v3, %v4645_v30  ;;  %v4652_v52 = vrot.slane %v4626_v4, 2  ;;  %v4640_v31 = vrot.slane %v4619_v28, 1 }
0x149b   :  { %v4639_v47 = vsel %vm1070_vm7, %v4638_v38, %v4637_v59  ;;  %v4649_v39 = vsel %vm1066_vm5, %v4648_v50, %v4647_v43  ;;  %v4654_v6 = vrot.slane %v4627_v51, 1  ;;  %v4858_v13 = vrot.slane %v8401_v0, %v6518_v56  ;;  %v8405_v56 = vld [vmem:[#allocation15_spill] sm:$0xff] }
0x149c   :  { %v4651_v22 = vsel %vm1068_vm6, %v4650_v25, %v4649_v39  ;;  %v4641_v14 = vsel %vm1072_vm8, %v4640_v31, %v4639_v47  ;;  %v4854_v12 = vrot.slane %v8403_v49, %v8402_v32  ;;  %v4595_v20 = vrot.slane %v5429_v48, %v5656_v8 }
0x149d   :  { %v4653_v58 = vsel %vm1070_vm7, %v4652_v52, %v4651_v22 }
0x149e   :  { %v4655_v40 = vsel %vm1072_vm8, %v4654_v6, %v4653_v58  ;;  %v4859_v53 = vsel %vm4723_vm10, %v4858_v13, %v4854_v12 }
0x149f   :  { %v4656_v42 = vpack.c.b16 %v4655_v40, %v4641_v14  ;;  %v4873_v7 = vsel %vm1072_vm8, %v4859_v53, %v8405_v56 }
0x14a1   :  { %5233 = vmatmul.mubr.msk.bf16.vlgmr.msra.gmra.mrb[44].mxu0 %vm420_vm0, %v4656_v42 }
0x1574   :  { %v4706_v2 = vpop.f32.mrb[44].mxu0 }
0x1575   :  { %v4707_v1 = vadd.f32 %v4706_v2, %v4595_v20  ;;  %v5234_v62 = vpop.f32.mrb[45].mxu0 }
0x1576   :  { %v4709_v17 = vpop.f32.mrb[46].mxu0 }
0x1577   :  { %v4876_v33 = vsel %vm1083_vm9, %v4707_v1, %v8404_v46  ;;  %v4710_v44 = vadd.f32 %v4709_v17, %v4595_v20  ;;  %v5235_v23 = vpop.f32.mrb[47].mxu0 }
0x1578   :  { %v4879_v35 = vsel %vm4878_vm12, %v4876_v33, 0.0 }
0x1579   :  { %4881 = vst [vmem:[%s8206_s6] sm:$0xff] %v4879_v35  ;;  %v4877_v8 = vsel %vm1083_vm9, %v4710_v44, %v4873_v7 }
0x157a   :  { %v4880_v55 = vsel %vm4878_vm12, %v4877_v8, 0.0 }
0x157b   :  { %4882 = vst [vmem:[%s8206_s6 + $0x8] sm:$0xff] %v4880_v55 }
0x157c   :  { %4887 = vsyncpa [#allocation3], 1 }
0x157d   :  { %4888 = vsyncpa [#allocation5], 1 }
0x157e   :  { %4889 = vsyncpa [#allocation8], 1 }

</bundles_post_ra>
